<compile_context>
chip_gen: v6e
topology: v6e:2x2x1
jax: 0.10.0
libtpu: 0.0.40
codegen_flags: <defaults>
</compile_context>

<pallas_src>
import functools
import math

import jax
import jax.numpy as jnp
from jax import lax
from jax.experimental import pallas as pl
from jax.experimental.pallas import tpu as pltpu

# ---- model constants (match the PyTorch module) ----
EMBEDS = 100                     # embeds_size
NUM_HEADS = 4
HEAD_DIM = EMBEDS // NUM_HEADS   # 25
NUM_CLASSES = 2
LN_EPS = 1e-5
LEAKY_SLOPE = 0.01               # nn.LeakyReLU default

# ---- TPU-padded widths ----
E_PAD = 128                      # embeds padded to native lane width
D_PAD = 32                       # per-head dim 25 -> 32
FF_PAD = 256                     # 2*embeds 200 -> 256
C_PAD = 128                      # lane-dense classifier output (2 -> 128)
NEG_PAD = -1e30                  # pad logit bias -> exp underflows to 0

# ---- per-tile VMEM budgets used to size btile ----
_TOKENS_PER_TILE = 2048          # rows of the (N, 128..256) f32 activation slabs
_SCORE_BYTES_BUDGET = 8 << 20    # f32 (btile, Tp, Tp) score/prob temporaries


def _leaky_relu(x):
    return jnp.where(x > 0, x, LEAKY_SLOPE * x)


def _layernorm_padded(x, gamma, beta):
    # x: (N, E_PAD) f32 with zeros in pad lanes (>= EMBEDS).  Statistics are
    # over the real EMBEDS lanes only (pads contribute 0 to both sums); pad
    # lanes of the output stay 0 because gamma/beta are zero-padded.
    inv_e = 1.0 / EMBEDS
    mu = jnp.sum(x, axis=-1, keepdims=True) * inv_e
    msq = jnp.sum(x * x, axis=-1, keepdims=True) * inv_e
    var = msq - mu * mu
    return (x - mu) * lax.rsqrt(var + LN_EPS) * gamma + beta


def disc_kernel(x_ref,
                wqkv_ref, bqkv_ref, wo_ref, bo_ref,
                g1_ref, be1_ref,
                wf1_ref, bf1_ref, wf2_ref, bf2_ref,
                g2_ref, be2_ref,
                wc1_ref, bc1_ref, wc2_ref, bc2_ref, wc3_ref, bc3_ref,
                out_ref, *, t_real):
    bt, tp, ep = x_ref.shape
    n = bt * tp
    x_bf = x_ref[...].reshape(n, ep)                       # (N, 128) bf16 token slab
    x_f32 = x_bf.astype(jnp.float32)

    scale = 1.0 / math.sqrt(HEAD_DIM)

    # ---- fused QKV projection: one full-width MXU matmul ----
    qkv = jnp.dot(x_bf, wqkv_ref[...],
                  preferred_element_type=jnp.float32) + bqkv_ref[...]   # (N, 384)
    qkv_bf = qkv.astype(jnp.bfloat16)

    # key mask for padded sequence positions (static decision at trace time)
    if tp != t_real:
        key_bias = jnp.where(
            lax.broadcasted_iota(jnp.int32, (1, 1, tp), 2) < t_real, 0.0, NEG_PAD)
    else:
        key_bias = None

    # ---- per-head attention core (H = 4, static unroll; T^2 buffers sized
    #      into the btile formula) ----
    ctx_heads = []
    for h in range(NUM_HEADS):
        q_h = qkv_bf[:, h * D_PAD:(h + 1) * D_PAD].reshape(bt, tp, D_PAD)
        k_h = qkv_bf[:, E_PAD + h * D_PAD:E_PAD + (h + 1) * D_PAD].reshape(bt, tp, D_PAD)
        v_h = qkv_bf[:, 2 * E_PAD + h * D_PAD:2 * E_PAD + (h + 1) * D_PAD].reshape(bt, tp, D_PAD)
        s = lax.dot_general(q_h, k_h,
                            dimension_numbers=(((2,), (2,)), ((0,), (0,))),
                            preferred_element_type=jnp.float32) * scale   # (bt,Tp,Tp)
        if key_bias is not None:
            s = s + key_bias
        s = s - jnp.max(s, axis=-1, keepdims=True)
        p = jnp.exp(s)
        p = p * pl.reciprocal(jnp.sum(p, axis=-1, keepdims=True), approx=True)
        ctx = lax.dot_general(p.astype(jnp.bfloat16), v_h,
                              dimension_numbers=(((2,), (1,)), ((0,), (0,))),
                              preferred_element_type=jnp.float32)          # (bt,Tp,32)
        ctx_heads.append(ctx.reshape(n, D_PAD).astype(jnp.bfloat16))

    # ---- fused out-projection: concat heads lane-dense, one 128x128 matmul ----
    ctx_all = jnp.concatenate(ctx_heads, axis=-1)                          # (N, 128) bf16
    attn = jnp.dot(ctx_all, wo_ref[...],
                   preferred_element_type=jnp.float32) + bo_ref[...]
    # TODO(synk): nn.Dropout layers are identity (eval / inference semantics).

    # ---- ln1(x + attn) ----
    y1 = _layernorm_padded(x_f32 + attn, g1_ref[...], be1_ref[...])

    # ---- FFN: Linear(E, 2E) -> LeakyReLU -> Linear(2E, E) ----
    h1 = _leaky_relu(jnp.dot(y1.astype(jnp.bfloat16), wf1_ref[...],
                             preferred_element_type=jnp.float32) + bf1_ref[...])
    h2 = jnp.dot(h1.astype(jnp.bfloat16), wf2_ref[...],
                 preferred_element_type=jnp.float32) + bf2_ref[...]

    # ---- ln2(y1 + ffn) ----
    y2 = _layernorm_padded(y1 + h2, g2_ref[...], be2_ref[...])

    # ---- mean over the real sequence positions: sublane reduce (no MXU) ----
    y3 = y2.reshape(bt, tp, ep)
    if tp != t_real:
        row_mask = (lax.broadcasted_iota(jnp.int32, (1, tp, 1), 1)
                    < t_real).astype(jnp.float32)
        y3 = y3 * row_mask
    pooled = jnp.sum(y3, axis=1) * (1.0 / t_real)                          # (bt, 128)

    # ---- classifier head: Linear -> LeakyReLU -> (Dropout) -> Linear ->
    #      LeakyReLU -> Linear -> Softmax(dim=1) ----
    c = _leaky_relu(jnp.dot(pooled.astype(jnp.bfloat16), wc1_ref[...],
                            preferred_element_type=jnp.float32) + bc1_ref[...])
    c = _leaky_relu(jnp.dot(c.astype(jnp.bfloat16), wc2_ref[...],
                            preferred_element_type=jnp.float32) + bc2_ref[...])
    logits = jnp.dot(c.astype(jnp.bfloat16), wc3_ref[...],
                     preferred_element_type=jnp.float32) + bc3_ref[...]
    # pad classes carry a -1e30 bias -> after max-subtraction exp underflows to 0
    logits = logits - jnp.max(logits, axis=-1, keepdims=True)
    e = jnp.exp(logits)
    probs = e / jnp.sum(e, axis=-1, keepdims=True)
    out_ref[0, :, :] = probs


def _pad_2d(w, rows, cols):
    out = jnp.zeros((rows, cols), jnp.float32)
    return out.at[:w.shape[0], :w.shape[1]].set(w.astype(jnp.float32))


def _prepare_weights(params):
    """Pad / pack PyTorch-layout params to TPU-friendly (bf16 matmul) shapes."""
    E, D, H = EMBEDS, HEAD_DIM, NUM_HEADS
    bf16 = jnp.bfloat16

    w_in = params["w_in"].astype(jnp.float32)     # (E, 3E)   x @ w_in = [q|k|v]
    b_in = params["b_in"].astype(jnp.float32)     # (1, 3E)
    w_out = params["w_out"].astype(jnp.float32)   # (E, E)    ctx @ w_out
    b_out = params["b_out"]

    # Fused QKV weight: (128, 384).  Lane blocks [0:128]=Q, [128:256]=K,
    # [256:384]=V; inside each block head h occupies lanes [h*32 : h*32+25].
    w_qkv = jnp.zeros((E_PAD, 3 * E_PAD), jnp.float32)
    b_qkv = jnp.zeros((1, 3 * E_PAD), jnp.float32)
    for p_idx in range(3):
        for h in range(H):
            src_lo = p_idx * E + h * D
            dst_lo = p_idx * E_PAD + h * D_PAD
            w_qkv = w_qkv.at[:E, dst_lo:dst_lo + D].set(w_in[:, src_lo:src_lo + D])
            b_qkv = b_qkv.at[0, dst_lo:dst_lo + D].set(b_in[0, src_lo:src_lo + D])

    # Out-projection packed to the same head-major 32-lane layout on its rows.
    w_o = jnp.zeros((E_PAD, E_PAD), jnp.float32)
    for h in range(H):
        w_o = w_o.at[h * D_PAD:h * D_PAD + D, :E].set(w_out[h * D:(h + 1) * D, :])
    b_o = _pad_2d(b_out, 1, E_PAD)

    wc3 = _pad_2d(params["wc3"], E_PAD, C_PAD)
    bc3 = jnp.full((1, C_PAD), NEG_PAD, jnp.float32)
    bc3 = bc3.at[0, :NUM_CLASSES].set(params["bc3"][0].astype(jnp.float32))

    return [
        w_qkv.astype(bf16), b_qkv,
        w_o.astype(bf16), b_o,
        _pad_2d(params["ln1_g"], 1, E_PAD), _pad_2d(params["ln1_b"], 1, E_PAD),
        _pad_2d(params["wf1"], E_PAD, FF_PAD).astype(bf16), _pad_2d(params["bf1"], 1, FF_PAD),
        _pad_2d(params["wf2"], FF_PAD, E_PAD).astype(bf16), _pad_2d(params["bf2"], 1, E_PAD),
        _pad_2d(params["ln2_g"], 1, E_PAD), _pad_2d(params["ln2_b"], 1, E_PAD),
        _pad_2d(params["wc1"], E_PAD, E_PAD).astype(bf16), _pad_2d(params["bc1"], 1, E_PAD),
        _pad_2d(params["wc2"], E_PAD, E_PAD).astype(bf16), _pad_2d(params["bc2"], 1, E_PAD),
        wc3.astype(bf16), bc3,
    ]


def _rep_spec(a):
    nd = a.ndim
    return pl.BlockSpec(a.shape, lambda i, _nd=nd: (0,) * _nd)


def discriminator_forward(seq, params, btile=None):
    """seq: (B, T) int32 token ids -> (B, num_classes) probabilities."""
    B, T = seq.shape
    Tp = ((T + 7) // 8) * 8                    # sublane-aligned sequence length

    # Embedding gather + positional add: plain-JAX glue (data-dependent gather).
    x = params["tok_emb"][seq] + params["pos_emb"][:T]          # (B, T, E) f32

    # ---- VMEM-aware batch tile: function of Tp, with >= 2 grid steps ----
    if btile is None:
        cap_tokens = max(1, _TOKENS_PER_TILE // Tp)
        cap_scores = max(1, _SCORE_BYTES_BUDGET // (2 * NUM_HEADS * 4 * Tp * Tp))
        btile = max(1, min(128, cap_tokens, cap_scores))
        if B >= 2:
            btile = min(btile, (B + 1) // 2)   # keep both TensorCores busy (v7x)
    btile = max(1, int(btile))
    Bp = pl.cdiv(B, btile) * btile
    num_tiles = Bp // btile

    # Zero-pad batch/sequence/lanes; store the activation slab in bf16 (halves
    # the HBM pass and the x-block DMA bytes).
    xp = jnp.zeros((Bp, Tp, E_PAD), jnp.bfloat16)
    xp = xp.at[:B, :T, :EMBEDS].set(x.astype(jnp.bfloat16))

    weights = _prepare_weights(params)

    # ---- explicit VMEM limit sized from the tile ----
    n_tok = btile * Tp
    w_bytes = sum(int(w.size) * w.dtype.itemsize for w in weights)
    est_vmem = (2 * n_tok * E_PAD * 2                      # x block, double-buffered
                + 10 * n_tok * E_PAD * 4                   # f32 activation slabs
                + n_tok * FF_PAD * 4                       # FFN hidden
                + 2 * NUM_HEADS * btile * Tp * Tp * 4      # score / prob temporaries
                + 2 * w_bytes                              # double-buffered weights
                + (4 << 20))                               # margin
    vmem_limit = int(min(48 << 20, max(32 << 20, est_vmem)))

    # ---- advisory cost estimate ----
    mm_flops = (2 * n_tok * E_PAD * (3 * E_PAD + E_PAD + FF_PAD + FF_PAD)
                + 2 * NUM_HEADS * btile * Tp * Tp * D_PAD * 2
                + 2 * btile * E_PAD * (E_PAD + E_PAD + C_PAD))
    cost = pl.CostEstimate(
        flops=int(num_tiles * mm_flops),
        transcendentals=int(num_tiles * (NUM_HEADS * btile * Tp * Tp
                                         + btile * C_PAD + 2 * n_tok)),
        bytes_accessed=int(xp.size * 2 + Bp * C_PAD * 4 + num_tiles * w_bytes),
    )

    in_specs = [pl.BlockSpec((btile, Tp, E_PAD), lambda i: (i, 0, 0))] + \
               [_rep_spec(w) for w in weights]
    # 3-D output so the trailing two block dims always equal the full array
    # dims (valid for any btile), and the output stays lane-dense (128 wide).
    out_spec = pl.BlockSpec((1, btile, C_PAD), lambda i: (i, 0, 0))

    out = pl.pallas_call(
        functools.partial(disc_kernel, t_real=T),
        out_shape=jax.ShapeDtypeStruct((num_tiles, btile, C_PAD), jnp.float32),
        grid_spec=pltpu.PrefetchScalarGridSpec(
            num_scalar_prefetch=0,
            grid=(num_tiles,),
            in_specs=in_specs,
            out_specs=out_spec,
        ),
        compiler_params=pltpu.CompilerParams(
            dimension_semantics=("parallel",),
            vmem_limit_bytes=vmem_limit),
        cost_estimate=cost,
    )(xp, *weights)

    return out.reshape(Bp, C_PAD)[:B, :NUM_CLASSES]          # (B, num_classes)


def _reference_forward(seq, params):
    """Pure-JAX f32 reference of the PyTorch forward (eval mode)."""
    B, T = seq.shape
    E, H, D = EMBEDS, NUM_HEADS, HEAD_DIM

    def leaky(z):
        return jnp.where(z > 0, z, LEAKY_SLOPE * z)

    def ln(z, g, b):
        mu = z.mean(-1, keepdims=True)
        var = z.var(-1, keepdims=True)
        return (z - mu) / jnp.sqrt(var + LN_EPS) * g + b

    x = params["tok_emb"][seq] + params["pos_emb"][:T]
    qkv = x @ params["w_in"] + params["b_in"]
    q, k, v = qkv[..., :E], qkv[..., E:2 * E], qkv[..., 2 * E:]

    def split(a):
        return a.reshape(B, T, H, D).transpose(0, 2, 1, 3)

    qh, kh, vh = split(q), split(k), split(v)
    s = jnp.einsum("bhqd,bhkd->bhqk", qh, kh) / math.sqrt(D)
    p = jax.nn.softmax(s, axis=-1)
    ctx = jnp.einsum("bhqk,bhkd->bhqd", p, vh).transpose(0, 2, 1, 3).reshape(B, T, E)
    attn = ctx @ params["w_out"] + params["b_out"]
    y1 = ln(x + attn, params["ln1_g"], params["ln1_b"])
    ffn = leaky(y1 @ params["wf1"] + params["bf1"]) @ params["wf2"] + params["bf2"]
    y2 = ln(y1 + ffn, params["ln2_g"], params["ln2_b"])
    pooled = y2.mean(axis=1)
    c = leaky(pooled @ params["wc1"] + params["bc1"])
    c = leaky(c @ params["wc2"] + params["bc2"])
    logits = c @ params["wc3"] + params["bc3"]
    return jax.nn.softmax(logits, axis=-1)


def init_params(key, vocab_size, block_size):
    """Deterministic synthetic parameters (shapes match the PyTorch module)."""
    ks = jax.random.split(key, 16)
    s = 0.02

    def nrm(k, shape):
        return (s * jax.random.normal(k, shape)).astype(jnp.float32)

    E, H2 = EMBEDS, 2 * EMBEDS
    return {
        "tok_emb": nrm(ks[0], (vocab_size, E)),
        "pos_emb": nrm(ks[1], (block_size, E)),
        # MultiheadAttention: in_proj (3E, E) pre-transposed to (E, 3E)
        "w_in":  nrm(ks[2], (E, 3 * E)),
        "b_in":  jnp.zeros((1, 3 * E), jnp.float32),
        "w_out": nrm(ks[3], (E, E)),
        "b_out": jnp.zeros((1, E), jnp.float32),
        "ln1_g": jnp.ones((1, E), jnp.float32),
        "ln1_b": jnp.zeros((1, E), jnp.float32),
        "wf1": nrm(ks[4], (E, H2)),
        "bf1": jnp.zeros((1, H2), jnp.float32),
        "wf2": nrm(ks[5], (H2, E)),
        "bf2": jnp.zeros((1, E), jnp.float32),
        "ln2_g": jnp.ones((1, E), jnp.float32),
        "ln2_b": jnp.zeros((1, E), jnp.float32),
        "wc1": nrm(ks[6], (E, E)),
        "bc1": jnp.zeros((1, E), jnp.float32),
        "wc2": nrm(ks[7], (E, E)),
        "bc2": jnp.zeros((1, E), jnp.float32),
        "wc3": nrm(ks[8], (E, NUM_CLASSES)),
        "bc3": jnp.zeros((1, NUM_CLASSES), jnp.float32),
    }


if __name__ == "__main__":
    B, T = 8, 16            # small demo sizes (T <= block_size = 200)
    vocab_size = 1000       # small synthetic vocab
    block_size = 200

    key = jax.random.PRNGKey(0)
    k_params, k_seq = jax.random.split(key)
    params = init_params(k_params, vocab_size, block_size)
    seq = jax.random.randint(k_seq, (B, T), 0, vocab_size, dtype=jnp.int32)

    probs = discriminator_forward(seq, params)
    probs = jax.block_until_ready(probs)

    assert probs.shape == (B, NUM_CLASSES)
    assert bool(jnp.all(jnp.isfinite(probs)))
    # rows of a softmax must sum to 1
    assert bool(jnp.allclose(jnp.sum(probs, axis=-1), 1.0, atol=1e-3))
    # loose check vs the pure-JAX f32 reference (bf16 matmul operands)
    ref = _reference_forward(seq, params)
    assert bool(jnp.max(jnp.abs(probs - ref)) < 5e-2)
    print("KERNEL_OK")
</pallas_src>

<mosaic_0001>
module attributes {stable_mosaic.version = 11 : i64} {
  func.func @disc_kernel(%arg0: i32, %arg1: memref<4x16x128xbf16, #tpu.memory_space<vmem>>, %arg2: memref<128x384xbf16, #tpu.memory_space<vmem>>, %arg3: memref<1x384xf32, #tpu.memory_space<vmem>>, %arg4: memref<128x128xbf16, #tpu.memory_space<vmem>>, %arg5: memref<1x128xf32, #tpu.memory_space<vmem>>, %arg6: memref<1x128xf32, #tpu.memory_space<vmem>>, %arg7: memref<1x128xf32, #tpu.memory_space<vmem>>, %arg8: memref<128x256xbf16, #tpu.memory_space<vmem>>, %arg9: memref<1x256xf32, #tpu.memory_space<vmem>>, %arg10: memref<256x128xbf16, #tpu.memory_space<vmem>>, %arg11: memref<1x128xf32, #tpu.memory_space<vmem>>, %arg12: memref<1x128xf32, #tpu.memory_space<vmem>>, %arg13: memref<1x128xf32, #tpu.memory_space<vmem>>, %arg14: memref<128x128xbf16, #tpu.memory_space<vmem>>, %arg15: memref<1x128xf32, #tpu.memory_space<vmem>>, %arg16: memref<128x128xbf16, #tpu.memory_space<vmem>>, %arg17: memref<1x128xf32, #tpu.memory_space<vmem>>, %arg18: memref<128x128xbf16, #tpu.memory_space<vmem>>, %arg19: memref<1x128xf32, #tpu.memory_space<vmem>>, %arg20: memref<1x4x128xf32, #tpu.memory_space<vmem>>) attributes {dimension_semantics = [#tpu.dimension_semantics<parallel>], iteration_bounds = array<i64: 2>, scalar_prefetch = 0 : i64, scratch_operands = 0 : i64, tpu.core_type = #tpu.core_type<tc>, window_params = [{transform_indices = @transform_0, window_bounds = array<i64: 4, 16, 128>}, {pipeline_mode = #tpu.pipeline_mode<synchronous>, transform_indices = @transform_1, window_bounds = array<i64: 128, 384>}, {pipeline_mode = #tpu.pipeline_mode<synchronous>, transform_indices = @transform_2, window_bounds = array<i64: 1, 384>}, {pipeline_mode = #tpu.pipeline_mode<synchronous>, transform_indices = @transform_3, window_bounds = array<i64: 128, 128>}, {pipeline_mode = #tpu.pipeline_mode<synchronous>, transform_indices = @transform_4, window_bounds = array<i64: 1, 128>}, {pipeline_mode = #tpu.pipeline_mode<synchronous>, transform_indices = @transform_5, window_bounds = array<i64: 1, 128>}, {pipeline_mode = #tpu.pipeline_mode<synchronous>, transform_indices = @transform_6, window_bounds = array<i64: 1, 128>}, {pipeline_mode = #tpu.pipeline_mode<synchronous>, transform_indices = @transform_7, window_bounds = array<i64: 128, 256>}, {pipeline_mode = #tpu.pipeline_mode<synchronous>, transform_indices = @transform_8, window_bounds = array<i64: 1, 256>}, {pipeline_mode = #tpu.pipeline_mode<synchronous>, transform_indices = @transform_9, window_bounds = array<i64: 256, 128>}, {pipeline_mode = #tpu.pipeline_mode<synchronous>, transform_indices = @transform_10, window_bounds = array<i64: 1, 128>}, {pipeline_mode = #tpu.pipeline_mode<synchronous>, transform_indices = @transform_11, window_bounds = array<i64: 1, 128>}, {pipeline_mode = #tpu.pipeline_mode<synchronous>, transform_indices = @transform_12, window_bounds = array<i64: 1, 128>}, {pipeline_mode = #tpu.pipeline_mode<synchronous>, transform_indices = @transform_13, window_bounds = array<i64: 128, 128>}, {pipeline_mode = #tpu.pipeline_mode<synchronous>, transform_indices = @transform_14, window_bounds = array<i64: 1, 128>}, {pipeline_mode = #tpu.pipeline_mode<synchronous>, transform_indices = @transform_15, window_bounds = array<i64: 128, 128>}, {pipeline_mode = #tpu.pipeline_mode<synchronous>, transform_indices = @transform_16, window_bounds = array<i64: 1, 128>}, {pipeline_mode = #tpu.pipeline_mode<synchronous>, transform_indices = @transform_17, window_bounds = array<i64: 128, 128>}, {pipeline_mode = #tpu.pipeline_mode<synchronous>, transform_indices = @transform_18, window_bounds = array<i64: 1, 128>}, {transform_indices = @transform_19, window_bounds = array<i64: 1, 4, 128>}]} {
    %c0 = arith.constant 0 : index
    %c0_0 = arith.constant 0 : index
    %c0_1 = arith.constant 0 : index
    %0 = vector.load %arg1[%c0, %c0_0, %c0_1] : memref<4x16x128xbf16, #tpu.memory_space<vmem>>, vector<4x16x128xbf16>
    %1 = vector.shape_cast %0 : vector<4x16x128xbf16> to vector<64x128xbf16>
    %2 = arith.extf %1 : vector<64x128xbf16> to vector<64x128xf32>
    %c0_2 = arith.constant 0 : index
    %c0_3 = arith.constant 0 : index
    %3 = vector.load %arg2[%c0_2, %c0_3] : memref<128x384xbf16, #tpu.memory_space<vmem>>, vector<128x384xbf16>
    %cst = arith.constant dense<0.000000e+00> : vector<64x384xf32>
    %4 = tpu.matmul %1, %3, %cst {dimension_numbers = #tpu.dot_dimension_numbers<[1], [0], [0], [1], [0, 0, 1, 1], [], []>} : vector<64x128xbf16>, vector<128x384xbf16>, vector<64x384xf32> -> vector<64x384xf32>
    %c0_4 = arith.constant 0 : index
    %c0_5 = arith.constant 0 : index
    %5 = vector.load %arg3[%c0_4, %c0_5] : memref<1x384xf32, #tpu.memory_space<vmem>>, vector<1x384xf32>
    %6 = vector.broadcast %5 : vector<1x384xf32> to vector<64x384xf32>
    %7 = arith.addf %4, %6 : vector<64x384xf32>
    %8 = arith.truncf %7 : vector<64x384xf32> to vector<64x384xbf16>
    %9 = vector.extract_strided_slice %8 {offsets = [0, 0], sizes = [64, 32], strides = [1, 1]} : vector<64x384xbf16> to vector<64x32xbf16>
    %10 = vector.shape_cast %9 : vector<64x32xbf16> to vector<4x16x32xbf16>
    %11 = vector.extract_strided_slice %8 {offsets = [0, 128], sizes = [64, 32], strides = [1, 1]} : vector<64x384xbf16> to vector<64x32xbf16>
    %12 = vector.shape_cast %11 : vector<64x32xbf16> to vector<4x16x32xbf16>
    %13 = vector.extract_strided_slice %8 {offsets = [0, 256], sizes = [64, 32], strides = [1, 1]} : vector<64x384xbf16> to vector<64x32xbf16>
    %14 = vector.shape_cast %13 : vector<64x32xbf16> to vector<4x16x32xbf16>
    %cst_6 = arith.constant dense<0.000000e+00> : vector<4x16x16xf32>
    %15 = tpu.matmul %10, %12, %cst_6 {dimension_numbers = #tpu.dot_dimension_numbers<[2], [2], [1], [1], [0, 0, 0, 1, 1, 1], [0], [0]>} : vector<4x16x32xbf16>, vector<4x16x32xbf16>, vector<4x16x16xf32> -> vector<4x16x16xf32>
    %cst_7 = arith.constant 2.000000e-01 : f32
    %16 = vector.broadcast %cst_7 : f32 to vector<4x16x16xf32>
    %17 = arith.mulf %15, %16 : vector<4x16x16xf32>
    %cst_8 = arith.constant dense<0xFF800000> : vector<4x16xf32>
    %18 = vector.multi_reduction <maximumf>, %17, %cst_8 [2] : vector<4x16x16xf32> to vector<4x16xf32>
    %19 = vector.shape_cast %18 : vector<4x16xf32> to vector<4x16x1xf32>
    %20 = vector.broadcast %19 : vector<4x16x1xf32> to vector<4x16x16xf32>
    %21 = arith.subf %17, %20 : vector<4x16x16xf32>
    %22 = math.exp %21 : vector<4x16x16xf32>
    %cst_9 = arith.constant dense<0.000000e+00> : vector<4x16xf32>
    %23 = vector.multi_reduction <add>, %22, %cst_9 [2] : vector<4x16x16xf32> to vector<4x16xf32>
    %24 = vector.shape_cast %23 : vector<4x16xf32> to vector<4x16x1xf32>
    %25 = tpu.reciprocal %24 {approx = true} : vector<4x16x1xf32> -> vector<4x16x1xf32>
    %26 = vector.broadcast %25 : vector<4x16x1xf32> to vector<4x16x16xf32>
    %27 = arith.mulf %22, %26 : vector<4x16x16xf32>
    %28 = arith.truncf %27 : vector<4x16x16xf32> to vector<4x16x16xbf16>
    %cst_10 = arith.constant dense<0.000000e+00> : vector<4x16x32xf32>
    %29 = tpu.matmul %28, %14, %cst_10 {dimension_numbers = #tpu.dot_dimension_numbers<[2], [1], [1], [2], [0, 0, 0, 1, 1, 2], [0], [0]>} : vector<4x16x16xbf16>, vector<4x16x32xbf16>, vector<4x16x32xf32> -> vector<4x16x32xf32>
    %30 = vector.shape_cast %29 : vector<4x16x32xf32> to vector<64x32xf32>
    %31 = arith.truncf %30 : vector<64x32xf32> to vector<64x32xbf16>
    %32 = vector.extract_strided_slice %8 {offsets = [0, 32], sizes = [64, 32], strides = [1, 1]} : vector<64x384xbf16> to vector<64x32xbf16>
    %33 = vector.shape_cast %32 : vector<64x32xbf16> to vector<4x16x32xbf16>
    %34 = vector.extract_strided_slice %8 {offsets = [0, 160], sizes = [64, 32], strides = [1, 1]} : vector<64x384xbf16> to vector<64x32xbf16>
    %35 = vector.shape_cast %34 : vector<64x32xbf16> to vector<4x16x32xbf16>
    %36 = vector.extract_strided_slice %8 {offsets = [0, 288], sizes = [64, 32], strides = [1, 1]} : vector<64x384xbf16> to vector<64x32xbf16>
    %37 = vector.shape_cast %36 : vector<64x32xbf16> to vector<4x16x32xbf16>
    %cst_11 = arith.constant dense<0.000000e+00> : vector<4x16x16xf32>
    %38 = tpu.matmul %33, %35, %cst_11 {dimension_numbers = #tpu.dot_dimension_numbers<[2], [2], [1], [1], [0, 0, 0, 1, 1, 1], [0], [0]>} : vector<4x16x32xbf16>, vector<4x16x32xbf16>, vector<4x16x16xf32> -> vector<4x16x16xf32>
    %cst_12 = arith.constant 2.000000e-01 : f32
    %39 = vector.broadcast %cst_12 : f32 to vector<4x16x16xf32>
    %40 = arith.mulf %38, %39 : vector<4x16x16xf32>
    %cst_13 = arith.constant dense<0xFF800000> : vector<4x16xf32>
    %41 = vector.multi_reduction <maximumf>, %40, %cst_13 [2] : vector<4x16x16xf32> to vector<4x16xf32>
    %42 = vector.shape_cast %41 : vector<4x16xf32> to vector<4x16x1xf32>
    %43 = vector.broadcast %42 : vector<4x16x1xf32> to vector<4x16x16xf32>
    %44 = arith.subf %40, %43 : vector<4x16x16xf32>
    %45 = math.exp %44 : vector<4x16x16xf32>
    %cst_14 = arith.constant dense<0.000000e+00> : vector<4x16xf32>
    %46 = vector.multi_reduction <add>, %45, %cst_14 [2] : vector<4x16x16xf32> to vector<4x16xf32>
    %47 = vector.shape_cast %46 : vector<4x16xf32> to vector<4x16x1xf32>
    %48 = tpu.reciprocal %47 {approx = true} : vector<4x16x1xf32> -> vector<4x16x1xf32>
    %49 = vector.broadcast %48 : vector<4x16x1xf32> to vector<4x16x16xf32>
    %50 = arith.mulf %45, %49 : vector<4x16x16xf32>
    %51 = arith.truncf %50 : vector<4x16x16xf32> to vector<4x16x16xbf16>
    %cst_15 = arith.constant dense<0.000000e+00> : vector<4x16x32xf32>
    %52 = tpu.matmul %51, %37, %cst_15 {dimension_numbers = #tpu.dot_dimension_numbers<[2], [1], [1], [2], [0, 0, 0, 1, 1, 2], [0], [0]>} : vector<4x16x16xbf16>, vector<4x16x32xbf16>, vector<4x16x32xf32> -> vector<4x16x32xf32>
    %53 = vector.shape_cast %52 : vector<4x16x32xf32> to vector<64x32xf32>
    %54 = arith.truncf %53 : vector<64x32xf32> to vector<64x32xbf16>
    %55 = vector.extract_strided_slice %8 {offsets = [0, 64], sizes = [64, 32], strides = [1, 1]} : vector<64x384xbf16> to vector<64x32xbf16>
    %56 = vector.shape_cast %55 : vector<64x32xbf16> to vector<4x16x32xbf16>
    %57 = vector.extract_strided_slice %8 {offsets = [0, 192], sizes = [64, 32], strides = [1, 1]} : vector<64x384xbf16> to vector<64x32xbf16>
    %58 = vector.shape_cast %57 : vector<64x32xbf16> to vector<4x16x32xbf16>
    %59 = vector.extract_strided_slice %8 {offsets = [0, 320], sizes = [64, 32], strides = [1, 1]} : vector<64x384xbf16> to vector<64x32xbf16>
    %60 = vector.shape_cast %59 : vector<64x32xbf16> to vector<4x16x32xbf16>
    %cst_16 = arith.constant dense<0.000000e+00> : vector<4x16x16xf32>
    %61 = tpu.matmul %56, %58, %cst_16 {dimension_numbers = #tpu.dot_dimension_numbers<[2], [2], [1], [1], [0, 0, 0, 1, 1, 1], [0], [0]>} : vector<4x16x32xbf16>, vector<4x16x32xbf16>, vector<4x16x16xf32> -> vector<4x16x16xf32>
    %cst_17 = arith.constant 2.000000e-01 : f32
    %62 = vector.broadcast %cst_17 : f32 to vector<4x16x16xf32>
    %63 = arith.mulf %61, %62 : vector<4x16x16xf32>
    %cst_18 = arith.constant dense<0xFF800000> : vector<4x16xf32>
    %64 = vector.multi_reduction <maximumf>, %63, %cst_18 [2] : vector<4x16x16xf32> to vector<4x16xf32>
    %65 = vector.shape_cast %64 : vector<4x16xf32> to vector<4x16x1xf32>
    %66 = vector.broadcast %65 : vector<4x16x1xf32> to vector<4x16x16xf32>
    %67 = arith.subf %63, %66 : vector<4x16x16xf32>
    %68 = math.exp %67 : vector<4x16x16xf32>
    %cst_19 = arith.constant dense<0.000000e+00> : vector<4x16xf32>
    %69 = vector.multi_reduction <add>, %68, %cst_19 [2] : vector<4x16x16xf32> to vector<4x16xf32>
    %70 = vector.shape_cast %69 : vector<4x16xf32> to vector<4x16x1xf32>
    %71 = tpu.reciprocal %70 {approx = true} : vector<4x16x1xf32> -> vector<4x16x1xf32>
    %72 = vector.broadcast %71 : vector<4x16x1xf32> to vector<4x16x16xf32>
    %73 = arith.mulf %68, %72 : vector<4x16x16xf32>
    %74 = arith.truncf %73 : vector<4x16x16xf32> to vector<4x16x16xbf16>
    %cst_20 = arith.constant dense<0.000000e+00> : vector<4x16x32xf32>
    %75 = tpu.matmul %74, %60, %cst_20 {dimension_numbers = #tpu.dot_dimension_numbers<[2], [1], [1], [2], [0, 0, 0, 1, 1, 2], [0], [0]>} : vector<4x16x16xbf16>, vector<4x16x32xbf16>, vector<4x16x32xf32> -> vector<4x16x32xf32>
    %76 = vector.shape_cast %75 : vector<4x16x32xf32> to vector<64x32xf32>
    %77 = arith.truncf %76 : vector<64x32xf32> to vector<64x32xbf16>
    %78 = vector.extract_strided_slice %8 {offsets = [0, 96], sizes = [64, 32], strides = [1, 1]} : vector<64x384xbf16> to vector<64x32xbf16>
    %79 = vector.shape_cast %78 : vector<64x32xbf16> to vector<4x16x32xbf16>
    %80 = vector.extract_strided_slice %8 {offsets = [0, 224], sizes = [64, 32], strides = [1, 1]} : vector<64x384xbf16> to vector<64x32xbf16>
    %81 = vector.shape_cast %80 : vector<64x32xbf16> to vector<4x16x32xbf16>
    %82 = vector.extract_strided_slice %8 {offsets = [0, 352], sizes = [64, 32], strides = [1, 1]} : vector<64x384xbf16> to vector<64x32xbf16>
    %83 = vector.shape_cast %82 : vector<64x32xbf16> to vector<4x16x32xbf16>
    %cst_21 = arith.constant dense<0.000000e+00> : vector<4x16x16xf32>
    %84 = tpu.matmul %79, %81, %cst_21 {dimension_numbers = #tpu.dot_dimension_numbers<[2], [2], [1], [1], [0, 0, 0, 1, 1, 1], [0], [0]>} : vector<4x16x32xbf16>, vector<4x16x32xbf16>, vector<4x16x16xf32> -> vector<4x16x16xf32>
    %cst_22 = arith.constant 2.000000e-01 : f32
    %85 = vector.broadcast %cst_22 : f32 to vector<4x16x16xf32>
    %86 = arith.mulf %84, %85 : vector<4x16x16xf32>
    %cst_23 = arith.constant dense<0xFF800000> : vector<4x16xf32>
    %87 = vector.multi_reduction <maximumf>, %86, %cst_23 [2] : vector<4x16x16xf32> to vector<4x16xf32>
    %88 = vector.shape_cast %87 : vector<4x16xf32> to vector<4x16x1xf32>
    %89 = vector.broadcast %88 : vector<4x16x1xf32> to vector<4x16x16xf32>
    %90 = arith.subf %86, %89 : vector<4x16x16xf32>
    %91 = math.exp %90 : vector<4x16x16xf32>
    %cst_24 = arith.constant dense<0.000000e+00> : vector<4x16xf32>
    %92 = vector.multi_reduction <add>, %91, %cst_24 [2] : vector<4x16x16xf32> to vector<4x16xf32>
    %93 = vector.shape_cast %92 : vector<4x16xf32> to vector<4x16x1xf32>
    %94 = tpu.reciprocal %93 {approx = true} : vector<4x16x1xf32> -> vector<4x16x1xf32>
    %95 = vector.broadcast %94 : vector<4x16x1xf32> to vector<4x16x16xf32>
    %96 = arith.mulf %91, %95 : vector<4x16x16xf32>
    %97 = arith.truncf %96 : vector<4x16x16xf32> to vector<4x16x16xbf16>
    %cst_25 = arith.constant dense<0.000000e+00> : vector<4x16x32xf32>
    %98 = tpu.matmul %97, %83, %cst_25 {dimension_numbers = #tpu.dot_dimension_numbers<[2], [1], [1], [2], [0, 0, 0, 1, 1, 2], [0], [0]>} : vector<4x16x16xbf16>, vector<4x16x32xbf16>, vector<4x16x32xf32> -> vector<4x16x32xf32>
    %99 = vector.shape_cast %98 : vector<4x16x32xf32> to vector<64x32xf32>
    %100 = arith.truncf %99 : vector<64x32xf32> to vector<64x32xbf16>
    %101 = tpu.concatenate %31, %54, %77, %100 in 1 : vector<64x32xbf16>, vector<64x32xbf16>, vector<64x32xbf16>, vector<64x32xbf16> -> vector<64x128xbf16>
    %c0_26 = arith.constant 0 : index
    %c0_27 = arith.constant 0 : index
    %102 = vector.load %arg4[%c0_26, %c0_27] : memref<128x128xbf16, #tpu.memory_space<vmem>>, vector<128x128xbf16>
    %cst_28 = arith.constant dense<0.000000e+00> : vector<64x128xf32>
    %103 = tpu.matmul %101, %102, %cst_28 {dimension_numbers = #tpu.dot_dimension_numbers<[1], [0], [0], [1], [0, 0, 1, 1], [], []>} : vector<64x128xbf16>, vector<128x128xbf16>, vector<64x128xf32> -> vector<64x128xf32>
    %c0_29 = arith.constant 0 : index
    %c0_30 = arith.constant 0 : index
    %104 = vector.load %arg5[%c0_29, %c0_30] : memref<1x128xf32, #tpu.memory_space<vmem>>, vector<1x128xf32>
    %105 = vector.broadcast %104 : vector<1x128xf32> to vector<64x128xf32>
    %106 = arith.addf %103, %105 : vector<64x128xf32>
    %107 = arith.addf %2, %106 : vector<64x128xf32>
    %c0_31 = arith.constant 0 : index
    %c0_32 = arith.constant 0 : index
    %108 = vector.load %arg6[%c0_31, %c0_32] : memref<1x128xf32, #tpu.memory_space<vmem>>, vector<1x128xf32>
    %c0_33 = arith.constant 0 : index
    %c0_34 = arith.constant 0 : index
    %109 = vector.load %arg7[%c0_33, %c0_34] : memref<1x128xf32, #tpu.memory_space<vmem>>, vector<1x128xf32>
    %cst_35 = arith.constant dense<0.000000e+00> : vector<64xf32>
    %110 = vector.multi_reduction <add>, %107, %cst_35 [1] : vector<64x128xf32> to vector<64xf32>
    %111 = vector.shape_cast %110 : vector<64xf32> to vector<64x1xf32>
    %cst_36 = arith.constant 0.00999999977 : f32
    %112 = vector.broadcast %cst_36 : f32 to vector<64x1xf32>
    %113 = arith.mulf %111, %112 : vector<64x1xf32>
    %114 = arith.mulf %107, %107 : vector<64x128xf32>
    %cst_37 = arith.constant dense<0.000000e+00> : vector<64xf32>
    %115 = vector.multi_reduction <add>, %114, %cst_37 [1] : vector<64x128xf32> to vector<64xf32>
    %116 = vector.shape_cast %115 : vector<64xf32> to vector<64x1xf32>
    %cst_38 = arith.constant 0.00999999977 : f32
    %117 = vector.broadcast %cst_38 : f32 to vector<64x1xf32>
    %118 = arith.mulf %116, %117 : vector<64x1xf32>
    %119 = arith.mulf %113, %113 : vector<64x1xf32>
    %120 = arith.subf %118, %119 : vector<64x1xf32>
    %121 = vector.broadcast %113 : vector<64x1xf32> to vector<64x128xf32>
    %122 = arith.subf %107, %121 : vector<64x128xf32>
    %cst_39 = arith.constant 9.99999974E-6 : f32
    %123 = vector.broadcast %cst_39 : f32 to vector<64x1xf32>
    %124 = arith.addf %120, %123 : vector<64x1xf32>
    %125 = math.rsqrt %124 : vector<64x1xf32>
    %126 = vector.broadcast %125 : vector<64x1xf32> to vector<64x128xf32>
    %127 = arith.mulf %122, %126 : vector<64x128xf32>
    %128 = vector.broadcast %108 : vector<1x128xf32> to vector<64x128xf32>
    %129 = arith.mulf %127, %128 : vector<64x128xf32>
    %130 = vector.broadcast %109 : vector<1x128xf32> to vector<64x128xf32>
    %131 = arith.addf %129, %130 : vector<64x128xf32>
    %132 = arith.truncf %131 : vector<64x128xf32> to vector<64x128xbf16>
    %c0_40 = arith.constant 0 : index
    %c0_41 = arith.constant 0 : index
    %133 = vector.load %arg8[%c0_40, %c0_41] : memref<128x256xbf16, #tpu.memory_space<vmem>>, vector<128x256xbf16>
    %cst_42 = arith.constant dense<0.000000e+00> : vector<64x256xf32>
    %134 = tpu.matmul %132, %133, %cst_42 {dimension_numbers = #tpu.dot_dimension_numbers<[1], [0], [0], [1], [0, 0, 1, 1], [], []>} : vector<64x128xbf16>, vector<128x256xbf16>, vector<64x256xf32> -> vector<64x256xf32>
    %c0_43 = arith.constant 0 : index
    %c0_44 = arith.constant 0 : index
    %135 = vector.load %arg9[%c0_43, %c0_44] : memref<1x256xf32, #tpu.memory_space<vmem>>, vector<1x256xf32>
    %136 = vector.broadcast %135 : vector<1x256xf32> to vector<64x256xf32>
    %137 = arith.addf %134, %136 : vector<64x256xf32>
    %cst_45 = arith.constant 0.000000e+00 : f32
    %138 = vector.broadcast %cst_45 : f32 to vector<64x256xf32>
    %139 = arith.cmpf ogt, %137, %138 : vector<64x256xf32>
    %cst_46 = arith.constant 0.00999999977 : f32
    %140 = vector.broadcast %cst_46 : f32 to vector<64x256xf32>
    %141 = arith.mulf %140, %137 : vector<64x256xf32>
    %142 = arith.select %139, %137, %141 : vector<64x256xi1>, vector<64x256xf32>
    %143 = arith.truncf %142 : vector<64x256xf32> to vector<64x256xbf16>
    %c0_47 = arith.constant 0 : index
    %c0_48 = arith.constant 0 : index
    %144 = vector.load %arg10[%c0_47, %c0_48] : memref<256x128xbf16, #tpu.memory_space<vmem>>, vector<256x128xbf16>
    %cst_49 = arith.constant dense<0.000000e+00> : vector<64x128xf32>
    %145 = tpu.matmul %143, %144, %cst_49 {dimension_numbers = #tpu.dot_dimension_numbers<[1], [0], [0], [1], [0, 0, 1, 1], [], []>} : vector<64x256xbf16>, vector<256x128xbf16>, vector<64x128xf32> -> vector<64x128xf32>
    %c0_50 = arith.constant 0 : index
    %c0_51 = arith.constant 0 : index
    %146 = vector.load %arg11[%c0_50, %c0_51] : memref<1x128xf32, #tpu.memory_space<vmem>>, vector<1x128xf32>
    %147 = vector.broadcast %146 : vector<1x128xf32> to vector<64x128xf32>
    %148 = arith.addf %145, %147 : vector<64x128xf32>
    %149 = arith.addf %131, %148 : vector<64x128xf32>
    %c0_52 = arith.constant 0 : index
    %c0_53 = arith.constant 0 : index
    %150 = vector.load %arg12[%c0_52, %c0_53] : memref<1x128xf32, #tpu.memory_space<vmem>>, vector<1x128xf32>
    %c0_54 = arith.constant 0 : index
    %c0_55 = arith.constant 0 : index
    %151 = vector.load %arg13[%c0_54, %c0_55] : memref<1x128xf32, #tpu.memory_space<vmem>>, vector<1x128xf32>
    %cst_56 = arith.constant dense<0.000000e+00> : vector<64xf32>
    %152 = vector.multi_reduction <add>, %149, %cst_56 [1] : vector<64x128xf32> to vector<64xf32>
    %153 = vector.shape_cast %152 : vector<64xf32> to vector<64x1xf32>
    %cst_57 = arith.constant 0.00999999977 : f32
    %154 = vector.broadcast %cst_57 : f32 to vector<64x1xf32>
    %155 = arith.mulf %153, %154 : vector<64x1xf32>
    %156 = arith.mulf %149, %149 : vector<64x128xf32>
    %cst_58 = arith.constant dense<0.000000e+00> : vector<64xf32>
    %157 = vector.multi_reduction <add>, %156, %cst_58 [1] : vector<64x128xf32> to vector<64xf32>
    %158 = vector.shape_cast %157 : vector<64xf32> to vector<64x1xf32>
    %cst_59 = arith.constant 0.00999999977 : f32
    %159 = vector.broadcast %cst_59 : f32 to vector<64x1xf32>
    %160 = arith.mulf %158, %159 : vector<64x1xf32>
    %161 = arith.mulf %155, %155 : vector<64x1xf32>
    %162 = arith.subf %160, %161 : vector<64x1xf32>
    %163 = vector.broadcast %155 : vector<64x1xf32> to vector<64x128xf32>
    %164 = arith.subf %149, %163 : vector<64x128xf32>
    %cst_60 = arith.constant 9.99999974E-6 : f32
    %165 = vector.broadcast %cst_60 : f32 to vector<64x1xf32>
    %166 = arith.addf %162, %165 : vector<64x1xf32>
    %167 = math.rsqrt %166 : vector<64x1xf32>
    %168 = vector.broadcast %167 : vector<64x1xf32> to vector<64x128xf32>
    %169 = arith.mulf %164, %168 : vector<64x128xf32>
    %170 = vector.broadcast %150 : vector<1x128xf32> to vector<64x128xf32>
    %171 = arith.mulf %169, %170 : vector<64x128xf32>
    %172 = vector.broadcast %151 : vector<1x128xf32> to vector<64x128xf32>
    %173 = arith.addf %171, %172 : vector<64x128xf32>
    %174 = vector.shape_cast %173 : vector<64x128xf32> to vector<4x16x128xf32>
    %cst_61 = arith.constant dense<0.000000e+00> : vector<4x128xf32>
    %175 = vector.multi_reduction <add>, %174, %cst_61 [1] : vector<4x16x128xf32> to vector<4x128xf32>
    %cst_62 = arith.constant 6.250000e-02 : f32
    %176 = vector.broadcast %cst_62 : f32 to vector<4x128xf32>
    %177 = arith.mulf %175, %176 : vector<4x128xf32>
    %178 = arith.truncf %177 : vector<4x128xf32> to vector<4x128xbf16>
    %c0_63 = arith.constant 0 : index
    %c0_64 = arith.constant 0 : index
    %179 = vector.load %arg14[%c0_63, %c0_64] : memref<128x128xbf16, #tpu.memory_space<vmem>>, vector<128x128xbf16>
    %cst_65 = arith.constant dense<0.000000e+00> : vector<4x128xf32>
    %180 = tpu.matmul %178, %179, %cst_65 {dimension_numbers = #tpu.dot_dimension_numbers<[1], [0], [0], [1], [0, 0, 1, 1], [], []>} : vector<4x128xbf16>, vector<128x128xbf16>, vector<4x128xf32> -> vector<4x128xf32>
    %c0_66 = arith.constant 0 : index
    %c0_67 = arith.constant 0 : index
    %181 = vector.load %arg15[%c0_66, %c0_67] : memref<1x128xf32, #tpu.memory_space<vmem>>, vector<1x128xf32>
    %182 = vector.broadcast %181 : vector<1x128xf32> to vector<4x128xf32>
    %183 = arith.addf %180, %182 : vector<4x128xf32>
    %cst_68 = arith.constant 0.000000e+00 : f32
    %184 = vector.broadcast %cst_68 : f32 to vector<4x128xf32>
    %185 = arith.cmpf ogt, %183, %184 : vector<4x128xf32>
    %cst_69 = arith.constant 0.00999999977 : f32
    %186 = vector.broadcast %cst_69 : f32 to vector<4x128xf32>
    %187 = arith.mulf %186, %183 : vector<4x128xf32>
    %188 = arith.select %185, %183, %187 : vector<4x128xi1>, vector<4x128xf32>
    %189 = arith.truncf %188 : vector<4x128xf32> to vector<4x128xbf16>
    %c0_70 = arith.constant 0 : index
    %c0_71 = arith.constant 0 : index
    %190 = vector.load %arg16[%c0_70, %c0_71] : memref<128x128xbf16, #tpu.memory_space<vmem>>, vector<128x128xbf16>
    %cst_72 = arith.constant dense<0.000000e+00> : vector<4x128xf32>
    %191 = tpu.matmul %189, %190, %cst_72 {dimension_numbers = #tpu.dot_dimension_numbers<[1], [0], [0], [1], [0, 0, 1, 1], [], []>} : vector<4x128xbf16>, vector<128x128xbf16>, vector<4x128xf32> -> vector<4x128xf32>
    %c0_73 = arith.constant 0 : index
    %c0_74 = arith.constant 0 : index
    %192 = vector.load %arg17[%c0_73, %c0_74] : memref<1x128xf32, #tpu.memory_space<vmem>>, vector<1x128xf32>
    %193 = vector.broadcast %192 : vector<1x128xf32> to vector<4x128xf32>
    %194 = arith.addf %191, %193 : vector<4x128xf32>
    %cst_75 = arith.constant 0.000000e+00 : f32
    %195 = vector.broadcast %cst_75 : f32 to vector<4x128xf32>
    %196 = arith.cmpf ogt, %194, %195 : vector<4x128xf32>
    %cst_76 = arith.constant 0.00999999977 : f32
    %197 = vector.broadcast %cst_76 : f32 to vector<4x128xf32>
    %198 = arith.mulf %197, %194 : vector<4x128xf32>
    %199 = arith.select %196, %194, %198 : vector<4x128xi1>, vector<4x128xf32>
    %200 = arith.truncf %199 : vector<4x128xf32> to vector<4x128xbf16>
    %c0_77 = arith.constant 0 : index
    %c0_78 = arith.constant 0 : index
    %201 = vector.load %arg18[%c0_77, %c0_78] : memref<128x128xbf16, #tpu.memory_space<vmem>>, vector<128x128xbf16>
    %cst_79 = arith.constant dense<0.000000e+00> : vector<4x128xf32>
    %202 = tpu.matmul %200, %201, %cst_79 {dimension_numbers = #tpu.dot_dimension_numbers<[1], [0], [0], [1], [0, 0, 1, 1], [], []>} : vector<4x128xbf16>, vector<128x128xbf16>, vector<4x128xf32> -> vector<4x128xf32>
    %c0_80 = arith.constant 0 : index
    %c0_81 = arith.constant 0 : index
    %203 = vector.load %arg19[%c0_80, %c0_81] : memref<1x128xf32, #tpu.memory_space<vmem>>, vector<1x128xf32>
    %204 = vector.broadcast %203 : vector<1x128xf32> to vector<4x128xf32>
    %205 = arith.addf %202, %204 : vector<4x128xf32>
    %cst_82 = arith.constant dense<0xFF800000> : vector<4xf32>
    %206 = vector.multi_reduction <maximumf>, %205, %cst_82 [1] : vector<4x128xf32> to vector<4xf32>
    %207 = vector.shape_cast %206 : vector<4xf32> to vector<4x1xf32>
    %208 = vector.broadcast %207 : vector<4x1xf32> to vector<4x128xf32>
    %209 = arith.subf %205, %208 : vector<4x128xf32>
    %210 = math.exp %209 : vector<4x128xf32>
    %cst_83 = arith.constant dense<0.000000e+00> : vector<4xf32>
    %211 = vector.multi_reduction <add>, %210, %cst_83 [1] : vector<4x128xf32> to vector<4xf32>
    %212 = vector.shape_cast %211 : vector<4xf32> to vector<4x1xf32>
    %213 = vector.broadcast %212 : vector<4x1xf32> to vector<4x128xf32>
    %214 = arith.divf %210, %213 : vector<4x128xf32>
    %c0_84 = arith.constant 0 : index
    %c0_85 = arith.constant 0 : index
    %c0_86 = arith.constant 0 : index
    %215 = vector.load %arg20[%c0_84, %c0_85, %c0_86] : memref<1x4x128xf32, #tpu.memory_space<vmem>>, vector<1x4x128xf32>
    %216 = vector.shape_cast %215 : vector<1x4x128xf32> to vector<4x128xf32>
    %217 = vector.shape_cast %214 : vector<4x128xf32> to vector<1x4x128xf32>
    tpu.vector_store %arg20[%c0_84, %c0_85, %c0_86], %217 {strides = array<i32>} : memref<1x4x128xf32, #tpu.memory_space<vmem>>, vector<1x4x128xf32>,
    return
  }
  func.func @transform_0(%arg0: i32) -> (i32, i32, i32) {
    %c0_i32 = arith.constant 0 : i32
    %c0_i32_0 = arith.constant 0 : i32
    %c0_i32_1 = arith.constant 0 : i32
    return %arg0, %c0_i32, %c0_i32_0 : i32, i32, i32
  }
  func.func @transform_1(%arg0: i32) -> (i32, i32) {
    %c0_i32 = arith.constant 0 : i32
    %c0_i32_0 = arith.constant 0 : i32
    %c0_i32_1 = arith.constant 0 : i32
    return %c0_i32, %c0_i32_0 : i32, i32
  }
  func.func @transform_2(%arg0: i32) -> (i32, i32) {
    %c0_i32 = arith.constant 0 : i32
    %c0_i32_0 = arith.constant 0 : i32
    %c0_i32_1 = arith.constant 0 : i32
    return %c0_i32, %c0_i32_0 : i32, i32
  }
  func.func @transform_3(%arg0: i32) -> (i32, i32) {
    %c0_i32 = arith.constant 0 : i32
    %c0_i32_0 = arith.constant 0 : i32
    %c0_i32_1 = arith.constant 0 : i32
    return %c0_i32, %c0_i32_0 : i32, i32
  }
  func.func @transform_4(%arg0: i32) -> (i32, i32) {
    %c0_i32 = arith.constant 0 : i32
    %c0_i32_0 = arith.constant 0 : i32
    %c0_i32_1 = arith.constant 0 : i32
    return %c0_i32, %c0_i32_0 : i32, i32
  }
  func.func @transform_5(%arg0: i32) -> (i32, i32) {
    %c0_i32 = arith.constant 0 : i32
    %c0_i32_0 = arith.constant 0 : i32
    %c0_i32_1 = arith.constant 0 : i32
    return %c0_i32, %c0_i32_0 : i32, i32
  }
  func.func @transform_6(%arg0: i32) -> (i32, i32) {
    %c0_i32 = arith.constant 0 : i32
    %c0_i32_0 = arith.constant 0 : i32
    %c0_i32_1 = arith.constant 0 : i32
    return %c0_i32, %c0_i32_0 : i32, i32
  }
  func.func @transform_7(%arg0: i32) -> (i32, i32) {
    %c0_i32 = arith.constant 0 : i32
    %c0_i32_0 = arith.constant 0 : i32
    %c0_i32_1 = arith.constant 0 : i32
    return %c0_i32, %c0_i32_0 : i32, i32
  }
  func.func @transform_8(%arg0: i32) -> (i32, i32) {
    %c0_i32 = arith.constant 0 : i32
    %c0_i32_0 = arith.constant 0 : i32
    %c0_i32_1 = arith.constant 0 : i32
    return %c0_i32, %c0_i32_0 : i32, i32
  }
  func.func @transform_9(%arg0: i32) -> (i32, i32) {
    %c0_i32 = arith.constant 0 : i32
    %c0_i32_0 = arith.constant 0 : i32
    %c0_i32_1 = arith.constant 0 : i32
    return %c0_i32, %c0_i32_0 : i32, i32
  }
  func.func @transform_10(%arg0: i32) -> (i32, i32) {
    %c0_i32 = arith.constant 0 : i32
    %c0_i32_0 = arith.constant 0 : i32
    %c0_i32_1 = arith.constant 0 : i32
    return %c0_i32, %c0_i32_0 : i32, i32
  }
  func.func @transform_11(%arg0: i32) -> (i32, i32) {
    %c0_i32 = arith.constant 0 : i32
    %c0_i32_0 = arith.constant 0 : i32
    %c0_i32_1 = arith.constant 0 : i32
    return %c0_i32, %c0_i32_0 : i32, i32
  }
  func.func @transform_12(%arg0: i32) -> (i32, i32) {
    %c0_i32 = arith.constant 0 : i32
    %c0_i32_0 = arith.constant 0 : i32
    %c0_i32_1 = arith.constant 0 : i32
    return %c0_i32, %c0_i32_0 : i32, i32
  }
  func.func @transform_13(%arg0: i32) -> (i32, i32) {
    %c0_i32 = arith.constant 0 : i32
    %c0_i32_0 = arith.constant 0 : i32
    %c0_i32_1 = arith.constant 0 : i32
    return %c0_i32, %c0_i32_0 : i32, i32
  }
  func.func @transform_14(%arg0: i32) -> (i32, i32) {
    %c0_i32 = arith.constant 0 : i32
    %c0_i32_0 = arith.constant 0 : i32
    %c0_i32_1 = arith.constant 0 : i32
    return %c0_i32, %c0_i32_0 : i32, i32
  }
  func.func @transform_15(%arg0: i32) -> (i32, i32) {
    %c0_i32 = arith.constant 0 : i32
    %c0_i32_0 = arith.constant 0 : i32
    %c0_i32_1 = arith.constant 0 : i32
    return %c0_i32, %c0_i32_0 : i32, i32
  }
  func.func @transform_16(%arg0: i32) -> (i32, i32) {
    %c0_i32 = arith.constant 0 : i32
    %c0_i32_0 = arith.constant 0 : i32
    %c0_i32_1 = arith.constant 0 : i32
    return %c0_i32, %c0_i32_0 : i32, i32
  }
  func.func @transform_17(%arg0: i32) -> (i32, i32) {
    %c0_i32 = arith.constant 0 : i32
    %c0_i32_0 = arith.constant 0 : i32
    %c0_i32_1 = arith.constant 0 : i32
    return %c0_i32, %c0_i32_0 : i32, i32
  }
  func.func @transform_18(%arg0: i32) -> (i32, i32) {
    %c0_i32 = arith.constant 0 : i32
    %c0_i32_0 = arith.constant 0 : i32
    %c0_i32_1 = arith.constant 0 : i32
    return %c0_i32, %c0_i32_0 : i32, i32
  }
  func.func @transform_19(%arg0: i32) -> (i32, i32, i32) {
    %c0_i32 = arith.constant 0 : i32
    %c0_i32_0 = arith.constant 0 : i32
    %c0_i32_1 = arith.constant 0 : i32
    return %arg0, %c0_i32, %c0_i32_0 : i32, i32, i32
  }
}

</mosaic_0001>

<bundles_post_ra>
// kernel: tpu_custom_call.1
= control target key start
LH: loop header
LB: loop body
LE: loop exit
PB: predicated region body
PF: predicated region fallthrough
CT: control target
= control target key end

     0   :  { %s7005_s0 = inlined_call_operand.hbm [shape: bf16[8,16,128], index: 0, kind: input, shape index: {}]   ;;  %s7006_s1 = inlined_call_operand.hbm [shape: bf16[128,384], index: 1, kind: input, shape index: {}]   ;;  %s7007_s2 = inlined_call_operand.vmem [shape: f32[1,384], index: 2, kind: input, shape index: {}]   ;;  %s7008_s3 = inlined_call_operand.hbm [shape: bf16[128,128], index: 3, kind: input, shape index: {}]   ;;  %s7009_s4 = inlined_call_operand.vmem [shape: f32[1,128], index: 4, kind: input, shape index: {}]   ;;  %s7010_s5 = inlined_call_operand.vmem [shape: f32[1,128], index: 5, kind: input, shape index: {}]   ;;  %s7011_s6 = inlined_call_operand.vmem [shape: f32[1,128], index: 6, kind: input, shape index: {}]   ;;  %s7012_s7 = inlined_call_operand.hbm [shape: bf16[128,256], index: 7, kind: input, shape index: {}]   ;;  %s7013_s8 = inlined_call_operand.vmem [shape: f32[1,256], index: 8, kind: input, shape index: {}]   ;;  %s7014_s9 = inlined_call_operand.hbm [shape: bf16[256,128], index: 9, kind: input, shape index: {}]   ;;  %s7015_s10 = inlined_call_operand.vmem [shape: f32[1,128], index: 10, kind: input, shape index: {}]   ;;  %s7016_s11 = inlined_call_operand.vmem [shape: f32[1,128], index: 11, kind: input, shape index: {}]   ;;  %s7017_s12 = inlined_call_operand.vmem [shape: f32[1,128], index: 12, kind: input, shape index: {}]   ;;  %s7018_s13 = inlined_call_operand.hbm [shape: bf16[128,128], index: 13, kind: input, shape index: {}]   ;;  %s7019_s14 = inlined_call_operand.vmem [shape: f32[1,128], index: 14, kind: input, shape index: {}]   ;;  %s7020_s15 = inlined_call_operand.hbm [shape: bf16[128,128], index: 15, kind: input, shape index: {}]   ;;  %s7021_s16 = inlined_call_operand.vmem [shape: f32[1,128], index: 16, kind: input, shape index: {}]   ;;  %s7022_s17 = inlined_call_operand.hbm [shape: bf16[128,128], index: 17, kind: input, shape index: {}]   ;;  %s7023_s18 = inlined_call_operand.vmem [shape: f32[1,128], index: 18, kind: input, shape index: {}]   ;;  %s7024_s19 = inlined_call_operand.hbm [shape: f32[2,4,128], index: 19, kind: output, shape index: {}]  }
   0x1   :  { %7035 = sst [smem:[#allocation23_spill]] %s7005_s0 }
   0x2   :  { %7036 = sst [smem:[#allocation24_spill]] %s7006_s1 }
   0x3   :  { %7037 = sst [smem:[#allocation25_spill]] %s7007_s2 }
   0x4   :  { %7038 = sst [smem:[#allocation26_spill]] %s7008_s3 }
   0x5   :  { %7039 = sst [smem:[#allocation27_spill]] %s7012_s7 }
   0x6   :  { %7040 = sst [smem:[#allocation28_spill]] %s7014_s9 }
   0x7   :  { %7041 = sst [smem:[#allocation29_spill]] %s7017_s12 }
   0x8   :  { %7042 = sst [smem:[#allocation30_spill]] %s7018_s13 }
   0x9   :  { %7043 = sst [smem:[#allocation31_spill]] %s7019_s14 }
   0xa   :  { %7044 = sst [smem:[#allocation32_spill]] %s7020_s15 }
   0xb   :  { %7045 = sst [smem:[#allocation33_spill]] %s7021_s16 }
   0xc   :  { %7046 = sst [smem:[#allocation34_spill]] %s7022_s17 }
   0xd   :  { %7047 = sst [smem:[#allocation35_spill]] %s7023_s18 }
   0xe   :  { %7048 = sst [smem:[#allocation36_spill]] %s7024_s19 }
   0xf   :  { %24 = vsyncpa [#allocation3], 0 }
  0x10   :  { %26 = vsyncpa [#allocation3 + $0x1], 0 }
  0x11   :  { %27 = vsyncpa [#allocation6], 0 }
  0x12   :  { %28 = vsyncpa [#allocation9], 0 }
  0x13   :  { %29 = vsyncpa [#allocation12], 0 }
  0x14   :  { %30 = vsyncpa [#allocation15], 0 }
  0x15   :  { %31 = vsyncpa [#allocation4], 0 }
  0x16   :  { %33 = vsyncpa [#allocation4 + $0x1], 0  ;;  %s5991_s0 = smov 0   ;;  %s5993_s30 = smov 0  }
  0x17   :  { %s5995_s20 = smov 0   ;;  %s5997_s21 = smov 0  }
  0x18 LB: > { %s5870_s1 = smov [#allocation5]   ;;  %s6012_s2 = sadd.s32 4294967295, %s5868_s21   ;;  %s5868_s21 = sphi %s5997_s21, %s7095_s21   ;;  %s5864_s20 = sphi %s5995_s20, %s7094_s20   ;;  %s5860_s30 = sphi %s5993_s30, %s7093_s30   ;;  %s5856_s0 = sphi %s5991_s0, %s7092_s0  }
  0x19   : > { %s486_s22 = sshll.u32 %s5870_s1, 4  ;;  %p4552_p0 = scmp.ge.s32.totalorder %s5868_s21, 1  ;;  %s487_s22 = int_to_ptr.vmem [resolvable:$true] %s486_s22 }
  0x1a   : > { %p7027_p1 = scmp.eq.s32.totalorder %s6012_s2, 0  ;;  %p474_p2 = scmp.lt.s32.totalorder %s5868_s21, 3 }
  0x1b   : > { %s5871_s24 = smov [#allocation8]   ;;  %s5589_s27 = scalar_lea.vmem %s487_s22, 3072 }
  0x1c   : > { %p6017_p3 = pnand %p4552_p0, %p474_p2  ;;  %s524_s25 = sshll.u32 %s5871_s24, 4  ;;  %s525_s25 = int_to_ptr.vmem [resolvable:$true] %s524_s25 }
  0x1d   : > { %p5590_p8 = scmp.ne.s32.totalorder %s487_s22, %s5589_s27  ;;  %p5597_p11 = scmp.lt.s32.totalorder %s487_s22, %s487_s22 }
  0x1e   : > { %s7049_s23 = scalar_select %p6017_p3, 1, 0 }
  0x1f   : > { %p5201_p5 = pneg %p6017_p3  ;;  %p5598_p12 = scmp.lt.s32.totalorder %s5589_s27, %s5589_s27 }
  0x21   : > { %p6026_p6 = pnand %p5201_p5, %p7027_p1  ;;  %p5599_p13 = por %p5598_p12, %p5597_p11 }
  0x23   : > { %p6032_p7 = pneg %p6026_p6 }
  0x25   : > { %p5592_p9 = pnand %p5590_p8, %p6032_p7 }
  0x27   : > { %p5593_p10 = pneg %p5592_p9 }
  0x29   : > { %p5600_p0 = pnand %p5599_p13, %p5593_p10 }
  0x2b   : > { %5603 = shalt.err (!%p5600_p0)
}
  0x2c   : > { %s5872_s28 = smov 192   ;;  %s5873_s29 = smov 12  }
  0x2d   : > { %s7052_s19 = sld [smem:[#allocation24_spill]]  ;;  %s5615_s18 = scalar_lea.vmem %s525_s25, 2048 }
  0x2e   : > { %p5616_p2 = scmp.ne.s32.totalorder %s525_s25, %s5615_s18  ;;  %p5623_p9 = scmp.lt.s32.totalorder %s525_s25, %s525_s25 }
  0x2f   : > { %p5624_p4 = scmp.lt.s32.totalorder %s5615_s18, %s5615_s18 }
  0x30   : > { %p5618_p5 = pnand %p5616_p2, %p6032_p7 }
  0x31   : > { %p5625_p1 = por %p5624_p4, %p5623_p9 }
  0x32   : > { %p5619_p8 = pneg %p5618_p5 }
  0x33   : > { %5204 = dma.hbm_to_vmem [thread:$0]  (!%p6026_p6), %s7052_s19, 3072, %s487_s22, [#allocation6], %s5872_s28, %s5872_s28, %s5873_s29  }
  0x34   : > { %p5626_p11 = pnand %p5625_p1, %p5619_p8 }
  0x36   : > { %5629 = shalt.err (!%p5626_p11)
}
  0x37   : > { %s5874_s27 = smov 128   ;;  %s5875_s16 = smov 8  }
  0x38   : > { %s7053_s7 = sld [smem:[#allocation27_spill]]  ;;  %s5876_s19 = smov [#allocation11]  }
  0x39   : > { %s562_s22 = sshll.u32 %s5876_s19, 4  ;;  %s5877_s28 = smov [#allocation7]   ;;  %s563_s22 = int_to_ptr.vmem [resolvable:$true] %s562_s22 }
  0x3a   : > { %s502_s29 = sshll.u32 %s5877_s28, 4  ;;  %s5641_s1 = scalar_lea.vmem %s563_s22, 1024  ;;  %s503_s29 = int_to_ptr.vmem [resolvable:$true] %s502_s29 }
  0x3b   : > { %p5642_p10 = scmp.ne.s32.totalorder %s563_s22, %s5641_s1  ;;  %p5649_p12 = scmp.lt.s32.totalorder %s563_s22, %s563_s22 }
  0x3c   : > { %p5650_p13 = scmp.lt.s32.totalorder %s5641_s1, %s5641_s1 }
  0x3d   : > { %p5644_p1 = pnand %p5642_p10, %p6032_p7 }
  0x3e   : > { %5210 = dma.hbm_to_vmem [thread:$0]  (!%p6026_p6), %s7053_s7, 2048, %s525_s25, [#allocation9], %s5874_s27, %s5874_s27, %s5875_s16  }
  0x3f   : > { %p5645_p4 = pneg %p5644_p1  ;;  %p5651_p0 = por %p5650_p13, %p5649_p12 }
  0x41   : > { %p5652_p2 = pnand %p5651_p0, %p5645_p4 }
  0x43   : > { %5655 = shalt.err (!%p5652_p2)
}
  0x44   : > { %s7028_s18 = smov 64   ;;  %s7029_s12 = smov 4  }
  0x45   : > { %s7054_s13 = sld [smem:[#allocation30_spill]]  ;;  %s5667_s25 = scalar_lea.vmem %s503_s29, 1024 }
  0x46   : > { %p5668_p5 = scmp.ne.s32.totalorder %s503_s29, %s5667_s25  ;;  %p5675_p11 = scmp.lt.s32.totalorder %s503_s29, %s503_s29 }
  0x47   : > { %p5676_p10 = scmp.lt.s32.totalorder %s5667_s25, %s5667_s25 }
  0x48   : > { %p5670_p8 = pnand %p5668_p5, %p6032_p7 }
  0x49   : > { %p5677_p1 = por %p5676_p10, %p5675_p11 }
  0x4a   : > { %p5671_p9 = pneg %p5670_p8 }
  0x4b   : > { %5216 = dma.hbm_to_vmem [thread:$0]  (!%p6026_p6), %s7054_s13, 1024, %s563_s22, [#allocation12], %s7028_s18, %s7028_s18, %s7029_s12  }
  0x4c   : > { %p5678_p4 = pnand %p5677_p1, %p5671_p9 }
  0x4e   : > { %5681 = shalt.err (!%p5678_p4)
}
  0x4f   : > { %s7055_s19 = sld [smem:[#allocation26_spill]]  ;;  %s5880_s22 = smov [#allocation10]  }
  0x50   : > { %s540_s28 = sshll.u32 %s5880_s22, 4  ;;  %s5881_s1 = smov [#allocation13]   ;;  %s541_s28 = int_to_ptr.vmem [resolvable:$true] %s540_s28 }
  0x51   : > { %s578_s14 = sshll.u32 %s5881_s1, 4  ;;  %s5693_s16 = scalar_lea.vmem %s541_s28, 2048  ;;  %s579_s14 = int_to_ptr.vmem [resolvable:$true] %s578_s14 }
  0x52   : > { %p5694_p12 = scmp.ne.s32.totalorder %s541_s28, %s5693_s16  ;;  %p5701_p2 = scmp.lt.s32.totalorder %s541_s28, %s541_s28 }
  0x53   : > { %p5702_p5 = scmp.lt.s32.totalorder %s5693_s16, %s5693_s16 }
  0x54   : > { %p5696_p13 = pnand %p5694_p12, %p6032_p7 }
  0x55   : > { %5207 = dma.hbm_to_vmem [thread:$0]  (!%p6026_p6), %s7055_s19, 1024, %s503_s29, [#allocation6], %s7028_s18, %s7028_s18, %s7029_s12  }
  0x56   : > { %p5697_p0 = pneg %p5696_p13  ;;  %p5703_p8 = por %p5702_p5, %p5701_p2 }
  0x58   : > { %p5704_p9 = pnand %p5703_p8, %p5697_p0 }
  0x5a   : > { %5707 = shalt.err (!%p5704_p9)
}
  0x5b   : > { %s7056_s9 = sld [smem:[#allocation28_spill]]  ;;  %s5719_s24 = scalar_lea.vmem %s579_s14, 1024 }
  0x5c   : > { %p5720_p11 = scmp.ne.s32.totalorder %s579_s14, %s5719_s24  ;;  %p5727_p4 = scmp.lt.s32.totalorder %s579_s14, %s579_s14 }
  0x5d   : > { %p5728_p12 = scmp.lt.s32.totalorder %s5719_s24, %s5719_s24 }
  0x5e   : > { %p5722_p10 = pnand %p5720_p11, %p6032_p7 }
  0x5f   : > { %p5729_p13 = por %p5728_p12, %p5727_p4 }
  0x60   : > { %p5723_p1 = pneg %p5722_p10 }
  0x61   : > { %5213 = dma.hbm_to_vmem [thread:$0]  (!%p6026_p6), %s7056_s9, 2048, %s541_s28, [#allocation9], %s7028_s18, %s7028_s18, %s7029_s12  }
  0x62   : > { %p5730_p0 = pnand %p5729_p13, %p5723_p1 }
  0x64   : > { %5733 = shalt.err (!%p5730_p0)
}
  0x65   : > { %s7057_s15 = sld [smem:[#allocation32_spill]]  ;;  %s5882_s22 = smov [#allocation14]  }
  0x66   : > { %s594_s28 = sshll.u32 %s5882_s22, 4  ;;  %s595_s28 = int_to_ptr.vmem [resolvable:$true] %s594_s28 }
  0x67   : > { %s5745_s1 = scalar_lea.vmem %s595_s28, 1024  ;;  %p5753_p9 = scmp.lt.s32.totalorder %s595_s28, %s595_s28 }
  0x68   : > { %p5746_p2 = scmp.ne.s32.totalorder %s595_s28, %s5745_s1  ;;  %p5754_p11 = scmp.lt.s32.totalorder %s5745_s1, %s5745_s1 }
  0x6a   : > { %p5748_p5 = pnand %p5746_p2, %p6032_p7  ;;  %p5755_p10 = por %p5754_p11, %p5753_p9 }
  0x6b   : > { %5219 = dma.hbm_to_vmem [thread:$0]  (!%p6026_p6), %s7057_s15, 1024, %s579_s14, [#allocation12], %s7028_s18, %s7028_s18, %s7029_s12  }
  0x6c   : > { %p5749_p8 = pneg %p5748_p5 }
  0x6e   : > { %p5756_p1 = pnand %p5755_p10, %p5749_p8 }
  0x70   : > { %5759 = shalt.err (!%p5756_p1)
}
  0x71   : > { %s7058_s17 = sld [smem:[#allocation34_spill]]  ;;  %s4551_s3 = sadd.s32 4294967294, %s5868_s21  }
  0x72   : > { %s6102_s26 = sadd.s32 1, %s5868_s21   ;;  %s46_s29 = sadd.s32 1, %s5864_s20 }
  0x73   : > { %s43_s25 = ssub.s32 %s5868_s21, %s6102_s26  ;;  %p53_p7 = scmp.ne.s32.totalorder %s5864_s20, %s5860_s30 }
  0x74   : > { %p44_p4 = scmp.eq.s32.totalorder %s43_s25, 0  ;;  %p54_p12 = scmp.eq.s32.totalorder %s5868_s21, 0 }
  0x75   : > { %p59_p13 = scmp.ne.s32.totalorder %s5860_s30, %s5856_s0  ;;  %p461_p0 = scmp.eq.s32.totalorder %s6012_s2, 1 }
  0x76   : > { %s6114_s24 = scalar_select %p44_p4, %s5864_s20, %s46_s29  }
  0x77   : > { %5222 = dma.hbm_to_vmem [thread:$0]  (!%p6026_p6), %s7058_s17, 1024, %s595_s28, [#allocation15], %s7028_s18, %s7028_s18, %s7029_s12  }
  0x78   : > { %p55_p2 = por %p54_p12, %p53_p7  ;;  %p7059_p5 = scmp.eq.s32.totalorder %s6012_s2, 0 }
  0x79   : > { %p6122_p6 = por %p461_p0, %p53_p7  ;;  %p467_p9 = scmp.eq.s32.totalorder %s4551_s3, 1 }
  0x7a   : > { %p6118_p8 = por %p7059_p5, %p59_p13  ;;  %p5238_p11 = scmp.lt.s32.totalorder %s5868_s21, 2 }
  0x7b   : > { %s7061_s19 = scalar_select %p6122_p6, 1, 0 }
  0x7c   : > { %s7060_s27 = scalar_select %p6118_p8, 1, 0 }
  0x7d   : > { %s611_s22 = sand.u32 1, %s5864_s20   ;;  %p6128_p10 = por %p467_p9, %p59_p13 }
  0x7e   : > { %s4561_s1 = sshll.u32 %s611_s22, 5  ;;  %s4713_s16 = sshll.u32 %s5868_s21, 9 }
  0x7f   : > { %s7062_s28 = scalar_select %p6128_p10, 1, 0 }
  0x80   : > { %s7063_s25 = sld [smem:[#allocation23_spill]]  ;;  %s615_s12 = scalar_lea.vmem [#allocation2], %s4561_s1 }
  0x81   : > { %s623_s7 = sshll.u32 %s615_s12, 4  ;;  %p6138_p1 = pnand %p5238_p11, %p55_p2  ;;  %s6142_s7 = int_to_ptr.vmem [resolvable:$true] %s623_s7 }
  0x82   : > { %s6144_s9 = scalar_lea.sflag [#allocation3], %s611_s22 }
  0x83   : > { %p5762_p4 = pneg %p6138_p1 }
  0x86   : > { %s6136_s18 = scalar_lea.hbm %s7063_s25, %s4713_s16  ;;  %s5765_s1 = scalar_lea.hbm %s7063_s25, 1024 }
  0x87   : > { %s5760_s13 = scalar_lea.hbm %s6136_s18, 512  ;;  %p5766_p0 = scmp.lt.s32.totalorder %s6136_s18, %s7063_s25 }
  0x88   : > { %p5761_p7 = scmp.ne.s32.totalorder %s6136_s18, %s5760_s13  ;;  %p5767_p2 = scmp.lt.s32.totalorder %s5765_s1, %s5760_s13 }
  0x8a   : > { %p5763_p12 = pnand %p5762_p4, %p5761_p7  ;;  %p5768_p5 = por %p5767_p2, %p5766_p0 }
  0x8c   : > { %p5764_p13 = pneg %p5763_p12 }
  0x8e   : > { %p5769_p9 = pnand %p5768_p5, %p5764_p13 }
  0x90   : > { %5772 = shalt.err (!%p5769_p9)
}
  0x91   : > { %s5773_s22 = scalar_lea.vmem %s6142_s7, 512  ;;  %s5883_s15 = smov [#allocation2]  }
  0x92   : > { %p5774_p11 = scmp.ne.s32.totalorder %s6142_s7, %s5773_s22  ;;  %s5778_s17 = sshll.u32 %s5883_s15, 4  ;;  %s5779_s17 = int_to_ptr.vmem [resolvable:$false] %s5778_s17 }
  0x93   : > { %s5780_s16 = scalar_lea.vmem %s5779_s17, 1024  ;;  %p5781_p12 = scmp.lt.s32.totalorder %s6142_s7, %s5779_s17 }
  0x94   : > { %p5776_p10 = pnand %p5774_p11, %p5762_p4  ;;  %p5782_p6 = scmp.lt.s32.totalorder %s5780_s16, %s5773_s22 }
  0x96   : > { %p5777_p7 = pneg %p5776_p10  ;;  %p5783_p8 = por %p5782_p6, %p5781_p12 }
  0x98   : > { %p5784_p3 = pnand %p5783_p8, %p5777_p7 }
  0x9a   : > { %5787 = shalt.err (!%p5784_p3)
}
  0x9b   : > { %s7065_s13 = smov 4   ;;  %s7066_s14 = smov 64  }
  0x9c   : > { %5226 = dma.hbm_to_vmem [thread:$0]  (!%p6138_p1), %s6136_s18, 512, %s6142_s7, %s6144_s9, %s7066_s14, %s7066_s14, %s7065_s13  }
  0x9d   : > { %p7067_p10 = scmp.ne.s32.totalorder %s7049_s23, 0 }
  0x9e   : > { %s6171_s15 = sand.u32 (!%p7067_p10), 1, %s5860_s30   ;;  %p7068_p3 = scmp.ne.s32.totalorder (!%p7067_p10), %s7060_s27, 0 }
  0x9f   : > { %635 = sbr.rel (%p7067_p10) target bundleno = 4918 (0x1336), region = 96  ;;  %s4566_s17 = sshll.u32 (!%p7067_p10), %s6171_s15, 5 }
  0xa0   : > { %s638_s1 = scalar_lea.sflag (!%p7067_p10), [#allocation3], %s6171_s15  ;;  %s6175_s12 = scalar_lea.vmem (!%p7067_p10), [#allocation2], %s4566_s17 }
  0xa4   : > { %5831 = dma.done.wait (%p7068_p3), %s638_s1, 512  }
  0xa5   : > { %5833 = vsyncadd (%p7068_p3), %s638_s1, 4294966784  ;;  %p7069_p8 = scmp.eq.s32.totalorder %s6012_s2, 0 }
  0xa7   : > { %5835 = dma.done.wait (%p7069_p8), [#allocation6], 4096   ;;  %p7070_p6 = pmov %p7069_p8 }
  0xa9   : > { %5837 = vsyncadd (%p7070_p6), [#allocation6], 4294963200  ;;  %p7071_p1 = pmov %p7070_p6 }
  0xab   : > { %5839 = dma.done.wait (%p7071_p1), [#allocation9], 4096   ;;  %p7072_p4 = pmov %p7071_p1 }
  0xac   : > { %p7073_p13 = pmov %p7071_p1 }
  0xad   : > { %5841 = vsyncadd (%p7072_p4), [#allocation9], 4294963200 }
  0xae   : > { %5843 = dma.done.wait (%p7073_p13), [#allocation12], 2048   ;;  %p7074_p0 = pmov %p7071_p1 }
  0xb0   : > { %5845 = vsyncadd (%p7074_p0), [#allocation12], 4294965248  ;;  %p7075_p2 = pmov %p7074_p0 }
  0xb1   : > { %p7076_p5 = pmov %p7074_p0 }
  0xb2   : > { %5847 = dma.done.wait (%p7075_p2), [#allocation15], 1024  }
  0xb3   : > { %5849 = vsyncadd (%p7076_p5), [#allocation15], 4294966272  ;;  %v5884_v0 = vmov 0   ;;  %v5298_v1 = vld [vmem:[#allocation5 + $0xac] ss:$12 sps:$4 sm:$0xff]   ;;  %v726_v8 = vld [vmem:[%s6175_s12] sm:$0xff]   ;;  %v776_v30 = vlaneseq }
  0xb4   : > { %975 = vmatprep.mubr.bf16.mxu0 %v5884_v0  ;;  %v5300_v2 = vld [vmem:[#allocation5 + $0xa8] ss:$12 sps:$4 sm:$0xff]   ;;  %943 = vmatprep.subr.bf16.mxu0 %v5298_v1  ;;  %v5303_v4 = vld [vmem:[#allocation5 + $0x90] ss:$12 sps:$4 sm:$0xff]   ;;  %v5306_v6 = vld [vmem:[#allocation5 + $0x78] ss:$12 sps:$4 sm:$0xff]  }
  0xb5   : > { %v5301_v3 = vld [vmem:[#allocation5 + $0x94] ss:$12 sps:$4 sm:$0xff]   ;;  %944 = vmatpush1.bf16.msra.mxu0 %v5300_v2  ;;  %v5304_v5 = vld [vmem:[#allocation5 + $0x7c] ss:$12 sps:$4 sm:$0xff]   ;;  %v5307_v7 = vld [vmem:[#allocation5 + $0x64] ss:$12 sps:$4 sm:$0xff]   ;;  %4885 = vmatprep.mubr.bf16.mxu1 %v726_v8 }
  0xb6   : > { %945 = vmatprep.subr.bf16.mxu0 %v5301_v3  ;;  %v5309_v9 = vld [vmem:[#allocation5 + $0x60] ss:$12 sps:$4 sm:$0xff]   ;;  %v5326_v11 = vld [vmem:[#allocation5 + $0xb0] ss:$12 sps:$4 sm:$0xff]   ;;  %v5327_v12 = vld [vmem:[#allocation5 + $0x98] ss:$12 sps:$4 sm:$0xff]  }
  0xb7   : > { %v5310_v10 = vld [vmem:[#allocation5 + $0x4c] ss:$12 sps:$4 sm:$0xff]   ;;  %v5312_v13 = vld [vmem:[#allocation5 + $0x48] ss:$12 sps:$4 sm:$0xff]   ;;  %4869 = vmatprep.subr.bf16.mxu1 %v5326_v11  ;;  %v5315_v16 = vld [vmem:[#allocation5 + $0x30] ss:$12 sps:$4 sm:$0xff]  }
  0xb8   : > { %v5313_v14 = vld [vmem:[#allocation5 + $0x34] ss:$12 sps:$4 sm:$0xff]   ;;  %4870 = vmatpush3.bf16.msra.mxu1 %v5326_v11  ;;  %v5316_v17 = vld [vmem:[#allocation5 + $0x1c] ss:$12 sps:$4 sm:$0xff]   ;;  %v5318_v19 = vld [vmem:[#allocation5 + $0x18] ss:$12 sps:$4 sm:$0xff]  }
  0xb9   : > { %946 = vmatpush1.bf16.msra.mxu0 %v5303_v4  ;;  %4871 = vmatprep.subr.bf16.mxu1 %v5327_v12  ;;  %v5328_v15 = vld [vmem:[#allocation5 + $0x80] ss:$12 sps:$4 sm:$0xff]   ;;  %v5329_v18 = vld [vmem:[#allocation5 + $0x68] ss:$12 sps:$4 sm:$0xff]   ;;  %v5319_v20 = vld [vmem:[#allocation5 + $0x4] ss:$12 sps:$4 sm:$0xff]  }
  0xba   : > { %947 = vmatprep.subr.bf16.mxu0 %v5304_v5  ;;  %v5330_v21 = vld [vmem:[#allocation5 + $0x50] ss:$12 sps:$4 sm:$0xff]   ;;  %v5321_v22 = vld [vmem:[#allocation5] ss:$12 sps:$4 sm:$0xff]   ;;  %v5331_v23 = vld [vmem:[#allocation5 + $0x38] ss:$12 sps:$4 sm:$0xff]  }
  0xbb   : > { %v5332_v24 = vld [vmem:[#allocation5 + $0x20] ss:$12 sps:$4 sm:$0xff]   ;;  %v5333_v26 = vld [vmem:[#allocation5 + $0x8] ss:$12 sps:$4 sm:$0xff]   ;;  %v732_v28 = vld [vmem:[%s6175_s12 + $0x18] sm:$0xff]   ;;  %v5885_v29 = vmov 0.0  }
  0xbc   : > { %4872 = vmatpush3.bf16.msra.mxu1 %v5327_v12  ;;  %v728_v25 = vld [vmem:[%s6175_s12 + $0x8] sm:$0xff]   ;;  %v730_v27 = vld [vmem:[%s6175_s12 + $0x10] sm:$0xff]   ;;  %vm5886_vm0 = vmmov 0   ;;  %v6211_v31 = vshrl.u32 %v776_v30, 7  ;;  %s7077_s23 = sld [smem:[#allocation25_spill]]  ;;  %vm1093_vm1 = vcmask 261120  }
  0xbd   : > { %948 = vmatpush1.bf16.msra.mxu0 %v5306_v6  ;;  %4873 = vmatprep.subr.bf16.mxu1 %v5328_v15  ;;  %vm1290_vm2 = vcmask 130048   ;;  %s5887_s18 = smov 96   ;;  %s5888_s27 = smov 64   ;;  %vm3111_vm3 = vcmask 523264   ;;  %vm3120_vm4 = vcmask 785408  }
  0xbe   : > { %949 = vmatprep.subr.bf16.mxu0 %v5307_v7  ;;  %v7034_v32 = vsub.s32 1, %v6211_v31  ;;  %v7033_v39 = vsub.s32 0, %v6211_v31  ;;  %v786_v55 = vsub.s32 2, %v6211_v31  ;;  %s5889_s3 = smov 32   ;;  %s7084_s29 = sld [smem:[#allocation29_spill]] }
  0xbf   : > { %s7085_s13 = sld [smem:[#allocation31_spill]]  ;;  %s4401_s14 = scalar_lea.sflag [#allocation4], %s6171_s15 }
  0xc0   : > { %4874 = vmatpush3.bf16.msra.mxu1 %v5328_v15  ;;  %s7086_s1 = sld [smem:[#allocation33_spill]]  ;;  %p7089_p11 = scmp.ne.s32.totalorder %s7061_s19, 0 }
  0xc1   : > { %950 = vmatpush1.bf16.msra.mxu0 %v5309_v9  ;;  %4875 = vmatprep.subr.bf16.mxu1 %v5329_v18  ;;  %s7087_s9 = sld [smem:[#allocation35_spill]] }
  0xc2   : > { %951 = vmatprep.subr.bf16.mxu0 %v5310_v10  ;;  %v774_v34 = vld [vmem:[%s7077_s23] sm:$0x7]  ;;  %s4574_s23 = sshll.u32 %s6171_s15, 2  ;;  %s7088_s16 = sld [smem:[#allocation36_spill]] }
  0xc3   : > { %v6219_v36 = vrot.slane %v774_v34, %v7034_v32  ;;  %v779_v45 = vrot.slane %v774_v34, %v7033_v39  ;;  %v787_v63 = vrot.slane %v774_v34, %v786_v55 }
  0xc4   : > { %4876 = vmatpush3.bf16.msra.mxu1 %v5329_v18 }
  0xc5   : > { %952 = vmatpush1.bf16.msra.mxu0 %v5312_v13  ;;  %4877 = vmatprep.subr.bf16.mxu1 %v5330_v21 }
  0xc6   : > { %953 = vmatprep.subr.bf16.mxu0 %v5313_v14 }
  0xc8   : > { %4878 = vmatpush3.bf16.msra.mxu1 %v5330_v21 }
  0xc9   : > { %954 = vmatpush1.bf16.msra.mxu0 %v5315_v16  ;;  %4879 = vmatprep.subr.bf16.mxu1 %v5331_v23 }
  0xca   : > { %955 = vmatprep.subr.bf16.mxu0 %v5316_v17 }
  0xcc   : > { %4880 = vmatpush3.bf16.msra.mxu1 %v5331_v23 }
  0xcd   : > { %956 = vmatpush1.bf16.msra.mxu0 %v5318_v19  ;;  %4881 = vmatprep.subr.bf16.mxu1 %v5332_v24 }
  0xce   : > { %957 = vmatprep.subr.bf16.mxu0 %v5319_v20 }
  0xd0   : > { %4882 = vmatpush3.bf16.msra.mxu1 %v5332_v24 }
  0xd1   : > { %958 = vmatpush1.bf16.msra.mxu0 %v5321_v22  ;;  %4883 = vmatprep.subr.bf16.mxu1 %v5333_v26 }
  0xd2   : > { %4905 = vmatprep.subr.bf16.mxu0 %v5885_v29 }
  0xd4   : > { %976 = vmatmul.mubr.bf16.vlgmr.msra.gmra.mxu0 %v726_v8  ;;  %4884 = vmatpush3.bf16.msra.mxu1 %v5333_v26 }
  0xd5   : > { %985 = vmatprep.mubr.bf16.mxu0 %v5884_v0  ;;  %4893 = vmatprep.subr.bf16.mxu1 %v5885_v29 }
  0xd7   : > { %4886 = vmatmul.mubr.bf16.vlgmr.msra.gmra.mxu1 %v728_v25 }
  0xd8   : > { %4889 = vmatprep.mubr.bf16.mxu1 %v730_v27 }
  0xdc   : > { %986 = vmatmul.mubr.bf16.gmra.mxu0 %v728_v25 }
  0xdd   : > { %995 = vmatprep.mubr.bf16.mxu0 %v5884_v0 }
  0xdf   : > { %4890 = vmatmul.mubr.bf16.gmra.mxu1 %v732_v28 }
  0xe0   : > { %4895 = vmatprep.mubr.msk.bf16.mxu1 %vm5886_vm0, %v5885_v29 }
  0xe4   : > { %996 = vmatmul.mubr.bf16.gmra.mxu0 %v730_v27 }
  0xe5   : > { %1005 = vmatprep.mubr.bf16.mxu0 %v5884_v0 }
  0xec   : > { %1006 = vmatmul.mubr.bf16.gmra.mxu0 %v732_v28 }
  0xed   : > { %4907 = vmatprep.mubr.msk.bf16.mxu0 %vm5886_vm0, %v5885_v29 }
 0x194   : > { %v977_v33 = vpop.f32.mrf.mxu0 }
 0x195   : > { %v978_v52 = vadd.f32 %v977_v33, %v779_v45 }
 0x196   : > { %v979_v35 = vpop.f32.mrf.mxu0 }
 0x197   : > { %v980_v40 = vadd.f32 %v979_v35, %v6219_v36  ;;  %v4887_v48 = vpop.f32.mrf.mxu1 }
 0x198   : > { %v981_v37 = vpop.f32.mrf.mxu0 }
 0x199   : > { %v982_v49 = vadd.f32 %v981_v37, %v779_v45  ;;  %v1050_v51 = vpop.f32.mrf.mxu1 }
 0x19a   : > { %v983_v38 = vpop.f32.mrf.mxu0  ;;  %v1051_v22 = vadd.f32 %v1050_v51, %v787_v63 }
 0x19b   : > { %v984_v41 = vadd.f32 %v983_v38, %v6219_v36  ;;  %v4888_v57 = vpop.f32.mrf.mxu1  ;;  %v6234_v58 = vpack.c.bf16 %v982_v49, %v978_v52 }
 0x19c   : > { %v987_v42 = vpop.f32.mrf.mxu0 }
 0x19d   : > { %v6224_v43 = vpack.c.bf16 %v984_v41, %v980_v40  ;;  %v1053_v61 = vpop.f32.mrf.mxu1  ;;  %v988_v7 = vadd.f32 %v987_v42, %v779_v45  ;;  %v1059_v41 = vadd.f32 %v4887_v48, %v787_v63  ;;  %v1062_v42 = vadd.f32 %v4888_v57, %v787_v63 }
 0x19e   : > { %v989_v44 = vpop.f32.mrf.mxu0  ;;  %v1054_v23 = vadd.f32 %v1053_v61, %v787_v63 }
 0x19f   : > { %v1098_v46 = vsel %vm1093_vm1, %v6224_v43, 0  ;;  %v990_v53 = vadd.f32 %v989_v44, %v6219_v36  ;;  %v4891_v2 = vpop.f32.mrf.mxu1  ;;  %v6281_v44 = vpack.c.bf16 %v1062_v42, %v1059_v41 }
 0x1a0   : > { %v991_v47 = vpop.f32.mrf.mxu0  ;;  %4894 = vmatpush3.bf16.xpose.msra.mxu1 %v1098_v46  ;;  %v1075_v4 = vadd.f32 %v4891_v2, %v787_v63  ;;  %v6264_v33 = vpack.c.bf16 %v1054_v23, %v1051_v22 }
 0x1a1   : > { %4899 = vmatprep.subr.bf16.mxu1 %v5885_v29  ;;  %v992_v3 = vadd.f32 %v991_v47, %v779_v45  ;;  %v1066_v6 = vpop.f32.mrf.mxu1 }
 0x1a2   : > { %v993_v50 = vpop.f32.mrf.mxu0  ;;  %v1067_v10 = vadd.f32 %v1066_v6, %v787_v63 }
 0x1a3   : > { %v994_v54 = vadd.f32 %v993_v50, %v6219_v36  ;;  %v4892_v12 = vpop.f32.mrf.mxu1  ;;  %v6247_v13 = vpack.c.bf16 %v992_v3, %v988_v7 }
 0x1a4   : > { %v997_v56 = vpop.f32.mrf.mxu0  ;;  %v1078_v15 = vadd.f32 %v4892_v12, %v787_v63 }
 0x1a5   : > { %v6236_v59 = vpack.c.bf16 %v994_v54, %v990_v53  ;;  %v1069_v17 = vpop.f32.mrf.mxu1  ;;  %v998_v28 = vadd.f32 %v997_v56, %v779_v45 }
 0x1a6   : > { %v999_v60 = vpop.f32.mrf.mxu0  ;;  %v6255_v19 = vpack.c.bf16 %v1078_v15, %v1075_v4  ;;  %v1070_v20 = vadd.f32 %v1069_v17, %v787_v63 }
 0x1a7   : > { %4896 = vmatmul.mubr.msk.bf16.vlgmr.msra.gmra.mxu1 %vm1093_vm1, %v6234_v58  ;;  %v1145_v62 = vsel %vm1093_vm1, %v6236_v59, 0  ;;  %v1000_v8 = vadd.f32 %v999_v60, %v6219_v36 }
 0x1a8   : > { %v1001_v1 = vpop.f32.mrf.mxu0  ;;  %4900 = vmatpush3.bf16.xpose.msra.mxu1 %v1145_v62  ;;  %4901 = vmatprep.mubr.msk.bf16.mxu1 %vm5886_vm0, %v5885_v29  ;;  %v6260_v26 = vpack.c.bf16 %v1070_v20, %v1067_v10 }
 0x1a9   : > { %4911 = vmatprep.subr.bf16.mxu1 %v5885_v29  ;;  %v1002_v24 = vadd.f32 %v1001_v1, %v779_v45 }
 0x1aa   : > { %v1003_v5 = vpop.f32.mrf.mxu0 }
 0x1ab   : > { %v1004_v9 = vadd.f32 %v1003_v5, %v6219_v36  ;;  %v6266_v34 = vpack.c.bf16 %v1002_v24, %v998_v28 }
 0x1ac   : > { %v1007_v11 = vpop.f32.mrf.mxu0 }
 0x1ad   : > { %v6249_v14 = vpack.c.bf16 %v1004_v9, %v1000_v8  ;;  %v1008_v37 = vadd.f32 %v1007_v11, %v779_v45 }
 0x1ae   : > { %v1009_v16 = vpop.f32.mrf.mxu0 }
 0x1af   : > { %4902 = vmatmul.mubr.msk.bf16.vlgmr.msra.gmra.mxu1 %vm1093_vm1, %v6247_v13  ;;  %v1192_v18 = vsel %vm1093_vm1, %v6249_v14, 0  ;;  %v1010_v25 = vadd.f32 %v1009_v16, %v6219_v36 }
 0x1b0   : > { %v1011_v21 = vpop.f32.mrf.mxu0  ;;  %4906 = vmatpush3.bf16.xpose.msra.mxu0 %v1192_v18  ;;  %4913 = vmatprep.mubr.msk.bf16.mxu1 %vm5886_vm0, %v5885_v29 }
 0x1b1   : > { %4917 = vmatprep.subr.bf16.mxu0 %v5885_v29  ;;  %v1012_v38 = vadd.f32 %v1011_v21, %v779_v45 }
 0x1b2   : > { %v1013_v27 = vpop.f32.mrf.mxu0 }
 0x1b3   : > { %v1014_v30 = vadd.f32 %v1013_v27, %v6219_v36  ;;  %v6279_v36 = vpack.c.bf16 %v1012_v38, %v1008_v37 }
 0x1b5   : > { %v6268_v35 = vpack.c.bf16 %v1014_v30, %v1010_v25 }
 0x1b7   : > { %4908 = vmatmul.mubr.msk.bf16.vlgmr.msra.gmra.mxu0 %vm1093_vm1, %v6266_v34  ;;  %v1239_v40 = vsel %vm1093_vm1, %v6268_v35, 0 }
 0x1b8   : > { %4912 = vmatpush3.bf16.xpose.msra.mxu1 %v1239_v40  ;;  %4918 = vmatpush3.bf16.msra.mxu0 %v6264_v33 }
 0x1b9   : > { %4923 = vmatprep.subr.bf16.mxu1 %v5885_v29  ;;  %4919 = vmatprep.mubr.msk.bf16.mxu0 %vm5886_vm0, %v5885_v29 }
 0x1ba   : > { %4929 = vmatprep.subr.bf16.mxu0 %v5885_v29 }
 0x1bf   : > { %4914 = vmatmul.mubr.msk.bf16.vlgmr.msra.gmra.mxu1 %vm1093_vm1, %v6279_v36 }
 0x1c0   : > { %4924 = vmatpush3.bf16.msra.mxu1 %v6281_v44  ;;  %4925 = vmatprep.mubr.msk.bf16.mxu1 %vm5886_vm0, %v5885_v29 }
 0x1c1   : > { %4935 = vmatprep.subr.bf16.mxu1 %v5885_v29 }
 0x267   : > { %v1134_v45 = vpop.f32.mrf.mxu1 }
 0x268   : > { %v1282_v46 = vmul.f32 0.2, %v1134_v45 }
 0x269   : > { %v4897_v47 = vpop.f32.mrf.mxu1 }
 0x26a   : > { %v1291_v48 = vsel %vm1290_vm2, %v1282_v46, -inf }
 0x26b   : > { %1292 = vmax.xlane.f32.xlu0 %v1291_v48  ;;  %v1137_v49 = vpop.f32.mrf.mxu1 }
 0x26c   : > { %v1283_v50 = vmul.f32 0.2, %v1137_v49 }
 0x26d   : > { %v4898_v51 = vpop.f32.mrf.mxu1 }
 0x26e   : > { %v1294_v52 = vsel %vm1290_vm2, %v1283_v50, -inf }
 0x26f   : > { %1295 = vmax.xlane.f32.xlu0 %v1294_v52  ;;  %v1181_v53 = vpop.f32.mrf.mxu1 }
 0x270   : > { %v1284_v54 = vmul.f32 0.2, %v1181_v53 }
 0x271   : > { %v4903_v55 = vpop.f32.mrf.mxu1 }
 0x272   : > { %v1297_v56 = vsel %vm1290_vm2, %v1284_v54, -inf }
 0x273   : > { %1298 = vmax.xlane.f32.xlu1 %v1297_v56  ;;  %v1184_v57 = vpop.f32.mrf.mxu1 }
 0x274   : > { %v1285_v60 = vmul.f32 0.2, %v1184_v57 }
 0x275   : > { %v4904_v61 = vpop.f32.mrf.mxu1 }
 0x276   : > { %v1300_v62 = vsel %vm1290_vm2, %v1285_v60, -inf }
 0x277   : > { %v1228_v63 = vpop.f32.mrf.mxu0  ;;  %1301 = vmax.xlane.f32.xlu1 %v1300_v62 }
 0x278   : > { %v1286_v1 = vmul.f32 0.2, %v1228_v63 }
 0x279   : > { %v4909_v2 = vpop.f32.mrf.mxu0 }
 0x27a   : > { %v1303_v3 = vsel %vm1290_vm2, %v1286_v1, -inf }
 0x27b   : > { %v1231_v4 = vpop.f32.mrf.mxu0  ;;  %1304 = vmax.xlane.f32.xlu0 %v1303_v3 }
 0x27c   : > { %v1287_v5 = vmul.f32 0.2, %v1231_v4 }
 0x27d   : > { %v4910_v6 = vpop.f32.mrf.mxu0 }
 0x27e   : > { %v1306_v7 = vsel %vm1290_vm2, %v1287_v5, -inf }
 0x27f   : > { %1307 = vmax.xlane.f32.xlu1 %v1306_v7  ;;  %v1275_v8 = vpop.f32.mrf.mxu1 }
 0x280   : > { %v1288_v9 = vmul.f32 0.2, %v1275_v8 }
 0x281   : > { %v4915_v10 = vpop.f32.mrf.mxu1 }
 0x282   : > { %v1309_v11 = vsel %vm1290_vm2, %v1288_v9, -inf }
 0x283   : > { %1310 = vmax.xlane.f32.xlu0 %v1309_v11  ;;  %v1278_v12 = vpop.f32.mrf.mxu1 }
 0x284   : > { %v1289_v15 = vmul.f32 0.2, %v1278_v12 }
 0x285   : > { %v4916_v16 = vpop.f32.mrf.mxu1 }
 0x286   : > { %v1312_v17 = vsel %vm1290_vm2, %v1289_v15, -inf }
 0x287   : > { %1313 = vmax.xlane.f32.xlu1 %v1312_v17 }
 0x2f4   : > { %v1293_v18 = vpop.xlane.xlu0 %1292 }
 0x2f5   : > { %v1315_v20 = vsub.f32 %v1282_v46, %v1293_v18 }
 0x2f7   : > { %v1323_v21 = vmul.f32 1.442695, %v1315_v20 }
 0x2f8   : > { %v1296_v22 = vpop.xlane.xlu0 %1295 }
 0x2f9   : > { %5410 = vpow2.f32 %v1323_v21  ;;  %v1316_v23 = vsub.f32 %v1283_v50, %v1296_v22 }
 0x2fb   : > { %v1325_v24 = vmul.f32 1.442695, %v1316_v23 }
 0x2fc   : > { %v1299_v25 = vpop.xlane.xlu1 %1298 }
 0x2fd   : > { %5412 = vpow2.f32 %v1325_v24  ;;  %v1317_v27 = vsub.f32 %v1284_v54, %v1299_v25 }
 0x2ff   : > { %v1327_v28 = vmul.f32 1.442695, %v1317_v27 }
 0x300   : > { %v1302_v30 = vpop.xlane.xlu1 %1301 }
 0x301   : > { %5414 = vpow2.f32 %v1327_v28  ;;  %v1318_v37 = vsub.f32 %v1285_v60, %v1302_v30 }
 0x303   : > { %v1329_v38 = vmul.f32 1.442695, %v1318_v37 }
 0x304   : > { %v1305_v40 = vpop.xlane.xlu0 %1304 }
 0x305   : > { %5416 = vpow2.f32 %v1329_v38  ;;  %v1319_v41 = vsub.f32 %v1286_v1, %v1305_v40 }
 0x306   : > { %v5411_v42 = vpop.eup %5410 }
 0x307   : > { %v1331_v45 = vmul.f32 1.442695, %v1319_v41  ;;  %v1339_v46 = vsel %vm1290_vm2, %v5411_v42, 0.0 }
 0x308   : > { %v1308_v47 = vpop.xlane.xlu1 %1307  ;;  %1340 = vadd.xlane.f32.xlu0 %v1339_v46 }
 0x309   : > { %5418 = vpow2.f32 %v1331_v45  ;;  %v1320_v48 = vsub.f32 %v1287_v5, %v1308_v47 }
 0x30a   : > { %v5413_v49 = vpop.eup %5412 }
 0x30b   : > { %v1333_v50 = vmul.f32 1.442695, %v1320_v48  ;;  %v1342_v51 = vsel %vm1290_vm2, %v5413_v49, 0.0 }
 0x30c   : > { %v1311_v52 = vpop.xlane.xlu0 %1310  ;;  %1343 = vadd.xlane.f32.xlu1 %v1342_v51 }
 0x30d   : > { %5420 = vpow2.f32 %v1333_v50  ;;  %v1321_v53 = vsub.f32 %v1288_v9, %v1311_v52 }
 0x30e   : > { %v5415_v54 = vpop.eup %5414 }
 0x30f   : > { %v1335_v55 = vmul.f32 1.442695, %v1321_v53  ;;  %v1345_v56 = vsel %vm1290_vm2, %v5415_v54, 0.0 }
 0x310   : > { %1346 = vadd.xlane.f32.xlu0 %v1345_v56  ;;  %v1314_v4 = vpop.xlane.xlu1 %1313 }
 0x311   : > { %5422 = vpow2.f32 %v1335_v55  ;;  %v1322_v5 = vsub.f32 %v1289_v15, %v1314_v4 }
 0x312   : > { %v5417_v57 = vpop.eup %5416 }
 0x313   : > { %v1348_v60 = vsel %vm1290_vm2, %v5417_v57, 0.0  ;;  %v1337_v6 = vmul.f32 1.442695, %v1322_v5 }
 0x314   : > { %1349 = vadd.xlane.f32.xlu1 %v1348_v60 }
 0x315   : > { %5424 = vpow2.f32 %v1337_v6 }
 0x316   : > { %v5419_v61 = vpop.eup %5418 }
 0x317   : > { %v1351_v62 = vsel %vm1290_vm2, %v5419_v61, 0.0 }
 0x318   : > { %1352 = vadd.xlane.f32.xlu0 %v1351_v62 }
 0x31a   : > { %v5421_v63 = vpop.eup %5420 }
 0x31b   : > { %v1354_v1 = vsel %vm1290_vm2, %v5421_v63, 0.0 }
 0x31c   : > { %1355 = vadd.xlane.f32.xlu1 %v1354_v1 }
 0x31e   : > { %v6303_v2 = vpop.eup %5422 }
 0x31f   : > { %v1357_v3 = vsel %vm1290_vm2, %v6303_v2, 0.0 }
 0x320   : > { %1358 = vadd.xlane.f32.xlu0 %v1357_v3 }
 0x322   : > { %v6317_v7 = vpop.eup %5424 }
 0x323   : > { %v1360_v8 = vsel %vm1290_vm2, %v6317_v7, 0.0 }
 0x32d   : > { %1620 = vrot.lane.b32.xlu1 %v6236_v59, %s5887_s18 }
 0x331   : > { %1564 = vrot.lane.b32.xlu1 %v6234_v58, %s5887_s18 }
 0x336   : > { %1567 = vrot.lane.b32.xlu0 %v6224_v43, %s5887_s18 }
 0x33a   : > { %1617 = vrot.lane.b32.xlu0 %v6247_v13, %s5887_s18 }
 0x33e   : > { %1670 = vrot.lane.b32.xlu0 %v6266_v34, %s5887_s18 }
 0x355   : > { %1361 = vadd.xlane.f32.xlu1 %v1360_v8 }
 0x366   : > { %1673 = vrot.lane.b32.xlu1 %v6249_v14, %s5887_s18 }
 0x36a   : > { %1726 = vrot.lane.b32.xlu1 %v6268_v35, %s5887_s18 }
 0x36e   : > { %1723 = vrot.lane.b32.xlu1 %v6279_v36, %s5887_s18 }
 0x391   : > { %v1341_v9 = vpop.xlane.xlu0 %1340 }
 0x392   : > { %5426 = vrcp.f32 %v1341_v9 }
 0x395   : > { %v1344_v10 = vpop.xlane.xlu1 %1343 }
 0x396   : > { %5428 = vrcp.f32 %v1344_v10 }
 0x399   : > { %v1347_v11 = vpop.xlane.xlu0 %1346 }
 0x39a   : > { %5430 = vrcp.f32 %v1347_v11 }
 0x39d   : > { %v1350_v12 = vpop.xlane.xlu1 %1349 }
 0x39e   : > { %5432 = vrcp.f32 %v1350_v12 }
 0x39f   : > { %v5427_v15 = vpop.eup %5426 }
 0x3a0   : > { %v1371_v18 = vmul.f32 %v5427_v15, %v5411_v42 }
 0x3a1   : > { %v1353_v16 = vpop.xlane.xlu0 %1352 }
 0x3a2   : > { %5434 = vrcp.f32 %v1353_v16 }
 0x3a3   : > { %v5429_v17 = vpop.eup %5428 }
 0x3a4   : > { %v1372_v20 = vmul.f32 %v5429_v17, %v5413_v49 }
 0x3a5   : > { %v1356_v21 = vpop.xlane.xlu1 %1355 }
 0x3a6   : > { %5436 = vrcp.f32 %v1356_v21  ;;  %v1379_v22 = vpack.c.bf16 %v1372_v20, %v1371_v18 }
 0x3a7   : > { %v5431_v23 = vpop.eup %5430 }
 0x3a8   : > { %4920 = vmatmul.mubr.msk.bf16.vlgmr.msra.gmra.mxu0 %vm1290_vm2, %v1379_v22  ;;  %v1373_v25 = vmul.f32 %v5431_v23, %v5415_v54 }
 0x3a9   : > { %4930 = vmatpush3.bf16.msra.mxu0 %v6260_v26  ;;  %4931 = vmatprep.mubr.msk.bf16.mxu0 %vm5886_vm0, %v5885_v29  ;;  %v1359_v30 = vpop.xlane.xlu0 %1358  ;;  %v1621_v47 = vpop.permute.xlu1 %1620 }
 0x3aa   : > { %4941 = vmatprep.subr.bf16.mxu0 %v5885_v29  ;;  %5438 = vrcp.f32 %v1359_v30 }
 0x3ab   : > { %v5433_v24 = vpop.eup %5432 }
 0x3ac   : > { %v1374_v27 = vmul.f32 %v5433_v24, %v5417_v57 }
 0x3ad   : > { %v1568_v42 = vpop.permute.xlu0 %1567  ;;  %v1565_v48 = vpop.permute.xlu1 %1564 }
 0x3ae   : > { %v1380_v28 = vpack.c.bf16 %v1374_v27, %v1373_v25  ;;  %v1573_v46 = vsel %vm1093_vm1, %v1568_v42, 0 }
 0x3af   : > { %v5435_v37 = vpop.eup %5434 }
 0x3b0   : > { %4926 = vmatmul.mubr.msk.bf16.vlgmr.msra.gmra.mxu1 %vm1290_vm2, %v1380_v28  ;;  %v1375_v40 = vmul.f32 %v5435_v37, %v5419_v61  ;;  %v1626_v61 = vsel %vm1093_vm1, %v1621_v47, 0 }
 0x3b1   : > { %4936 = vmatpush3.bf16.msra.mxu1 %v6255_v19  ;;  %4937 = vmatprep.mubr.msk.bf16.mxu1 %vm5886_vm0, %v5885_v29  ;;  %v1618_v52 = vpop.permute.xlu0 %1617 }
 0x3b2   : > { %4947 = vmatprep.subr.bf16.mxu1 %v5885_v29 }
 0x3b3   : > { %v5437_v38 = vpop.eup %5436 }
 0x3b4   : > { %v1376_v41 = vmul.f32 %v5437_v38, %v5421_v63 }
 0x3b5   : > { %v1671_v54 = vpop.permute.xlu0 %1670 }
 0x3b6   : > { %v1381_v45 = vpack.c.bf16 %v1376_v41, %v1375_v40 }
 0x3b7   : > { %v5439_v53 = vpop.eup %5438 }
 0x3b8   : > { %4932 = vmatmul.mubr.msk.bf16.vlgmr.msra.gmra.mxu0 %vm1290_vm2, %v1381_v45  ;;  %v1377_v56 = vmul.f32 %v5439_v53, %v6303_v2 }
 0x3b9   : > { %4942 = vmatpush3.bf16.xpose.msra.mxu0 %v1573_v46  ;;  %4943 = vmatprep.mubr.msk.bf16.mxu0 %vm5886_vm0, %v5885_v29 }
 0x3ba   : > { %4953 = vmatprep.subr.bf16.mxu0 %v5885_v29 }
 0x3c0   : > { %4944 = vmatmul.mubr.msk.bf16.vlgmr.msra.gmra.mxu0 %vm1093_vm1, %v1565_v48 }
 0x3c1   : > { %4955 = vmatprep.mubr.msk.bf16.mxu0 %vm5886_vm0, %v5885_v29 }
 0x3de   : > { %v1362_v49 = vpop.xlane.xlu1 %1361 }
 0x3df   : > { %5440 = vrcp.f32 %v1362_v49 }
 0x3e2   : > { %v1674_v50 = vpop.permute.xlu1 %1673 }
 0x3e3   : > { %v1679_v51 = vsel %vm1093_vm1, %v1674_v50, 0 }
 0x3e4   : > { %4954 = vmatpush3.bf16.xpose.msra.mxu0 %v1679_v51 }
 0x3e5   : > { %4965 = vmatprep.subr.bf16.mxu0 %v5885_v29 }
 0x3e6   : > { %v1727_v62 = vpop.permute.xlu1 %1726 }
 0x3e7   : > { %v1732_v63 = vsel %vm1093_vm1, %v1727_v62, 0 }
 0x3ea   : > { %v1724_v1 = vpop.permute.xlu1 %1723 }
 0x3eb   : > { %4956 = vmatmul.mubr.msk.bf16.vlgmr.msra.gmra.mxu0 %vm1093_vm1, %v1671_v54 }
 0x3ec   : > { %v5441_v55 = vpop.eup %5440  ;;  %4967 = vmatprep.mubr.msk.bf16.mxu0 %vm5886_vm0, %v5885_v29 }
 0x3ed   : > { %v1378_v57 = vmul.f32 %v5441_v55, %v6317_v7 }
 0x3ef   : > { %v1382_v60 = vpack.c.bf16 %v1378_v57, %v1377_v56 }
 0x3f1   : > { %4938 = vmatmul.mubr.msk.bf16.vlgmr.msra.gmra.mxu1 %vm1290_vm2, %v1382_v60 }
 0x3f2   : > { %4948 = vmatpush3.bf16.xpose.msra.mxu1 %v1626_v61  ;;  %4949 = vmatprep.mubr.msk.bf16.mxu1 %vm5886_vm0, %v5885_v29 }
 0x3f3   : > { %4959 = vmatprep.subr.bf16.mxu1 %v5885_v29 }
 0x3f9   : > { %4950 = vmatmul.mubr.msk.bf16.vlgmr.msra.gmra.mxu1 %vm1093_vm1, %v1618_v52 }
 0x3fa   : > { %4960 = vmatpush3.bf16.xpose.msra.mxu1 %v1732_v63  ;;  %4961 = vmatprep.mubr.msk.bf16.mxu1 %vm5886_vm0, %v5885_v29 }
 0x3fb   : > { %4971 = vmatprep.subr.bf16.mxu1 %v5885_v29 }
 0x401   : > { %4962 = vmatmul.mubr.msk.bf16.vlgmr.msra.gmra.mxu1 %vm1093_vm1, %v1724_v1 }
 0x402   : > { %4973 = vmatprep.mubr.msk.bf16.mxu1 %vm5886_vm0, %v5885_v29 }
 0x468   : > { %v6365_v2 = vpop.f32.mrf.mxu0 }
 0x46a   : > { %v4921_v3 = vpop.f32.mrf.mxu0 }
 0x46c   : > { %v6367_v4 = vpop.f32.mrf.mxu0 }
 0x46e   : > { %v4922_v6 = vpop.f32.mrf.mxu0 }
 0x470   : > { %v6371_v7 = vpop.f32.mrf.mxu1 }
 0x472   : > { %v4927_v8 = vpop.f32.mrf.mxu1 }
 0x474   : > { %v6373_v9 = vpop.f32.mrf.mxu1 }
 0x476   : > { %v4928_v11 = vpop.f32.mrf.mxu1 }
 0x478   : > { %v6377_v12 = vpop.f32.mrf.mxu0 }
 0x47a   : > { %v4933_v15 = vpop.f32.mrf.mxu0 }
 0x47c   : > { %v6379_v16 = vpop.f32.mrf.mxu0 }
 0x47e   : > { %v4934_v18 = vpop.f32.mrf.mxu0 }
 0x480   : > { %v1609_v20 = vpop.f32.mrf.mxu0 }
 0x481   : > { %v1775_v21 = vmul.f32 0.2, %v1609_v20 }
 0x482   : > { %v4945_v22 = vpop.f32.mrf.mxu0 }
 0x483   : > { %v1783_v23 = vsel %vm1290_vm2, %v1775_v21, -inf }
 0x484   : > { %1784 = vmax.xlane.f32.xlu0 %v1783_v23  ;;  %v1612_v24 = vpop.f32.mrf.mxu0 }
 0x485   : > { %v1776_v25 = vmul.f32 0.2, %v1612_v24 }
 0x486   : > { %v4946_v27 = vpop.f32.mrf.mxu0 }
 0x487   : > { %v1786_v28 = vsel %vm1290_vm2, %v1776_v25, -inf }
 0x488   : > { %1787 = vmax.xlane.f32.xlu1 %v1786_v28 }
 0x4ab   : > { %v1715_v30 = vpop.f32.mrf.mxu0 }
 0x4ac   : > { %v1779_v57 = vmul.f32 0.2, %v1715_v30 }
 0x4ad   : > { %v4957_v37 = vpop.f32.mrf.mxu0 }
 0x4ae   : > { %v1795_v1 = vsel %vm1290_vm2, %v1779_v57, -inf }
 0x4af   : > { %v1718_v38 = vpop.f32.mrf.mxu0 }
 0x4b0   : > { %v1780_v40 = vmul.f32 0.2, %v1718_v38 }
 0x4b1   : > { %v6385_v41 = vpop.f32.mrf.mxu1  ;;  %v4958_v42 = vpop.f32.mrf.mxu0 }
 0x4b2   : > { %v1798_v45 = vsel %vm1290_vm2, %v1780_v40, -inf }
 0x4b3   : > { %1799 = vmax.xlane.f32.xlu1 %v1798_v45  ;;  %v4939_v46 = vpop.f32.mrf.mxu1 }
 0x4b5   : > { %v6388_v47 = vpop.f32.mrf.mxu1 }
 0x4b7   : > { %v4940_v49 = vpop.f32.mrf.mxu1 }
 0x4b9   : > { %v1662_v50 = vpop.f32.mrf.mxu1 }
 0x4ba   : > { %v1777_v51 = vmul.f32 0.2, %v1662_v50 }
 0x4bb   : > { %v4951_v52 = vpop.f32.mrf.mxu1 }
 0x4bc   : > { %v1789_v53 = vsel %vm1290_vm2, %v1777_v51, -inf }
 0x4bd   : > { %1790 = vmax.xlane.f32.xlu0 %v1789_v53  ;;  %v1665_v54 = vpop.f32.mrf.mxu1 }
 0x4be   : > { %v1778_v55 = vmul.f32 0.2, %v1665_v54 }
 0x4bf   : > { %v4952_v56 = vpop.f32.mrf.mxu1 }
 0x4c0   : > { %v1792_v60 = vsel %vm1290_vm2, %v1778_v55, -inf }
 0x4c1   : > { %1793 = vmax.xlane.f32.xlu0 %v1792_v60  ;;  %v1768_v61 = vpop.f32.mrf.mxu1 }
 0x4c2   : > { %v1781_v63 = vmul.f32 0.2, %v1768_v61 }
 0x4c3   : > { %v4963_v62 = vpop.f32.mrf.mxu1 }
 0x4c4   : > { %1924 = vrot.lane.b32.xlu1 %v6281_v44, %s5887_s18  ;;  %v1801_v8 = vsel %vm1290_vm2, %v1781_v63, -inf }
 0x4c5   : > { %1796 = vmax.xlane.f32.xlu0 %v1795_v1  ;;  %v1771_v3 = vpop.f32.mrf.mxu1 }
 0x4c6   : > { %v6402_v11 = vmul.f32 0.2, %v1771_v3 }
 0x4c7   : > { %v4964_v6 = vpop.f32.mrf.mxu1 }
 0x4c8   : > { %1972 = vrot.lane.b32.xlu1 %v6260_v26, %s5887_s18  ;;  %v1804_v15 = vsel %vm1290_vm2, %v6402_v11, -inf }
 0x4c9   : > { %1802 = vmax.xlane.f32.xlu0 %v1801_v8 }
 0x4df   : > { %1876 = vrot.lane.b32.xlu0 %v6264_v33, %s5887_s18 }
 0x4ec   : > { %1805 = vmax.xlane.f32.xlu1 %v1804_v15 }
 0x4fd   : > { %2020 = vrot.lane.b32.xlu1 %v6255_v19, %s5887_s18 }
 0x50d   : > { %v1785_v18 = vpop.xlane.xlu0 %1784 }
 0x50e   : > { %v1807_v20 = vsub.f32 %v1775_v21, %v1785_v18 }
 0x510   : > { %v1815_v22 = vmul.f32 1.442695, %v1807_v20 }
 0x511   : > { %v1788_v23 = vpop.xlane.xlu1 %1787 }
 0x512   : > { %5442 = vpow2.f32 %v1815_v22  ;;  %v1808_v24 = vsub.f32 %v1776_v25, %v1788_v23 }
 0x514   : > { %v1817_v27 = vmul.f32 1.442695, %v1808_v24 }
 0x516   : > { %5444 = vpow2.f32 %v1817_v27 }
 0x51f   : > { %v6408_v28 = vpop.eup %5442 }
 0x520   : > { %v1831_v30 = vsel %vm1290_vm2, %v6408_v28, 0.0 }
 0x521   : > { %1832 = vadd.xlane.f32.xlu0 %v1831_v30 }
 0x523   : > { %v6412_v37 = vpop.eup %5444 }
 0x524   : > { %v1834_v38 = vsel %vm1290_vm2, %v6412_v37, 0.0 }
 0x525   : > { %1835 = vadd.xlane.f32.xlu1 %v1834_v38 }
 0x53c   : > { %v1800_v42 = vpop.xlane.xlu1 %1799 }
 0x53d   : > { %v1812_v46 = vsub.f32 %v1780_v40, %v1800_v42 }
 0x53f   : > { %v1825_v53 = vmul.f32 1.442695, %v1812_v46 }
 0x540   : > { %v1925_v21 = vpop.permute.xlu1 %1924 }
 0x541   : > { %4972 = vmatpush3.bf16.msra.mxu1 %v1925_v21 }
 0x542   : > { %4983 = vmatprep.subr.bf16.mxu1 %v5885_v29 }
 0x544   : > { %v1973_v23 = vpop.permute.xlu1 %1972 }
 0x546   : > { %v1791_v25 = vpop.xlane.xlu0 %1790 }
 0x547   : > { %v1809_v45 = vsub.f32 %v1777_v51, %v1791_v25 }
 0x549   : > { %v1819_v49 = vmul.f32 1.442695, %v1809_v45 }
 0x54a   : > { %v1794_v50 = vpop.xlane.xlu0 %1793 }
 0x54b   : > { %5446 = vpow2.f32 %v1819_v49  ;;  %v1810_v52 = vsub.f32 %v1778_v55, %v1794_v50 }
 0x54d   : > { %v1821_v54 = vmul.f32 1.442695, %v1810_v52 }
 0x54e   : > { %v1797_v56 = vpop.xlane.xlu0 %1796 }
 0x54f   : > { %5448 = vpow2.f32 %v1821_v54  ;;  %v1811_v60 = vsub.f32 %v1779_v57, %v1797_v56 }
 0x550   : > { %5450 = vpow2.f32 %v1825_v53 }
 0x551   : > { %v1823_v61 = vmul.f32 1.442695, %v1811_v60 }
 0x552   : > { %v1803_v62 = vpop.xlane.xlu0 %1802 }
 0x553   : > { %5452 = vpow2.f32 %v1823_v61  ;;  %v1813_v1 = vsub.f32 %v1781_v63, %v1803_v62 }
 0x555   : > { %v1827_v3 = vmul.f32 1.442695, %v1813_v1 }
 0x556   : > { %v1877_v6 = vpop.permute.xlu0 %1876 }
 0x557   : > { %5454 = vpow2.f32 %v1827_v3  ;;  %4966 = vmatpush3.bf16.msra.mxu0 %v1877_v6 }
 0x558   : > { %v5447_v51 = vpop.eup %5446  ;;  %4977 = vmatprep.subr.bf16.mxu0 %v5885_v29 }
 0x559   : > { %v1837_v40 = vsel %vm1290_vm2, %v5447_v51, 0.0 }
 0x55a   : > { %1838 = vadd.xlane.f32.xlu0 %v1837_v40 }
 0x55c   : > { %v5449_v55 = vpop.eup %5448 }
 0x55d   : > { %v1840_v8 = vsel %vm1290_vm2, %v5449_v55, 0.0  ;;  %v5451_v15 = vpop.eup %5450 }
 0x55e   : > { %1841 = vadd.xlane.f32.xlu1 %v1840_v8  ;;  %v1846_v63 = vsel %vm1290_vm2, %v5451_v15, 0.0 }
 0x560   : > { %v5453_v57 = vpop.eup %5452 }
 0x561   : > { %v1843_v18 = vsel %vm1290_vm2, %v5453_v57, 0.0 }
 0x562   : > { %1844 = vadd.xlane.f32.xlu0 %v1843_v18  ;;  %1847 = vadd.xlane.f32.xlu1 %v1846_v63 }
 0x564   : > { %v6422_v20 = vpop.eup %5454 }
 0x565   : > { %v1849_v22 = vsel %vm1290_vm2, %v6422_v20, 0.0 }
 0x566   : > { %1850 = vadd.xlane.f32.xlu0 %v1849_v22 }
 0x573   : > { %2124 = vrot.lane.b32.xlu1 %v6236_v59, %s5888_s27 }
 0x575   : > { %v1806_v24 = vpop.xlane.xlu1 %1805 }
 0x576   : > { %v1814_v27 = vsub.f32 %v6402_v11, %v1806_v24 }
 0x578   : > { %v1829_v30 = vmul.f32 1.442695, %v1814_v27 }
 0x579   : > { %v2021_v11 = vpop.permute.xlu1 %2020 }
 0x57a   : > { %5456 = vpow2.f32 %v1829_v30 }
 0x57c   : > { %2073 = vrot.lane.b32.xlu0 %v6224_v43, %s5888_s27 }
 0x580   : > { %2071 = vrot.lane.b32.xlu0 %v6234_v58, %s5888_s27 }
 0x584   : > { %2122 = vrot.lane.b32.xlu0 %v6247_v13, %s5888_s27 }
 0x587   : > { %v6437_v38 = vpop.eup %5456 }
 0x588   : > { %2173 = vrot.lane.b32.xlu0 %v6266_v34, %s5888_s27  ;;  %v1852_v42 = vsel %vm1290_vm2, %v6437_v38, 0.0 }
 0x597   : > { %1853 = vadd.xlane.f32.xlu1 %v1852_v42 }
 0x5a8   : > { %2175 = vrot.lane.b32.xlu1 %v6249_v14, %s5888_s27 }
 0x5aa   : > { %v1833_v21 = vpop.xlane.xlu0 %1832 }
 0x5ab   : > { %5458 = vrcp.f32 %v1833_v21 }
 0x5ac   : > { %2226 = vrot.lane.b32.xlu1 %v6268_v35, %s5888_s27 }
 0x5ae   : > { %v1836_v25 = vpop.xlane.xlu1 %1835 }
 0x5af   : > { %5460 = vrcp.f32 %v1836_v25 }
 0x5b0   : > { %2224 = vrot.lane.b32.xlu1 %v6279_v36, %s5888_s27 }
 0x5b8   : > { %v5459_v45 = vpop.eup %5458 }
 0x5b9   : > { %v1863_v49 = vmul.f32 %v5459_v45, %v6408_v28 }
 0x5bc   : > { %v5461_v46 = vpop.eup %5460 }
 0x5bd   : > { %v1864_v50 = vmul.f32 %v5461_v46, %v6412_v37 }
 0x5bf   : > { %v1871_v52 = vpack.c.bf16 %v1864_v50, %v1863_v49 }
 0x5c1   : > { %4968 = vmatmul.mubr.msk.bf16.vlgmr.msra.gmra.mxu0 %vm1290_vm2, %v1871_v52 }
 0x5c2   : > { %4978 = vmatpush3.bf16.msra.mxu0 %v1973_v23  ;;  %4979 = vmatprep.mubr.msk.bf16.mxu0 %vm5886_vm0, %v5885_v29 }
 0x5c3   : > { %4989 = vmatprep.subr.bf16.mxu0 %v5885_v29 }
 0x5e3   : > { %v1839_v53 = vpop.xlane.xlu0 %1838 }
 0x5e4   : > { %5462 = vrcp.f32 %v1839_v53 }
 0x5e7   : > { %v1842_v54 = vpop.xlane.xlu1 %1841 }
 0x5e8   : > { %5464 = vrcp.f32 %v1842_v54 }
 0x5eb   : > { %v1845_v56 = vpop.xlane.xlu0 %1844  ;;  %v1848_v60 = vpop.xlane.xlu1 %1847 }
 0x5ec   : > { %5466 = vrcp.f32 %v1845_v56 }
 0x5ed   : > { %5468 = vrcp.f32 %v1848_v60 }
 0x5ef   : > { %v1851_v37 = vpop.xlane.xlu0 %1850 }
 0x5f0   : > { %5470 = vrcp.f32 %v1851_v37 }
 0x5f1   : > { %v5463_v28 = vpop.eup %5462 }
 0x5f2   : > { %v1865_v62 = vmul.f32 %v5463_v28, %v5447_v51 }
 0x5f3   : > { %v2074_v63 = vpop.permute.xlu0 %2073 }
 0x5f4   : > { %v2079_v23 = vsel %vm1093_vm1, %v2074_v63, 0 }
 0x5f5   : > { %v5465_v61 = vpop.eup %5464 }
 0x5f6   : > { %v1866_v1 = vmul.f32 %v5465_v61, %v5449_v55  ;;  %v2125_v55 = vpop.permute.xlu1 %2124 }
 0x5f7   : > { %v2072_v51 = vpop.permute.xlu0 %2071  ;;  %v2130_v46 = vsel %vm1093_vm1, %v2125_v55, 0 }
 0x5f8   : > { %v1872_v3 = vpack.c.bf16 %v1866_v1, %v1865_v62 }
 0x5f9   : > { %v5467_v6 = vpop.eup %5466 }
 0x5fa   : > { %v5469_v40 = vpop.eup %5468  ;;  %4974 = vmatmul.mubr.msk.bf16.vlgmr.msra.gmra.mxu1 %vm1290_vm2, %v1872_v3  ;;  %v1867_v8 = vmul.f32 %v5467_v6, %v5453_v57 }
 0x5fb   : > { %4984 = vmatpush3.bf16.msra.mxu1 %v2021_v11  ;;  %v1868_v18 = vmul.f32 %v5469_v40, %v5451_v15  ;;  %4985 = vmatprep.mubr.msk.bf16.mxu1 %vm5886_vm0, %v5885_v29  ;;  %v2123_v27 = vpop.permute.xlu0 %2122 }
 0x5fc   : > { %4995 = vmatprep.subr.bf16.mxu1 %v5885_v29 }
 0x5fd   : > { %v1873_v22 = vpack.c.bf16 %v1868_v18, %v1867_v8  ;;  %v5471_v30 = vpop.eup %5470 }
 0x5fe   : > { %v1869_v21 = vmul.f32 %v5471_v30, %v6422_v20 }
 0x5ff   : > { %4980 = vmatmul.mubr.msk.bf16.vlgmr.msra.gmra.mxu0 %vm1290_vm2, %v1873_v22  ;;  %v2174_v42 = vpop.permute.xlu0 %2173 }
 0x600   : > { %4990 = vmatpush3.bf16.xpose.msra.mxu0 %v2079_v23  ;;  %4991 = vmatprep.mubr.msk.bf16.mxu0 %vm5886_vm0, %v5885_v29 }
 0x601   : > { %5001 = vmatprep.subr.bf16.mxu0 %v5885_v29 }
 0x607   : > { %4992 = vmatmul.mubr.msk.bf16.vlgmr.msra.gmra.mxu0 %vm1093_vm1, %v2072_v51 }
 0x608   : > { %5003 = vmatprep.mubr.msk.bf16.mxu0 %vm5886_vm0, %v5885_v29 }
 0x620   : > { %v1854_v15 = vpop.xlane.xlu1 %1853 }
 0x621   : > { %5472 = vrcp.f32 %v1854_v15 }
 0x624   : > { %v2176_v57 = vpop.permute.xlu1 %2175 }
 0x625   : > { %v2181_v24 = vsel %vm1093_vm1, %v2176_v57, 0 }
 0x626   : > { %5002 = vmatpush3.bf16.xpose.msra.mxu0 %v2181_v24 }
 0x627   : > { %5013 = vmatprep.subr.bf16.mxu0 %v5885_v29 }
 0x628   : > { %v2227_v49 = vpop.permute.xlu1 %2226 }
 0x629   : > { %v2232_v50 = vsel %vm1093_vm1, %v2227_v49, 0 }
 0x62c   : > { %v2225_v20 = vpop.permute.xlu1 %2224 }
 0x62d   : > { %5004 = vmatmul.mubr.msk.bf16.vlgmr.msra.gmra.mxu0 %vm1093_vm1, %v2174_v42 }
 0x62e   : > { %v5473_v11 = vpop.eup %5472  ;;  %5015 = vmatprep.mubr.msk.bf16.mxu0 %vm5886_vm0, %v5885_v29 }
 0x62f   : > { %v1870_v25 = vmul.f32 %v5473_v11, %v6437_v38 }
 0x631   : > { %v1874_v45 = vpack.c.bf16 %v1870_v25, %v1869_v21 }
 0x633   : > { %4986 = vmatmul.mubr.msk.bf16.vlgmr.msra.gmra.mxu1 %vm1290_vm2, %v1874_v45 }
 0x634   : > { %4996 = vmatpush3.bf16.xpose.msra.mxu1 %v2130_v46  ;;  %4997 = vmatprep.mubr.msk.bf16.mxu1 %vm5886_vm0, %v5885_v29 }
 0x635   : > { %5007 = vmatprep.subr.bf16.mxu1 %v5885_v29 }
 0x63b   : > { %4998 = vmatmul.mubr.msk.bf16.vlgmr.msra.gmra.mxu1 %vm1093_vm1, %v2123_v27 }
 0x63c   : > { %5008 = vmatpush3.bf16.xpose.msra.mxu1 %v2232_v50  ;;  %5009 = vmatprep.mubr.msk.bf16.mxu1 %vm5886_vm0, %v5885_v29 }
 0x63d   : > { %5019 = vmatprep.subr.bf16.mxu1 %v5885_v29 }
 0x643   : > { %5010 = vmatmul.mubr.msk.bf16.vlgmr.msra.gmra.mxu1 %vm1093_vm1, %v2225_v20 }
 0x644   : > { %5021 = vmatprep.mubr.msk.bf16.mxu1 %vm5886_vm0, %v5885_v29 }
 0x681   : > { %v6485_v38 = vpop.f32.mrf.mxu0 }
 0x683   : > { %v4969_v52 = vpop.f32.mrf.mxu0 }
 0x685   : > { %v6487_v53 = vpop.f32.mrf.mxu0 }
 0x686   : > { %v2067_v54 = vpack.c.bf16 %v6487_v53, %v6485_v38 }
 0x687   : > { %v4970_v56 = vpop.f32.mrf.mxu0 }
 0x6ba   : > { %v6491_v60 = vpop.f32.mrf.mxu1 }
 0x6bc   : > { %v4975_v28 = vpop.f32.mrf.mxu1 }
 0x6be   : > { %v6493_v61 = vpop.f32.mrf.mxu1 }
 0x6bf   : > { %v2068_v37 = vpack.c.bf16 %v6493_v61, %v6491_v60  ;;  %v6497_v62 = vpop.f32.mrf.mxu0 }
 0x6c0   : > { %v4976_v1 = vpop.f32.mrf.mxu1 }
 0x6c1   : > { %v4981_v3 = vpop.f32.mrf.mxu0 }
 0x6c3   : > { %v6499_v6 = vpop.f32.mrf.mxu0 }
 0x6c4   : > { %v2069_v40 = vpack.c.bf16 %v6499_v6, %v6497_v62 }
 0x6c5   : > { %v4982_v8 = vpop.f32.mrf.mxu0 }
 0x6c7   : > { %v2115_v18 = vpop.f32.mrf.mxu0 }
 0x6c8   : > { %v2275_v63 = vmul.f32 0.2, %v2115_v18 }
 0x6c9   : > { %v4993_v22 = vpop.f32.mrf.mxu0 }
 0x6ca   : > { %v2283_v23 = vsel %vm1290_vm2, %v2275_v63, -inf }
 0x6cb   : > { %2284 = vmax.xlane.f32.xlu0 %v2283_v23  ;;  %v2118_v51 = vpop.f32.mrf.mxu0 }
 0x6cc   : > { %v2276_v55 = vmul.f32 0.2, %v2118_v51 }
 0x6cd   : > { %v4994_v15 = vpop.f32.mrf.mxu0 }
 0x6ce   : > { %v2286_v57 = vsel %vm1290_vm2, %v2276_v55, -inf }
 0x6cf   : > { %2287 = vmax.xlane.f32.xlu1 %v2286_v57 }
 0x6ed   : > { %v2217_v24 = vpop.f32.mrf.mxu0 }
 0x6ee   : > { %v2279_v18 = vmul.f32 0.2, %v2217_v24 }
 0x6ef   : > { %v5005_v27 = vpop.f32.mrf.mxu0 }
 0x6f0   : > { %v2295_v57 = vsel %vm1290_vm2, %v2279_v18, -inf }
 0x6f1   : > { %v2220_v30 = vpop.f32.mrf.mxu0 }
 0x6f2   : > { %v2280_v42 = vmul.f32 0.2, %v2220_v30 }
 0x6f3   : > { %v6505_v11 = vpop.f32.mrf.mxu1  ;;  %v5006_v21 = vpop.f32.mrf.mxu0 }
 0x6f4   : > { %v2298_v25 = vsel %vm1290_vm2, %v2280_v42, -inf }
 0x6f5   : > { %2299 = vmax.xlane.f32.xlu1 %v2298_v25  ;;  %v4987_v45 = vpop.f32.mrf.mxu1 }
 0x6f7   : > { %v6508_v46 = vpop.f32.mrf.mxu1 }
 0x6f8   : > { %v2070_v49 = vpack.c.bf16 %v6508_v46, %v6505_v11 }
 0x6f9   : > { %v4988_v50 = vpop.f32.mrf.mxu1 }
 0x6fb   : > { %v2166_v20 = vpop.f32.mrf.mxu1 }
 0x6fc   : > { %v2277_v52 = vmul.f32 0.2, %v2166_v20 }
 0x6fd   : > { %v4999_v56 = vpop.f32.mrf.mxu1 }
 0x6fe   : > { %v2289_v28 = vsel %vm1290_vm2, %v2277_v52, -inf }
 0x6ff   : > { %2290 = vmax.xlane.f32.xlu0 %v2289_v28  ;;  %v2169_v1 = vpop.f32.mrf.mxu1 }
 0x700   : > { %v2278_v3 = vmul.f32 0.2, %v2169_v1 }
 0x701   : > { %v5000_v8 = vpop.f32.mrf.mxu1 }
 0x702   : > { %v2292_v22 = vsel %vm1290_vm2, %v2278_v3, -inf }
 0x703   : > { %2293 = vmax.xlane.f32.xlu0 %v2292_v22  ;;  %v2268_v23 = vpop.f32.mrf.mxu1 }
 0x704   : > { %v2281_v15 = vmul.f32 0.2, %v2268_v23 }
 0x705   : > { %v5011_v51 = vpop.f32.mrf.mxu1 }
 0x706   : > { %v2301_v25 = vsel %vm1290_vm2, %v2281_v15, -inf }
 0x707   : > { %2296 = vmax.xlane.f32.xlu0 %v2295_v57  ;;  %v2271_v27 = vpop.f32.mrf.mxu1 }
 0x708   : > { %v2282_v30 = vmul.f32 0.2, %v2271_v27 }
 0x709   : > { %v5012_v21 = vpop.f32.mrf.mxu1 }
 0x70a   : > { %v2304_v45 = vsel %vm1290_vm2, %v2282_v30, -inf }
 0x70b   : > { %2302 = vmax.xlane.f32.xlu0 %v2301_v25  ;;  %2305 = vmax.xlane.f32.xlu1 %v2304_v45 }
 0x71c   : > { %2422 = vrot.lane.b32.xlu1 %v6281_v44, %s5888_s27 }
 0x720   : > { %2469 = vrot.lane.b32.xlu1 %v6260_v26, %s5888_s27 }
 0x721   : > { %2375 = vrot.lane.b32.xlu0 %v6264_v33, %s5888_s27 }
 0x724   : > { %2516 = vrot.lane.b32.xlu1 %v6255_v19, %s5888_s27 }
 0x754   : > { %v2285_v24 = vpop.xlane.xlu0 %2284 }
 0x755   : > { %v2307_v50 = vsub.f32 %v2275_v63, %v2285_v24 }
 0x757   : > { %v2315_v20 = vmul.f32 1.442695, %v2307_v50 }
 0x758   : > { %v2288_v56 = vpop.xlane.xlu1 %2287 }
 0x759   : > { %5474 = vpow2.f32 %v2315_v20  ;;  %v2308_v28 = vsub.f32 %v2276_v55, %v2288_v56 }
 0x75b   : > { %v2317_v1 = vmul.f32 1.442695, %v2308_v28 }
 0x75d   : > { %5476 = vpow2.f32 %v2317_v1 }
 0x766   : > { %v6525_v8 = vpop.eup %5474 }
 0x767   : > { %v2331_v22 = vsel %vm1290_vm2, %v6525_v8, 0.0 }
 0x768   : > { %2332 = vadd.xlane.f32.xlu0 %v2331_v22 }
 0x76a   : > { %v6529_v23 = vpop.eup %5476 }
 0x76b   : > { %v2334_v51 = vsel %vm1290_vm2, %v6529_v23, 0.0 }
 0x76c   : > { %2335 = vadd.xlane.f32.xlu1 %v2334_v51 }
 0x77e   : > { %v2300_v57 = vpop.xlane.xlu1 %2299 }
 0x77f   : > { %v2312_v21 = vsub.f32 %v2280_v42, %v2300_v57 }
 0x781   : > { %v2325_v24 = vmul.f32 1.442695, %v2312_v21 }
 0x788   : > { %v2291_v63 = vpop.xlane.xlu0 %2290 }
 0x789   : > { %v2309_v27 = vsub.f32 %v2277_v52, %v2291_v63 }
 0x78b   : > { %v2319_v25 = vmul.f32 1.442695, %v2309_v27 }
 0x78c   : > { %v2294_v55 = vpop.xlane.xlu0 %2293 }
 0x78d   : > { %5478 = vpow2.f32 %v2319_v25  ;;  %v2310_v45 = vsub.f32 %v2278_v3, %v2294_v55 }
 0x78f   : > { %v2321_v50 = vmul.f32 1.442695, %v2310_v45 }
 0x790   : > { %v2297_v20 = vpop.xlane.xlu0 %2296 }
 0x791   : > { %5480 = vpow2.f32 %v2321_v50  ;;  %v2311_v56 = vsub.f32 %v2279_v18, %v2297_v20 }
 0x792   : > { %5482 = vpow2.f32 %v2325_v24 }
 0x793   : > { %v2323_v28 = vmul.f32 1.442695, %v2311_v56 }
 0x794   : > { %v2303_v1 = vpop.xlane.xlu0 %2302  ;;  %v2306_v22 = vpop.xlane.xlu1 %2305 }
 0x795   : > { %5484 = vpow2.f32 %v2323_v28  ;;  %v2313_v39 = vsub.f32 %v2281_v15, %v2303_v1  ;;  %v2314_v51 = vsub.f32 %v2282_v30, %v2306_v22 }
 0x797   : > { %v2327_v32 = vmul.f32 1.442695, %v2313_v39  ;;  %v2329_v48 = vmul.f32 1.442695, %v2314_v51 }
 0x798   : > { %v2376_v52 = vpop.permute.xlu0 %2375  ;;  %v2423_v42 = vpop.permute.xlu1 %2422 }
 0x799   : > { %5486 = vpow2.f32 %v2327_v32  ;;  %5014 = vmatpush3.bf16.msra.mxu0 %v2376_v52  ;;  %5020 = vmatpush3.bf16.msra.mxu1 %v2423_v42 }
 0x79a   : > { %v5479_v3 = vpop.eup %5478  ;;  %5488 = vpow2.f32 %v2329_v48  ;;  %5025 = vmatprep.subr.bf16.mxu0 %v5885_v29  ;;  %5031 = vmatprep.subr.bf16.mxu1 %v5885_v29 }
 0x79b   : > { %v2337_v18 = vsel %vm1290_vm2, %v5479_v3, 0.0 }
 0x79c   : > { %2338 = vadd.xlane.f32.xlu0 %v2337_v18 }
 0x79e   : > { %v5481_v57 = vpop.eup %5480 }
 0x79f   : > { %v2340_v15 = vsel %vm1290_vm2, %v5481_v57, 0.0  ;;  %v5483_v30 = vpop.eup %5482 }
 0x7a0   : > { %2341 = vadd.xlane.f32.xlu1 %v2340_v15  ;;  %v2346_v32 = vsel %vm1290_vm2, %v5483_v30, 0.0 }
 0x7a2   : > { %v5485_v39 = vpop.eup %5484 }
 0x7a3   : > { %v2343_v63 = vsel %vm1290_vm2, %v5485_v39, 0.0 }
 0x7a4   : > { %2344 = vadd.xlane.f32.xlu0 %v2343_v63  ;;  %2347 = vadd.xlane.f32.xlu1 %v2346_v32 }
 0x7a6   : > { %v5487_v48 = vpop.eup %5486 }
 0x7a7   : > { %v6539_v27 = vpop.eup %5488  ;;  %v2349_v21 = vsel %vm1290_vm2, %v5487_v48, 0.0 }
 0x7a8   : > { %2350 = vadd.xlane.f32.xlu0 %v2349_v21  ;;  %v2352_v25 = vsel %vm1290_vm2, %v6539_v27, 0.0 }
 0x7a9   : > { %2353 = vadd.xlane.f32.xlu1 %v2352_v25 }
 0x7ba   : > { %2620 = vrot.lane.b32.xlu1 %v6236_v59, %s5889_s3  ;;  %v2470_v59 = vpop.permute.xlu1 %2469 }
 0x7be   : > { %2618 = vrot.lane.b32.xlu1 %v6247_v13, %s5889_s3  ;;  %2569 = vrot.lane.b32.xlu0 %v6224_v43, %s5889_s3  ;;  %v2517_v13 = vpop.permute.xlu1 %2516 }
 0x7c2   : > { %2722 = vrot.lane.b32.xlu1 %v6268_v35, %s5889_s3  ;;  %2567 = vrot.lane.b32.xlu0 %v6234_v58, %s5889_s3 }
 0x7c6   : > { %2720 = vrot.lane.b32.xlu1 %v6279_v36, %s5889_s3  ;;  %2671 = vrot.lane.b32.xlu0 %v6249_v14, %s5889_s3 }
 0x7ca   : > { %2669 = vrot.lane.b32.xlu0 %v6266_v34, %s5889_s3 }
 0x7f1   : > { %v2333_v55 = vpop.xlane.xlu0 %2332 }
 0x7f2   : > { %5490 = vrcp.f32 %v2333_v55 }
 0x7f5   : > { %v2336_v43 = vpop.xlane.xlu1 %2335 }
 0x7f6   : > { %5492 = vrcp.f32 %v2336_v43 }
 0x7ff   : > { %v5491_v45 = vpop.eup %5490 }
 0x800   : > { %v2363_v24 = vmul.f32 %v5491_v45, %v6525_v8 }
 0x803   : > { %v5493_v35 = vpop.eup %5492 }
 0x804   : > { %v2364_v58 = vmul.f32 %v5493_v35, %v6529_v23 }
 0x806   : > { %v2371_v50 = vpack.c.bf16 %v2364_v58, %v2363_v24 }
 0x808   : > { %5016 = vmatmul.mubr.msk.bf16.vlgmr.msra.gmra.mxu0 %vm1290_vm2, %v2371_v50 }
 0x809   : > { %5026 = vmatpush3.bf16.msra.mxu0 %v2470_v59  ;;  %5027 = vmatprep.mubr.msk.bf16.mxu0 %vm5886_vm0, %v5885_v29 }
 0x80a   : > { %5037 = vmatprep.subr.bf16.mxu0 %v5885_v29 }
 0x825   : > { %v2339_v14 = vpop.xlane.xlu0 %2338 }
 0x826   : > { %5494 = vrcp.f32 %v2339_v14 }
 0x829   : > { %v2342_v34 = vpop.xlane.xlu1 %2341 }
 0x82a   : > { %5496 = vrcp.f32 %v2342_v34 }
 0x82d   : > { %v2345_v36 = vpop.xlane.xlu0 %2344  ;;  %v2348_v20 = vpop.xlane.xlu1 %2347 }
 0x82e   : > { %5498 = vrcp.f32 %v2345_v36 }
 0x82f   : > { %5500 = vrcp.f32 %v2348_v20 }
 0x831   : > { %v2351_v8 = vpop.xlane.xlu0 %2350 }
 0x832   : > { %5502 = vrcp.f32 %v2351_v8  ;;  %v2354_v23 = vpop.xlane.xlu1 %2353 }
 0x833   : > { %5504 = vrcp.f32 %v2354_v23  ;;  %v5495_v56 = vpop.eup %5494 }
 0x834   : > { %v2365_v1 = vmul.f32 %v5495_v56, %v5479_v3 }
 0x835   : > { %v2570_v51 = vpop.permute.xlu0 %2569 }
 0x836   : > { %v2621_v32 = vpop.permute.xlu1 %2620  ;;  %v2575_v55 = vsel %vm1093_vm1, %v2570_v51, 0 }
 0x837   : > { %v5497_v28 = vpop.eup %5496 }
 0x838   : > { %v2366_v22 = vmul.f32 %v5497_v28, %v5481_v57 }
 0x839   : > { %v2568_v3 = vpop.permute.xlu0 %2567 }
 0x83a   : > { %v2372_v52 = vpack.c.bf16 %v2366_v22, %v2365_v1 }
 0x83b   : > { %v5499_v42 = vpop.eup %5498 }
 0x83c   : > { %v5501_v18 = vpop.eup %5500  ;;  %5022 = vmatmul.mubr.msk.bf16.vlgmr.msra.gmra.mxu1 %vm1290_vm2, %v2372_v52  ;;  %v2367_v15 = vmul.f32 %v5499_v42, %v5485_v39  ;;  %v2619_v39 = vpop.permute.xlu1 %2618 }
 0x83d   : > { %5032 = vmatpush3.bf16.msra.mxu1 %v2517_v13  ;;  %v2368_v63 = vmul.f32 %v5501_v18, %v5483_v30  ;;  %5033 = vmatprep.mubr.msk.bf16.mxu1 %vm5886_vm0, %v5885_v29  ;;  %v2626_v13 = vsel %vm1093_vm1, %v2621_v32, 0  ;;  %v2672_v45 = vpop.permute.xlu0 %2671 }
 0x83e   : > { %5043 = vmatprep.subr.bf16.mxu1 %v5885_v29 }
 0x83f   : > { %v5503_v21 = vpop.eup %5502  ;;  %v2373_v25 = vpack.c.bf16 %v2368_v63, %v2367_v15 }
 0x840   : > { %v5505_v59 = vpop.eup %5504  ;;  %v2369_v57 = vmul.f32 %v5503_v21, %v5487_v48  ;;  %v2677_v48 = vsel %vm1093_vm1, %v2672_v45, 0 }
 0x841   : > { %5028 = vmatmul.mubr.msk.bf16.vlgmr.msra.gmra.mxu0 %vm1290_vm2, %v2373_v25  ;;  %v2370_v43 = vmul.f32 %v5505_v59, %v6539_v27  ;;  %v2723_v27 = vpop.permute.xlu1 %2722  ;;  %v2670_v24 = vpop.permute.xlu0 %2669 }
 0x842   : > { %5038 = vmatpush3.bf16.xpose.msra.mxu0 %v2575_v55  ;;  %5039 = vmatprep.mubr.msk.bf16.mxu0 %vm5886_vm0, %v5885_v29  ;;  %v2728_v35 = vsel %vm1093_vm1, %v2723_v27, 0 }
 0x843   : > { %v2374_v30 = vpack.c.bf16 %v2370_v43, %v2369_v57  ;;  %5049 = vmatprep.subr.bf16.mxu0 %v5885_v29 }
 0x845   : > { %5034 = vmatmul.mubr.msk.bf16.vlgmr.msra.gmra.mxu1 %vm1290_vm2, %v2374_v30  ;;  %v2721_v58 = vpop.permute.xlu1 %2720 }
 0x846   : > { %5044 = vmatpush3.bf16.xpose.msra.mxu1 %v2626_v13  ;;  %5045 = vmatprep.mubr.msk.bf16.mxu1 %vm5886_vm0, %v5885_v29 }
 0x847   : > { %5055 = vmatprep.subr.bf16.mxu1 %v5885_v29 }
 0x849   : > { %5040 = vmatmul.mubr.msk.bf16.vlgmr.msra.gmra.mxu0 %vm1093_vm1, %v2568_v3 }
 0x84a   : > { %5050 = vmatpush3.bf16.xpose.msra.mxu0 %v2677_v48  ;;  %5051 = vmatprep.mubr.msk.bf16.mxu0 %vm5886_vm0, %v5885_v29 }
 0x84b   : > { %5061 = vmatprep.subr.bf16.mxu0 %v5885_v29 }
 0x84d   : > { %5046 = vmatmul.mubr.msk.bf16.vlgmr.msra.gmra.mxu1 %vm1093_vm1, %v2619_v39 }
 0x84e   : > { %5056 = vmatpush3.bf16.xpose.msra.mxu1 %v2728_v35  ;;  %5057 = vmatprep.mubr.msk.bf16.mxu1 %vm5886_vm0, %v5885_v29 }
 0x84f   : > { %5067 = vmatprep.subr.bf16.mxu1 %v5885_v29 }
 0x851   : > { %5052 = vmatmul.mubr.msk.bf16.vlgmr.msra.gmra.mxu0 %vm1093_vm1, %v2670_v24 }
 0x852   : > { %5063 = vmatprep.mubr.msk.bf16.mxu0 %vm5886_vm0, %v5885_v29 }
 0x855   : > { %5058 = vmatmul.mubr.msk.bf16.vlgmr.msra.gmra.mxu1 %vm1093_vm1, %v2721_v58 }
 0x856   : > { %5069 = vmatprep.mubr.msk.bf16.mxu1 %vm5886_vm0, %v5885_v29 }
 0x8c8   : > { %v6597_v50 = vpop.f32.mrf.mxu0 }
 0x8ca   : > { %v5017_v14 = vpop.f32.mrf.mxu0 }
 0x8cc   : > { %v6599_v34 = vpop.f32.mrf.mxu0 }
 0x8cd   : > { %v2563_v36 = vpack.c.bf16 %v6599_v34, %v6597_v50 }
 0x8ce   : > { %v5018_v20 = vpop.f32.mrf.mxu0 }
 0x8fc   : > { %v6603_v8 = vpop.f32.mrf.mxu1 }
 0x8fe   : > { %v5023_v23 = vpop.f32.mrf.mxu1 }
 0x900   : > { %v6605_v56 = vpop.f32.mrf.mxu1 }
 0x901   : > { %v2564_v28 = vpack.c.bf16 %v6605_v56, %v6603_v8  ;;  %v6609_v1 = vpop.f32.mrf.mxu0 }
 0x902   : > { %v5024_v22 = vpop.f32.mrf.mxu1 }
 0x903   : > { %v5029_v51 = vpop.f32.mrf.mxu0 }
 0x905   : > { %v6611_v52 = vpop.f32.mrf.mxu0  ;;  %v6613_v42 = vpop.f32.mrf.mxu1 }
 0x906   : > { %v2565_v18 = vpack.c.bf16 %v6611_v52, %v6609_v1  ;;  %v7078_v52 = vpack.c.bf16 %v6367_v4, %v6365_v2  ;;  %v7080_v4 = vpack.c.bf16 %v6379_v16, %v6377_v12 }
 0x907   : > { %v5030_v15 = vpop.f32.mrf.mxu0  ;;  %v5035_v63 = vpop.f32.mrf.mxu1 }
 0x909   : > { %v6617_v32 = vpop.f32.mrf.mxu1  ;;  %v2611_v21 = vpop.f32.mrf.mxu0 }
 0x90a   : > { %v2566_v25 = vpack.c.bf16 %v6617_v32, %v6613_v42  ;;  %v2771_v59 = vmul.f32 0.2, %v2611_v21 }
 0x90b   : > { %v5036_v3 = vpop.f32.mrf.mxu1  ;;  %v5041_v57 = vpop.f32.mrf.mxu0 }
 0x90c   : > { %v2779_v55 = vsel %vm1290_vm2, %v2771_v59, -inf }
 0x90d   : > { %2780 = vmax.xlane.f32.xlu0 %v2779_v55  ;;  %v2614_v43 = vpop.f32.mrf.mxu0  ;;  %v2662_v30 = vpop.f32.mrf.mxu1 }
 0x90e   : > { %v2772_v39 = vmul.f32 0.2, %v2614_v43  ;;  %v2773_v13 = vmul.f32 0.2, %v2662_v30 }
 0x90f   : > { %v5042_v45 = vpop.f32.mrf.mxu0  ;;  %v5047_v48 = vpop.f32.mrf.mxu1 }
 0x910   : > { %v2782_v27 = vsel %vm1290_vm2, %v2772_v39, -inf  ;;  %v2785_v35 = vsel %vm1290_vm2, %v2773_v13, -inf }
 0x911   : > { %2783 = vmax.xlane.f32.xlu1 %v2782_v27  ;;  %v2713_v24 = vpop.f32.mrf.mxu0  ;;  %2786 = vmax.xlane.f32.xlu0 %v2785_v35  ;;  %v2665_v58 = vpop.f32.mrf.mxu1 }
 0x912   : > { %v2774_v14 = vmul.f32 0.2, %v2665_v58  ;;  %v2775_v22 = vmul.f32 0.2, %v2713_v24 }
 0x913   : > { %v5048_v20 = vpop.f32.mrf.mxu1  ;;  %v5053_v23 = vpop.f32.mrf.mxu0 }
 0x914   : > { %v2788_v51 = vsel %vm1290_vm2, %v2774_v14, -inf  ;;  %v2791_v30 = vsel %vm1290_vm2, %v2775_v22, -inf }
 0x915   : > { %v2716_v15 = vpop.f32.mrf.mxu0  ;;  %2789 = vmax.xlane.f32.xlu0 %v2788_v51  ;;  %v2764_v63 = vpop.f32.mrf.mxu1 }
 0x916   : > { %v2776_v21 = vmul.f32 0.2, %v2716_v15  ;;  %v2777_v55 = vmul.f32 0.2, %v2764_v63 }
 0x917   : > { %v5054_v3 = vpop.f32.mrf.mxu0  ;;  %v5059_v57 = vpop.f32.mrf.mxu1 }
 0x918   : > { %v2794_v43 = vsel %vm1290_vm2, %v2776_v21, -inf  ;;  %v2797_v35 = vsel %vm1290_vm2, %v2777_v55, -inf }
 0x919   : > { %2795 = vmax.xlane.f32.xlu1 %v2794_v43  ;;  %2792 = vmax.xlane.f32.xlu0 %v2791_v30  ;;  %v2767_v45 = vpop.f32.mrf.mxu1 }
 0x91a   : > { %v2778_v48 = vmul.f32 0.2, %v2767_v45 }
 0x91b   : > { %v5060_v27 = vpop.f32.mrf.mxu1 }
 0x91c   : > { %v2800_v24 = vsel %vm1290_vm2, %v2778_v48, -inf }
 0x91d   : > { %2798 = vmax.xlane.f32.xlu0 %v2797_v35  ;;  %2801 = vmax.xlane.f32.xlu1 %v2800_v24 }
 0x996   : > { %v2781_v58 = vpop.xlane.xlu0 %2780 }
 0x997   : > { %v2803_v20 = vsub.f32 %v2771_v59, %v2781_v58 }
 0x999   : > { %v2811_v23 = vmul.f32 1.442695, %v2803_v20 }
 0x99a   : > { %v2784_v51 = vpop.xlane.xlu1 %2783  ;;  %v2787_v15 = vpop.xlane.xlu0 %2786 }
 0x99b   : > { %5506 = vpow2.f32 %v2811_v23  ;;  %v2804_v63 = vsub.f32 %v2772_v39, %v2784_v51  ;;  %v2805_v3 = vsub.f32 %v2773_v13, %v2787_v15 }
 0x99d   : > { %v2813_v57 = vmul.f32 1.442695, %v2804_v63  ;;  %v2815_v43 = vmul.f32 1.442695, %v2805_v3 }
 0x99e   : > { %v2790_v30 = vpop.xlane.xlu0 %2789 }
 0x99f   : > { %5508 = vpow2.f32 %v2813_v57  ;;  %v2806_v45 = vsub.f32 %v2774_v14, %v2790_v30 }
 0x9a0   : > { %5510 = vpow2.f32 %v2815_v43 }
 0x9a1   : > { %v2817_v27 = vmul.f32 1.442695, %v2806_v45 }
 0x9a2   : > { %v2796_v17 = vpop.xlane.xlu1 %2795  ;;  %v2793_v10 = vpop.xlane.xlu0 %2792 }
 0x9a3   : > { %5512 = vpow2.f32 %v2817_v27  ;;  %v2808_v35 = vsub.f32 %v2776_v21, %v2796_v17  ;;  %v2807_v24 = vsub.f32 %v2775_v22, %v2793_v10 }
 0x9a5   : > { %v2821_v5 = vmul.f32 1.442695, %v2808_v35  ;;  %v2819_v59 = vmul.f32 1.442695, %v2807_v24 }
 0x9a6   : > { %v2799_v58 = vpop.xlane.xlu0 %2798  ;;  %v2802_v43 = vpop.xlane.xlu1 %2801 }
 0x9a7   : > { %5514 = vpow2.f32 %v2821_v5  ;;  %v2809_v20 = vsub.f32 %v2777_v55, %v2799_v58  ;;  %v2810_v30 = vsub.f32 %v2778_v48, %v2802_v43  ;;  %v5337_v43 = vld [vmem:[#allocation7 + $0x20] sm:$0xff]  }
 0x9a8   : > { %v5507_v23 = vpop.eup %5506  ;;  %5516 = vpow2.f32 %v2819_v59 }
 0x9a9   : > { %v2823_v39 = vmul.f32 1.442695, %v2809_v20  ;;  %v2827_v13 = vsel %vm1290_vm2, %v5507_v23, 0.0  ;;  %v2825_v45 = vmul.f32 1.442695, %v2810_v30  ;;  %v5338_v30 = vld [vmem:[#allocation7 + $0x18] sm:$0xff]  }
 0x9aa   : > { %2828 = vadd.xlane.f32.xlu0 %v2827_v13 }
 0x9ab   : > { %5518 = vpow2.f32 %v2823_v39 }
 0x9ac   : > { %v5509_v14 = vpop.eup %5508  ;;  %5520 = vpow2.f32 %v2825_v45  ;;  %v5340_v45 = vld [vmem:[#allocation7 + $0x8] sm:$0xff]  }
 0x9ad   : > { %v5511_v51 = vpop.eup %5510  ;;  %v2830_v15 = vsel %vm1290_vm2, %v5509_v14, 0.0 }
 0x9ae   : > { %v2833_v63 = vsel %vm1290_vm2, %v5511_v51, 0.0  ;;  %2831 = vadd.xlane.f32.xlu1 %v2830_v15 }
 0x9af   : > { %2834 = vadd.xlane.f32.xlu0 %v2833_v63 }
 0x9b0   : > { %v5513_v10 = vpop.eup %5512 }
 0x9b1   : > { %v2836_v17 = vsel %vm1290_vm2, %v5513_v10, 0.0 }
 0x9b2   : > { %2837 = vadd.xlane.f32.xlu1 %v2836_v17 }
 0x9b4   : > { %v5515_v5 = vpop.eup %5514 }
 0x9b5   : > { %v5517_v22 = vpop.eup %5516  ;;  %v2842_v21 = vsel %vm1290_vm2, %v5515_v5, 0.0 }
 0x9b6   : > { %v2839_v55 = vsel %vm1290_vm2, %v5517_v22, 0.0  ;;  %2843 = vadd.xlane.f32.xlu1 %v2842_v21 }
 0x9b7   : > { %2840 = vadd.xlane.f32.xlu0 %v2839_v55 }
 0x9b8   : > { %v6635_v3 = vpop.eup %5518 }
 0x9b9   : > { %v2845_v57 = vsel %vm1290_vm2, %v6635_v3, 0.0 }
 0x9bb   : > { %2846 = vadd.xlane.f32.xlu0 %v2845_v57  ;;  %v5336_v57 = vld [vmem:[#allocation7 + $0x28] sm:$0xff]  }
 0x9c7   : > { %2918 = vrot.lane.b32.xlu1 %v6281_v44, %s5889_s3  ;;  %v5521_v44 = vpop.eup %5520 }
 0x9cb   : > { %2965 = vrot.lane.b32.xlu1 %v6260_v26, %s5889_s3  ;;  %v2848_v26 = vsel %vm1290_vm2, %v5521_v44, 0.0 }
 0x9d1   : > { %2871 = vrot.lane.b32.xlu0 %v6264_v33, %s5889_s3 }
 0x9d5   : > { %3067 = vrot.lane.b32.xlu0 %v2067_v54, %s5889_s3 }
 0x9d9   : > { %3079 = vrot.lane.b32.xlu0 %v2563_v36, %s5888_s27 }
 0x9ef   : > { %2849 = vadd.xlane.f32.xlu1 %v2848_v26 }
 0xa00   : > { %3012 = vrot.lane.b32.xlu1 %v6255_v19, %s5889_s3 }
 0xa04   : > { %3069 = vrot.lane.b32.xlu1 %v2068_v37, %s5889_s3 }
 0xa08   : > { %3081 = vrot.lane.b32.xlu1 %v2564_v28, %s5888_s27 }
 0xa33   : > { %v2829_v33 = vpop.xlane.xlu0 %2828 }
 0xa34   : > { %5522 = vrcp.f32 %v2829_v33 }
 0xa37   : > { %v2832_v38 = vpop.xlane.xlu1 %2831 }
 0xa38   : > { %v2835_v53 = vpop.xlane.xlu0 %2834  ;;  %5524 = vrcp.f32 %v2832_v38 }
 0xa39   : > { %5526 = vrcp.f32 %v2835_v53 }
 0xa3b   : > { %v2838_v54 = vpop.xlane.xlu1 %2837 }
 0xa3c   : > { %5528 = vrcp.f32 %v2838_v54 }
 0xa3f   : > { %v2844_v50 = vpop.xlane.xlu1 %2843 }
 0xa40   : > { %v2841_v19 = vpop.xlane.xlu0 %2840  ;;  %5530 = vrcp.f32 %v2844_v50 }
 0xa41   : > { %5532 = vrcp.f32 %v2841_v19  ;;  %v5523_v34 = vpop.eup %5522 }
 0xa42   : > { %v2859_v36 = vmul.f32 %v5523_v34, %v5507_v23 }
 0xa43   : > { %v2919_v60 = vpop.permute.xlu1 %2918 }
 0xa44   : > { %v2847_v61 = vpop.xlane.xlu0 %2846  ;;  %5068 = vmatpush3.bf16.msra.mxu1 %v2919_v60 }
 0xa45   : > { %v5525_v37 = vpop.eup %5524  ;;  %5079 = vmatprep.subr.bf16.mxu1 %v5885_v29  ;;  %5534 = vrcp.f32 %v2847_v61 }
 0xa46   : > { %v2860_v8 = vmul.f32 %v5525_v37, %v5509_v14  ;;  %v5527_v56 = vpop.eup %5526 }
 0xa47   : > { %v2861_v35 = vmul.f32 %v5527_v56, %v5511_v51  ;;  %v2966_v59 = vpop.permute.xlu1 %2965 }
 0xa48   : > { %v2872_v28 = vpop.permute.xlu0 %2871  ;;  %v2867_v48 = vpack.c.bf16 %v2860_v8, %v2859_v36 }
 0xa49   : > { %v5529_v27 = vpop.eup %5528  ;;  %5062 = vmatpush3.bf16.msra.mxu0 %v2872_v28 }
 0xa4a   : > { %5073 = vmatprep.subr.bf16.mxu0 %v5885_v29  ;;  %v2862_v24 = vmul.f32 %v5529_v27, %v5513_v10 }
 0xa4c   : > { %5064 = vmatmul.mubr.msk.bf16.vlgmr.msra.gmra.mxu0 %vm1290_vm2, %v2867_v48  ;;  %v2868_v58 = vpack.c.bf16 %v2862_v24, %v2861_v35  ;;  %v3068_v46 = vpop.permute.xlu0 %3067 }
 0xa4d   : > { %v5531_v20 = vpop.eup %5530  ;;  %5074 = vmatpush3.bf16.msra.mxu0 %v2966_v59  ;;  %5075 = vmatprep.mubr.msk.bf16.mxu0 %vm5886_vm0, %v5885_v29  ;;  %v3101_v42 = vsel %vm1093_vm1, %v7078_v52, %v3068_v46  ;;  %v5357_v46 = vld [vmem:[#allocation8 + $0x20] ss:$8 sps:$4 sm:$0xff]   ;;  %v5365_v52 = vld [vmem:[#allocation8 + $0x4] ss:$8 sps:$4 sm:$0xff]  }
 0xa4e   : > { %v5533_v23 = vpop.eup %5532  ;;  %5070 = vmatmul.mubr.msk.bf16.vlgmr.msra.gmra.mxu1 %vm1290_vm2, %v2868_v58  ;;  %v2864_v39 = vmul.f32 %v5531_v20, %v5515_v5  ;;  %v5334_v5 = vld [vmem:[#allocation7 + $0x38] sm:$0xff]  }
 0xa4f   : > { %v2863_v13 = vmul.f32 %v5533_v23, %v5517_v22  ;;  %5081 = vmatprep.mubr.msk.bf16.mxu1 %vm5886_vm0, %v5885_v29  ;;  %v5335_v22 = vld [vmem:[#allocation7 + $0x30] sm:$0xff]   ;;  %5085 = vmatprep.subr.bf16.mxu0 %v5334_v5 }
 0xa50   : > { %v3080_v27 = vpop.permute.xlu0 %3079 }
 0xa51   : > { %v2869_v14 = vpack.c.bf16 %v2864_v39, %v2863_v13 }
 0xa52   : > { %v5535_v63 = vpop.eup %5534 }
 0xa53   : > { %v2865_v17 = vmul.f32 %v5535_v63, %v6635_v3  ;;  %v5339_v3 = vld [vmem:[#allocation7 + $0x10] sm:$0xff]  }
 0xa54   : > { %5076 = vmatmul.mubr.msk.bf16.vlgmr.msra.gmra.mxu0 %vm1290_vm2, %v2869_v14 }
 0xa55   : > { %5086 = vmatpush3.bf16.msra.mxu0 %v5334_v5  ;;  %v6724_v5 = vld [vmem:[%s7009_s4] ss:$0 sm:$0xff] }
 0xa56   : > { %5087 = vmatprep.subr.bf16.mxu0 %v5335_v22 }
 0xa59   : > { %5088 = vmatpush3.bf16.msra.mxu0 %v5335_v22 }
 0xa5a   : > { %5089 = vmatprep.subr.bf16.mxu0 %v5336_v57 }
 0xa5d   : > { %5090 = vmatpush3.bf16.msra.mxu0 %v5336_v57 }
 0xa5e   : > { %5091 = vmatprep.subr.bf16.mxu0 %v5337_v43 }
 0xa61   : > { %5092 = vmatpush3.bf16.msra.mxu0 %v5337_v43 }
 0xa62   : > { %5093 = vmatprep.subr.bf16.mxu0 %v5338_v30 }
 0xa65   : > { %5094 = vmatpush3.bf16.msra.mxu0 %v5338_v30 }
 0xa66   : > { %5095 = vmatprep.subr.bf16.mxu0 %v5339_v3 }
 0xa69   : > { %5096 = vmatpush3.bf16.msra.mxu0 %v5339_v3 }
 0xa6a   : > { %5097 = vmatprep.subr.bf16.mxu0 %v5340_v45 }
 0xa6d   : > { %5098 = vmatpush3.bf16.msra.mxu0 %v5340_v45  ;;  %v5575_v45 = vld [vmem:[%s6175_s12 + $0x8] sm:$0xff]  }
 0xa78   : > { %v2850_v51 = vpop.xlane.xlu1 %2849 }
 0xa79   : > { %5536 = vrcp.f32 %v2850_v51 }
 0xa7c   : > { %v3013_v15 = vpop.permute.xlu1 %3012 }
 0xa7d   : > { %5080 = vmatpush3.bf16.msra.mxu1 %v3013_v15  ;;  %v7081_v15 = vpack.c.bf16 %v6388_v47, %v6385_v41 }
 0xa86   : > { %v5537_v10 = vpop.eup %5536 }
 0xa87   : > { %v2866_v21 = vmul.f32 %v5537_v10, %v5521_v44  ;;  %v5341_v44 = vld [vmem:[#allocation7] sm:$0xff]  }
 0xa88   : > { %5099 = vmatprep.subr.bf16.mxu0 %v5341_v44 }
 0xa89   : > { %v2870_v55 = vpack.c.bf16 %v2866_v21, %v2865_v17  ;;  %5100 = vmatpush3.bf16.msra.mxu0 %v5341_v44  ;;  %v5574_v21 = vld [vmem:[%s6175_s12] sm:$0xff]   ;;  %v737_v44 = vunpack.c.h.bf16 %v5575_v45 }
 0xa8a   : > { %v735_v43 = vunpack.c.h.bf16 %v5574_v21 }
 0xa8b   : > { %5082 = vmatmul.mubr.msk.bf16.vlgmr.msra.gmra.mxu1 %vm1290_vm2, %v2870_v55  ;;  %v734_v55 = vunpack.c.l.bf16 %v5574_v21  ;;  %v5367_v21 = vld [vmem:[#allocation10 + $0x38] sm:$0xff]  }
 0xa8c   : > { %3555 = vmatprep.mubr.bf16.mxu1 %v5884_v0 }
 0xb0c   : > { %v2911_v26 = vpop.f32.mrf.mxu0 }
 0xb0e   : > { %v5065_v33 = vpop.f32.mrf.mxu0  ;;  %v2958_v38 = vpop.f32.mrf.mxu1 }
 0xb10   : > { %v2914_v53 = vpop.f32.mrf.mxu0  ;;  %v5071_v54 = vpop.f32.mrf.mxu1 }
 0xb11   : > { %v3059_v50 = vpack.c.bf16 %v2914_v53, %v2911_v26  ;;  %v736_v53 = vunpack.c.l.bf16 %v5575_v45 }
 0xb12   : > { %v5066_v19 = vpop.f32.mrf.mxu0  ;;  %v2961_v34 = vpop.f32.mrf.mxu1 }
 0xb13   : > { %3091 = vrot.lane.b32.xlu0 %v3059_v50, %s5887_s18  ;;  %v3060_v60 = vpack.c.bf16 %v2961_v34, %v2958_v38 }
 0xb14   : > { %v3005_v61 = vpop.f32.mrf.mxu0  ;;  %v5072_v37 = vpop.f32.mrf.mxu1 }
 0xb15   : > { %3093 = vrot.lane.b32.xlu1 %v3060_v60, %s5887_s18 }
 0xb16   : > { %v5077_v36 = vpop.f32.mrf.mxu0 }
 0xb17   : > { %3071 = vrot.lane.b32.xlu0 %v2069_v40, %s5889_s3  ;;  %v5342_v36 = vld [vmem:[#allocation8 + $0x70] ss:$8 sps:$4 sm:$0xff]  }
 0xb18   : > { %v3008_v8 = vpop.f32.mrf.mxu0 }
 0xb19   : > { %3073 = vrot.lane.b32.xlu1 %v2070_v49, %s5889_s3  ;;  %v3061_v28 = vpack.c.bf16 %v3008_v8, %v3005_v61  ;;  %v3070_v49 = vpop.permute.xlu1 %3069  ;;  %v5344_v61 = vld [vmem:[#allocation8 + $0x74] ss:$8 sps:$4 sm:$0xff]   ;;  %v5347_v8 = vld [vmem:[#allocation8 + $0x64] ss:$8 sps:$4 sm:$0xff]  }
 0xb1a   : > { %v5078_v56 = vpop.f32.mrf.mxu0  ;;  %3523 = vmatprep.subr.bf16.mxu1 %v5344_v61 }
 0xb1b   : > { %3083 = vrot.lane.b32.xlu0 %v2565_v18, %s5888_s27  ;;  %v3113_v18 = vsel %vm3111_vm3, %v3101_v42, %v3080_v27  ;;  %3524 = vmatpush1.bf16.msra.mxu1 %v5342_v36  ;;  %v5345_v56 = vld [vmem:[#allocation8 + $0x60] ss:$8 sps:$4 sm:$0xff]   ;;  %v5362_v27 = vld [vmem:[#allocation8 + $0x14] ss:$8 sps:$4 sm:$0xff]  }
 0xb1c   : > { %3525 = vmatprep.subr.bf16.mxu1 %v5347_v8  ;;  %v5363_v42 = vld [vmem:[#allocation8] ss:$8 sps:$4 sm:$0xff]  }
 0xb1d   : > { %3085 = vrot.lane.b32.xlu1 %v2566_v25, %s5888_s27  ;;  %v3082_v1 = vpop.permute.xlu1 %3081  ;;  %v7079_v25 = vpack.c.bf16 %v6373_v9, %v6371_v7  ;;  %s723_s27 = scalar_lea.vmem [#allocation16], %s4574_s23 }
 0xb1e   : > { %s4414_s3 = sshll.u32 %s723_s27, 4  ;;  %s4415_s3 = int_to_ptr.vmem [resolvable:$true] %s4414_s3 }
 0xb1f   : > { %3095 = vrot.lane.b32.xlu0 %v3061_v28, %s5887_s18  ;;  %v3104_v35 = vsel %vm1093_vm1, %v7079_v25, %v3070_v49  ;;  %3526 = vmatpush1.bf16.msra.mxu1 %v5345_v56  ;;  %v5350_v28 = vld [vmem:[#allocation8 + $0x54] ss:$8 sps:$4 sm:$0xff]   ;;  %v5359_v49 = vld [vmem:[#allocation8 + $0x24] ss:$8 sps:$4 sm:$0xff]   ;;  %s5788_s17 = scalar_lea.vmem %s4415_s3, 64 }
 0xb20   : > { %v3115_v59 = vsel %vm3111_vm3, %v3104_v35, %v3082_v1  ;;  %3527 = vmatprep.subr.bf16.mxu1 %v5350_v28  ;;  %v5360_v1 = vld [vmem:[#allocation8 + $0x10] ss:$8 sps:$4 sm:$0xff]   ;;  %p5789_p9 = scmp.ne.s32.totalorder %s4415_s3, %s5788_s17 }
 0xb22   : > { %p5790_p7 = pnand %p5789_p9, %p7089_p11 }
 0xb24   : > { %p5791_p12 = pneg %p5790_p7 }
 0xb4b   : > { %v3052_v62 = vpop.f32.mrf.mxu1 }
 0xb4d   : > { %v5083_v6 = vpop.f32.mrf.mxu1 }
 0xb4e   : > { %v5353_v6 = vld [vmem:[#allocation8 + $0x44] ss:$8 sps:$4 sm:$0xff]  }
 0xb4f   : > { %v3055_v40 = vpop.f32.mrf.mxu1 }
 0xb50   : > { %v3062_v48 = vpack.c.bf16 %v3055_v40, %v3052_v62  ;;  %v5348_v62 = vld [vmem:[#allocation8 + $0x50] ss:$8 sps:$4 sm:$0xff]   ;;  %v5351_v40 = vld [vmem:[#allocation8 + $0x40] ss:$8 sps:$4 sm:$0xff]  }
 0xb51   : > { %v5084_v11 = vpop.f32.mrf.mxu1  ;;  %3528 = vmatpush1.bf16.msra.mxu1 %v5348_v62 }
 0xb52   : > { %3097 = vrot.lane.b32.xlu1 %v3062_v48, %s5887_s18  ;;  %3529 = vmatprep.subr.bf16.mxu1 %v5353_v6  ;;  %v5356_v48 = vld [vmem:[#allocation8 + $0x34] ss:$8 sps:$4 sm:$0xff]   ;;  %v5354_v11 = vld [vmem:[#allocation8 + $0x30] ss:$8 sps:$4 sm:$0xff]   ;;  %s4709_s18 = sshll.u32 %s6012_s2, 6 }
 0xb55   : > { %3530 = vmatpush1.bf16.msra.mxu1 %v5351_v40 }
 0xb56   : > { %3531 = vmatprep.subr.bf16.mxu1 %v5356_v48 }
 0xb59   : > { %3532 = vmatpush1.bf16.msra.mxu1 %v5354_v11 }
 0xb5a   : > { %3533 = vmatprep.subr.bf16.mxu1 %v5359_v49 }
 0xb5d   : > { %3534 = vmatpush1.bf16.msra.mxu1 %v5357_v46 }
 0xb5e   : > { %3535 = vmatprep.subr.bf16.mxu1 %v5362_v27 }
 0xb61   : > { %3536 = vmatpush1.bf16.msra.mxu1 %v5360_v1 }
 0xb62   : > { %3537 = vmatprep.subr.bf16.mxu1 %v5365_v52 }
 0xb65   : > { %3538 = vmatpush1.bf16.msra.mxu1 %v5363_v42 }
 0xb66   : > { %5109 = vmatprep.subr.bf16.mxu1 %v5885_v29 }
 0xb85   : > { %v3092_v32 = vpop.permute.xlu0 %3091 }
 0xb86   : > { %v3122_v24 = vsel %vm3120_vm4, %v3113_v18, %v3092_v32  ;;  %v5576_v32 = vld [vmem:[%s6175_s12 + $0x10] sm:$0xff]  }
 0xb87   : > { %5101 = vmatprep.mubr.bf16.mxu0 %v3122_v24  ;;  %v3094_v58 = vpop.permute.xlu1 %3093  ;;  %v738_v25 = vunpack.c.l.bf16 %v5576_v32 }
 0xb88   : > { %v3125_v20 = vsel %vm3120_vm4, %v3115_v59, %v3094_v58 }
 0xb89   : > { %v3072_v23 = vpop.permute.xlu0 %3071  ;;  %5102 = vmatmul.mubr.bf16.vlgmr.msra.gmra.mxu0 %v3125_v20  ;;  %v739_v20 = vunpack.c.h.bf16 %v5576_v32 }
 0xb8a   : > { %v3107_v39 = vsel %vm1093_vm1, %v7080_v4, %v3072_v23  ;;  %v5577_v4 = vld [vmem:[%s6175_s12 + $0x18] sm:$0xff]  }
 0xb8b   : > { %v3074_v14 = vpop.permute.xlu1 %3073 }
 0xb8c   : > { %v3110_v63 = vsel %vm1093_vm1, %v7081_v15, %v3074_v14 }
 0xb8d   : > { %v3084_v2 = vpop.permute.xlu0 %3083 }
 0xb8e   : > { %v3117_v7 = vsel %vm3111_vm3, %v3107_v39, %v3084_v2  ;;  %v740_v39 = vunpack.c.l.bf16 %v5577_v4 }
 0xb8f   : > { %v3086_v51 = vpop.permute.xlu1 %3085 }
 0xb90   : > { %v3119_v10 = vsel %vm3111_vm3, %v3110_v63, %v3086_v51  ;;  %v741_v51 = vunpack.c.h.bf16 %v5577_v4 }
 0xb91   : > { %v3096_v9 = vpop.permute.xlu0 %3095 }
 0xb92   : > { %v3128_v13 = vsel %vm3120_vm4, %v3117_v7, %v3096_v9 }
 0xb93   : > { %5105 = vmatprep.mubr.bf16.mxu0 %v3128_v13 }
 0xbc4   : > { %v3098_v17 = vpop.permute.xlu1 %3097 }
 0xbc5   : > { %v3131_v12 = vsel %vm3120_vm4, %v3119_v10, %v3098_v17 }
 0xbc6   : > { %5106 = vmatmul.mubr.bf16.gmra.mxu0 %v3131_v12 }
 0xc49   : > { %v5103_v16 = vpop.f32.mrf.mxu0 }
 0xc4a   : > { %v3247_v54 = vadd.f32 %v5103_v16, %v6724_v5  ;;  %v5366_v16 = vld [vmem:[#allocation10 + $0x78] sm:$0xff]  }
 0xc4b   : > { %v3238_v22 = vpop.f32.mrf.mxu0  ;;  %4802 = vmatprep.subr.bf16.mxu0 %v5366_v16 }
 0xc4c   : > { %v3239_v41 = vadd.f32 %v6724_v5, %v3238_v22  ;;  %v6744_v34 = vadd.f32 %v3247_v54, %v736_v53  ;;  %4803 = vmatpush3.bf16.msra.mxu0 %v5367_v21  ;;  %v5370_v22 = vld [vmem:[#allocation10 + $0x68] sm:$0xff]  }
 0xc4d   : > { %v5104_v47 = vpop.f32.mrf.mxu0 }
 0xc4e   : > { %v6727_v57 = vadd.f32 %v3239_v41, %v734_v55  ;;  %v3250_v26 = vadd.f32 %v5104_v47, %v6724_v5  ;;  %v3305_v37 = vmul.f32 %v6744_v34, %v6744_v34  ;;  %v5368_v55 = vld [vmem:[#allocation10 + $0x70] sm:$0xff]   ;;  %v5371_v41 = vld [vmem:[#allocation10 + $0x28] sm:$0xff]   ;;  %v5372_v47 = vld [vmem:[#allocation10 + $0x60] sm:$0xff]  }
 0xc4f   : > { %v3241_v30 = vpop.f32.mrf.mxu0  ;;  %4804 = vmatprep.subr.bf16.mxu0 %v5368_v55 }
 0xc50   : > { %v3242_v3 = vadd.f32 %v6724_v5, %v3241_v30  ;;  %3279 = vadd.xlane.f32.xlu0 %v6727_v57  ;;  %v3303_v38 = vmul.f32 %v6727_v57, %v6727_v57  ;;  %v6739_v50 = vadd.f32 %v3250_v26, %v737_v44  ;;  %v5374_v30 = vld [vmem:[#allocation10 + $0x58] sm:$0xff]  }
 0xc52   : > { %v6733_v33 = vadd.f32 %v3242_v3, %v735_v43  ;;  %v3306_v60 = vmul.f32 %v6739_v50, %v6739_v50  ;;  %v5373_v43 = vld [vmem:[#allocation10 + $0x20] sm:$0xff]  }
 0xc54   : > { %3281 = vadd.xlane.f32.xlu1 %v6733_v33  ;;  %3311 = vadd.xlane.f32.xlu0 %v3303_v38  ;;  %v3304_v19 = vmul.f32 %v6733_v33, %v6733_v33 }
 0xc58   : > { %3285 = vadd.xlane.f32.xlu1 %v6739_v50  ;;  %3313 = vadd.xlane.f32.xlu0 %v3304_v19 }
 0xc5c   : > { %3317 = vadd.xlane.f32.xlu1 %v3306_v60  ;;  %3283 = vadd.xlane.f32.xlu0 %v6744_v34 }
 0xc60   : > { %3315 = vadd.xlane.f32.xlu0 %v3305_v37 }
 0xc86   : > { %v5107_v18 = vpop.f32.mrf.mxu0 }
 0xc87   : > { %v3263_v7 = vadd.f32 %v5107_v18, %v6724_v5 }
 0xc88   : > { %v3254_v35 = vpop.f32.mrf.mxu0 }
 0xc89   : > { %v3255_v24 = vadd.f32 %v6724_v5, %v3254_v35  ;;  %v6765_v14 = vadd.f32 %v3263_v7, %v740_v39  ;;  %v6789_v39 = vld [vmem:[%s7011_s6] ss:$0 sm:$0xff] }
 0xc8a   : > { %v5108_v59 = vpop.f32.mrf.mxu0 }
 0xc8b   : > { %v6754_v58 = vadd.f32 %v3255_v24, %v738_v25  ;;  %v3266_v15 = vadd.f32 %v5108_v59, %v6724_v5  ;;  %v3309_v17 = vmul.f32 %v6765_v14, %v6765_v14  ;;  %v6782_v59 = vld [vmem:[%s7010_s5] ss:$0 sm:$0xff] }
 0xc8c   : > { %v3257_v23 = vpop.f32.mrf.mxu0 }
 0xc8d   : > { %v3258_v2 = vadd.f32 %v6724_v5, %v3257_v23  ;;  %3287 = vadd.xlane.f32.xlu0 %v6754_v58  ;;  %v3307_v13 = vmul.f32 %v6754_v58, %v6754_v58  ;;  %v6771_v10 = vadd.f32 %v3266_v15, %v741_v51  ;;  %v5369_v5 = vld [vmem:[#allocation10 + $0x30] sm:$0xff]  }
 0xc8e   : > { %4805 = vmatpush3.bf16.msra.mxu0 %v5369_v5 }
 0xc8f   : > { %v6760_v9 = vadd.f32 %v3258_v2, %v739_v20  ;;  %v3310_v12 = vmul.f32 %v6771_v10, %v6771_v10  ;;  %4806 = vmatprep.subr.bf16.mxu0 %v5370_v22 }
 0xc91   : > { %3289 = vadd.xlane.f32.xlu1 %v6760_v9  ;;  %3319 = vadd.xlane.f32.xlu0 %v3307_v13  ;;  %v3308_v63 = vmul.f32 %v6760_v9, %v6760_v9 }
 0xc92   : > { %4807 = vmatpush3.bf16.msra.mxu0 %v5371_v41 }
 0xc93   : > { %4808 = vmatprep.subr.bf16.mxu0 %v5372_v47 }
 0xc95   : > { %3321 = vadd.xlane.f32.xlu1 %v3308_v63  ;;  %3291 = vadd.xlane.f32.xlu0 %v6765_v14 }
 0xc96   : > { %4809 = vmatpush3.bf16.msra.mxu0 %v5373_v43 }
 0xc97   : > { %4810 = vmatprep.subr.bf16.mxu0 %v5374_v30 }
 0xc99   : > { %3293 = vadd.xlane.f32.xlu1 %v6771_v10  ;;  %3323 = vadd.xlane.f32.xlu0 %v3309_v17 }
 0xc9d   : > { %3325 = vadd.xlane.f32.xlu1 %v3310_v12 }
 0xcd9   : > { %v3280_v3 = vpop.xlane.xlu0 %3279 }
 0xcda   : > { %v3295_v45 = vmul.f32 0.01, %v3280_v3 }
 0xcdc   : > { %v3335_v38 = vmul.f32 %v3295_v45, %v3295_v45  ;;  %v3351_v25 = vsub.f32 %v6727_v57, %v3295_v45 }
 0xcdd   : > { %v3282_v44 = vpop.xlane.xlu1 %3281  ;;  %v3312_v26 = vpop.xlane.xlu0 %3311 }
 0xcde   : > { %v3296_v53 = vmul.f32 0.01, %v3282_v44  ;;  %v3327_v54 = vmul.f32 0.01, %v3312_v26 }
 0xce0   : > { %v3343_v19 = vsub.f32 %v3327_v54, %v3335_v38  ;;  %v3336_v37 = vmul.f32 %v3296_v53, %v3296_v53  ;;  %v3352_v20 = vsub.f32 %v6733_v33, %v3296_v53 }
 0xce1   : > { %v3286_v60 = vpop.xlane.xlu1 %3285  ;;  %v3314_v61 = vpop.xlane.xlu0 %3313 }
 0xce2   : > { %v3359_v36 = vadd.f32 1e-05, %v3343_v19  ;;  %v3298_v8 = vmul.f32 0.01, %v3286_v60  ;;  %v3328_v56 = vmul.f32 0.01, %v3314_v61 }
 0xce4   : > { %5538 = vrsqrt.f32 %v3359_v36  ;;  %v3344_v28 = vsub.f32 %v3328_v56, %v3336_v37  ;;  %v3338_v40 = vmul.f32 %v3298_v8, %v3298_v8  ;;  %v3354_v57 = vsub.f32 %v6739_v50, %v3298_v8 }
 0xce5   : > { %v3318_v62 = vpop.xlane.xlu1 %3317  ;;  %v3284_v6 = vpop.xlane.xlu0 %3283 }
 0xce6   : > { %v3360_v48 = vadd.f32 1e-05, %v3344_v28  ;;  %v3330_v11 = vmul.f32 0.01, %v3318_v62  ;;  %v3297_v46 = vmul.f32 0.01, %v3284_v6 }
 0xce8   : > { %5540 = vrsqrt.f32 %v3360_v48  ;;  %v3346_v49 = vsub.f32 %v3330_v11, %v3338_v40  ;;  %v3337_v52 = vmul.f32 %v3297_v46, %v3297_v46  ;;  %v3353_v63 = vsub.f32 %v6744_v34, %v3297_v46 }
 0xce9   : > { %v3316_v27 = vpop.xlane.xlu0 %3315 }
 0xcea   : > { %v3362_v1 = vadd.f32 1e-05, %v3346_v49  ;;  %v3329_v42 = vmul.f32 0.01, %v3316_v27 }
 0xcec   : > { %5542 = vrsqrt.f32 %v3362_v1  ;;  %v3345_v18 = vsub.f32 %v3329_v42, %v3337_v52 }
 0xcee   : > { %v3361_v32 = vadd.f32 1e-05, %v3345_v18 }
 0xcf0   : > { %5544 = vrsqrt.f32 %v3361_v32 }
 0xcf1   : > { %v5539_v35 = vpop.eup %5538 }
 0xcf2   : > { %v3375_v24 = vmul.f32 %v5539_v35, %v3351_v25 }
 0xcf4   : > { %v3389_v4 = vmul.f32 %v6782_v59, %v3375_v24 }
 0xcf5   : > { %v5541_v23 = vpop.eup %5540 }
 0xcf6   : > { %v3376_v2 = vmul.f32 %v5541_v23, %v3352_v20  ;;  %v6794_v51 = vadd.f32 %v6789_v39, %v3389_v4 }
 0xcf8   : > { %v3390_v7 = vmul.f32 %v6782_v59, %v3376_v2 }
 0xcf9   : > { %v5543_v13 = vpop.eup %5542 }
 0xcfa   : > { %v6797_v15 = vadd.f32 %v6789_v39, %v3390_v7  ;;  %v3378_v33 = vmul.f32 %v5543_v13, %v3354_v57 }
 0xcfc   : > { %v3411_v17 = vpack.c.bf16 %v6797_v15, %v6794_v51  ;;  %v3392_v50 = vmul.f32 %v6782_v59, %v3378_v33 }
 0xcfd   : > { %v5545_v12 = vpop.eup %5544 }
 0xcfe   : > { %3556 = vmatmul.mubr.bf16.vlgmr.msra.gmra.mxu1 %v3411_v17  ;;  %v3377_v16 = vmul.f32 %v5545_v12, %v3353_v63  ;;  %v6809_v5 = vadd.f32 %v6789_v39, %v3392_v50  ;;  %v5375_v63 = vld [vmem:[#allocation10 + $0x18] sm:$0xff]   ;;  %v5377_v50 = vld [vmem:[#allocation10 + $0x10] sm:$0xff]  }
 0xcff   : > { %3565 = vmatprep.mubr.bf16.mxu1 %v5884_v0  ;;  %4811 = vmatpush3.bf16.msra.mxu0 %v5375_v63 }
 0xd00   : > { %v3391_v21 = vmul.f32 %v6782_v59, %v3377_v16 }
 0xd02   : > { %v6806_v55 = vadd.f32 %v6789_v39, %v3391_v21  ;;  %v5378_v21 = vld [vmem:[#allocation10 + $0x48] sm:$0xff]  }
 0xd04   : > { %v3412_v34 = vpack.c.bf16 %v6809_v5, %v6806_v55 }
 0xd06   : > { %3566 = vmatmul.mubr.bf16.gmra.mxu1 %v3412_v34  ;;  %v5381_v34 = vld [vmem:[#allocation10] sm:$0xff]  }
 0xd07   : > { %3575 = vmatprep.mubr.bf16.mxu1 %v5884_v0 }
 0xd16   : > { %v3288_v22 = vpop.xlane.xlu0 %3287 }
 0xd17   : > { %v3299_v41 = vmul.f32 0.01, %v3288_v22  ;;  %v7082_v22 = vsub.s32 1, %v6211_v31 }
 0xd19   : > { %v3339_v30 = vmul.f32 %v3299_v41, %v3299_v41  ;;  %v3355_v1 = vsub.f32 %v6754_v58, %v3299_v41 }
 0xd1a   : > { %v3290_v47 = vpop.xlane.xlu1 %3289  ;;  %v3320_v43 = vpop.xlane.xlu0 %3319 }
 0xd1b   : > { %v3300_v3 = vmul.f32 0.01, %v3290_v47  ;;  %v3331_v45 = vmul.f32 0.01, %v3320_v43  ;;  %v7083_v47 = vsub.s32 0, %v6211_v31 }
 0xd1d   : > { %v3347_v44 = vsub.f32 %v3331_v45, %v3339_v30  ;;  %v3340_v53 = vmul.f32 %v3300_v3, %v3300_v3  ;;  %v3356_v18 = vsub.f32 %v6760_v9, %v3300_v3 }
 0xd1e   : > { %v3322_v26 = vpop.xlane.xlu1 %3321  ;;  %v3292_v38 = vpop.xlane.xlu0 %3291 }
 0xd1f   : > { %v3363_v54 = vadd.f32 1e-05, %v3347_v44  ;;  %v3332_v19 = vmul.f32 0.01, %v3322_v26  ;;  %v3301_v60 = vmul.f32 0.01, %v3292_v38 }
 0xd21   : > { %5546 = vrsqrt.f32 %v3363_v54  ;;  %v3348_v61 = vsub.f32 %v3332_v19, %v3340_v53  ;;  %v3341_v56 = vmul.f32 %v3301_v60, %v3301_v60  ;;  %v3357_v24 = vsub.f32 %v6765_v14, %v3301_v60 }
 0xd22   : > { %v3294_v37 = vpop.xlane.xlu1 %3293  ;;  %v3324_v36 = vpop.xlane.xlu0 %3323 }
 0xd23   : > { %v3364_v8 = vadd.f32 1e-05, %v3348_v61  ;;  %v3302_v28 = vmul.f32 0.01, %v3294_v37  ;;  %v3333_v62 = vmul.f32 0.01, %v3324_v36 }
 0xd25   : > { %5548 = vrsqrt.f32 %v3364_v8  ;;  %v3349_v6 = vsub.f32 %v3333_v62, %v3341_v56  ;;  %v3342_v48 = vmul.f32 %v3302_v28, %v3302_v28  ;;  %v3358_v57 = vsub.f32 %v6771_v10, %v3302_v28  ;;  %v5376_v10 = vld [vmem:[#allocation10 + $0x50] sm:$0xff]  }
 0xd26   : > { %v3326_v40 = vpop.xlane.xlu1 %3325  ;;  %4812 = vmatprep.subr.bf16.mxu0 %v5376_v10 }
 0xd27   : > { %v3365_v11 = vadd.f32 1e-05, %v3349_v6  ;;  %v3334_v46 = vmul.f32 0.01, %v3326_v40  ;;  %4813 = vmatpush3.bf16.msra.mxu0 %v5377_v50 }
 0xd28   : > { %4814 = vmatprep.subr.bf16.mxu0 %v5378_v21 }
 0xd29   : > { %5550 = vrsqrt.f32 %v3365_v11  ;;  %v3350_v49 = vsub.f32 %v3334_v46, %v3342_v48 }
 0xd2b   : > { %v3366_v27 = vadd.f32 1e-05, %v3350_v49 }
 0xd2d   : > { %5552 = vrsqrt.f32 %v3366_v27 }
 0xd2e   : > { %v5547_v52 = vpop.eup %5546 }
 0xd2f   : > { %v3379_v42 = vmul.f32 %v5547_v52, %v3355_v1 }
 0xd31   : > { %v3393_v35 = vmul.f32 %v6782_v59, %v3379_v42 }
 0xd32   : > { %v5549_v32 = vpop.eup %5548 }
 0xd33   : > { %v3380_v25 = vmul.f32 %v5549_v32, %v3356_v18  ;;  %v6820_v2 = vadd.f32 %v6789_v39, %v3393_v35 }
 0xd35   : > { %v3394_v20 = vmul.f32 %v6782_v59, %v3380_v25 }
 0xd36   : > { %v5551_v23 = vpop.eup %5550 }
 0xd37   : > { %v6823_v4 = vadd.f32 %v6789_v39, %v3394_v20  ;;  %v3381_v58 = vmul.f32 %v5551_v23, %v3357_v24 }
 0xd39   : > { %v3413_v9 = vpack.c.bf16 %v6823_v4, %v6820_v2  ;;  %v3395_v14 = vmul.f32 %v6782_v59, %v3381_v58 }
 0xd3a   : > { %v5553_v7 = vpop.eup %5552 }
 0xd3b   : > { %3576 = vmatmul.mubr.bf16.gmra.mxu1 %v3413_v9  ;;  %v3382_v13 = vmul.f32 %v5553_v7, %v3358_v57  ;;  %v6832_v17 = vadd.f32 %v6789_v39, %v3395_v14 }
 0xd3c   : > { %3585 = vmatprep.mubr.bf16.mxu1 %v5884_v0  ;;  %v5379_v0 = vld [vmem:[#allocation10 + $0x8] sm:$0xff]  }
 0xd3d   : > { %v3396_v33 = vmul.f32 %v6782_v59, %v3382_v13  ;;  %4815 = vmatpush3.bf16.msra.mxu0 %v5379_v0  ;;  %v5380_v59 = vld [vmem:[#allocation10 + $0x40] sm:$0xff]  }
 0xd3e   : > { %4816 = vmatprep.subr.bf16.mxu0 %v5380_v59 }
 0xd3f   : > { %v6835_v12 = vadd.f32 %v6789_v39, %v3396_v33  ;;  %v3431_v39 = vld [vmem:[%s7013_s8] sm:$0x3] }
 0xd40   : > { %v6847_v41 = vrot.slane %v3431_v39, %v7082_v22  ;;  %v6851_v43 = vrot.slane %v3431_v39, %v7083_v47 }
 0xd41   : > { %v3414_v16 = vpack.c.bf16 %v6835_v12, %v6832_v17  ;;  %4817 = vmatpush3.bf16.msra.mxu0 %v5381_v34 }
 0xd42   : > { %5129 = vmatprep.subr.bf16.mxu0 %v5885_v29 }
 0xd43   : > { %3586 = vmatmul.mubr.bf16.gmra.mxu1 %v3414_v16 }
 0xd44   : > { %5125 = vmatprep.mubr.msk.bf16.mxu1 %vm5886_vm0, %v5885_v29 }
 0xdbe   : > { %v3557_v30 = vpop.f32.mrf.mxu1 }
 0xdbf   : > { %v3558_v44 = vadd.f32 %v3557_v30, %v6851_v43 }
 0xdc0   : > { %v3559_v3 = vpop.f32.mrf.mxu1 }
 0xdc1   : > { %v3560_v45 = vadd.f32 %v3559_v3, %v6847_v41  ;;  %v3612_v61 = vmul.f32 0.01, %v3558_v44  ;;  %vm3596_vm7 = vcmp.gt.f32.partialorder %v3558_v44, 0.0 }
 0xdc2   : > { %v3561_v26 = vpop.f32.mrf.mxu1 }
 0xdc3   : > { %v3562_v38 = vadd.f32 %v3561_v26, %v6851_v43  ;;  %v3613_v54 = vmul.f32 0.01, %v3560_v45  ;;  %vm3597_vm6 = vcmp.gt.f32.partialorder %v3560_v45, 0.0  ;;  %v3628_v6 = vsel %vm3596_vm7, %v3558_v44, %v3612_v61 }
 0xdc4   : > { %v3563_v53 = vpop.f32.mrf.mxu1  ;;  %vm4063_vm7 = vcmask 1042434  }
 0xdc5   : > { %vm3598_vm5 = vcmp.gt.f32.partialorder %v3562_v38, 0.0  ;;  %v3614_v19 = vmul.f32 0.01, %v3562_v38  ;;  %v3564_v60 = vadd.f32 %v3563_v53, %v6847_v41  ;;  %v3629_v28 = vsel %vm3597_vm6, %v3560_v45, %v3613_v54 }
 0xdc6   : > { %v3567_v31 = vpop.f32.mrf.mxu1  ;;  %vm4061_vm6 = vcmask 1041409  }
 0xdc7   : > { %vm3599_vm8 = vcmp.gt.f32.partialorder %v3564_v60, 0.0  ;;  %v3615_v37 = vmul.f32 0.01, %v3564_v60  ;;  %v3630_v36 = vsel %vm3598_vm5, %v3562_v38, %v3614_v19  ;;  %v3568_v40 = vadd.f32 %v3567_v31, %v6851_v43 }
 0xdc8   : > { %v3569_v8 = vpop.f32.mrf.mxu1  ;;  %v3644_v46 = vpack.c.bf16 %v3630_v36, %v3628_v6 }
 0xdc9   : > { %v3570_v56 = vadd.f32 %v3569_v8, %v6847_v41  ;;  %v3631_v62 = vsel %vm3599_vm8, %v3564_v60, %v3615_v37  ;;  %v3616_v18 = vmul.f32 0.01, %v3568_v40  ;;  %vm3600_vm11 = vcmp.gt.f32.partialorder %v3568_v40, 0.0 }
 0xdca   : > { %v3571_v48 = vpop.f32.mrf.mxu1  ;;  %v3645_v11 = vpack.c.bf16 %v3631_v62, %v3629_v28  ;;  %vm4065_vm8 = vcmask 1043459  }
 0xdcb   : > { %v3572_v49 = vadd.f32 %v3571_v48, %v6851_v43  ;;  %v3617_v1 = vmul.f32 0.01, %v3570_v56  ;;  %vm3601_vm10 = vcmp.gt.f32.partialorder %v3570_v56, 0.0  ;;  %v3632_v23 = vsel %vm3600_vm11, %v3568_v40, %v3616_v18 }
 0xdcc   : > { %v3573_v27 = vpop.f32.mrf.mxu1  ;;  %3819 = vmatprep.mubr.bf16.mxu0 %v3645_v11 }
 0xdcd   : > { %vm3602_vm9 = vcmp.gt.f32.partialorder %v3572_v49, 0.0  ;;  %v3618_v52 = vmul.f32 0.01, %v3572_v49  ;;  %v3574_v42 = vadd.f32 %v3573_v27, %v6847_v41  ;;  %3820 = vmatmul.mubr.bf16.vlgmr.msra.gmra.mxu0 %v3644_v46  ;;  %v3633_v35 = vsel %vm3601_vm10, %v3570_v56, %v3617_v1 }
 0xdce   : > { %vm4387_vm10 = vcmask 1043456  }
 0xdcf   : > { %vm3603_vm12 = vcmp.gt.f32.partialorder %v3574_v42, 0.0  ;;  %v3619_v32 = vmul.f32 0.01, %v3574_v42  ;;  %v3634_v25 = vsel %vm3602_vm9, %v3572_v49, %v3618_v52 }
 0xdd0   : > { %v3646_v58 = vpack.c.bf16 %v3634_v25, %v3632_v23 }
 0xdd1   : > { %v3635_v24 = vsel %vm3603_vm12, %v3574_v42, %v3619_v32 }
 0xdd2   : > { %v3647_v20 = vpack.c.bf16 %v3635_v24, %v3633_v35 }
 0xdd4   : > { %3827 = vmatprep.mubr.bf16.mxu0 %v3647_v20 }
 0xdd5   : > { %3828 = vmatmul.mubr.bf16.gmra.mxu0 %v3646_v58 }
 0xdfb   : > { %v3577_v57 = vpop.f32.mrf.mxu1 }
 0xdfc   : > { %v3578_v13 = vadd.f32 %v3577_v57, %v6851_v43 }
 0xdfd   : > { %v3579_v9 = vpop.f32.mrf.mxu1 }
 0xdfe   : > { %v3580_v7 = vadd.f32 %v3579_v9, %v6847_v41  ;;  %v3620_v21 = vmul.f32 0.01, %v3578_v13  ;;  %vm3604_vm15 = vcmp.gt.f32.partialorder %v3578_v13, 0.0 }
 0xdff   : > { %v3581_v14 = vpop.f32.mrf.mxu1 }
 0xe00   : > { %v3582_v33 = vadd.f32 %v3581_v14, %v6851_v43  ;;  %v3621_v10 = vmul.f32 0.01, %v3580_v7  ;;  %vm3605_vm14 = vcmp.gt.f32.partialorder %v3580_v7, 0.0  ;;  %v3636_v26 = vsel %vm3604_vm15, %v3578_v13, %v3620_v21 }
 0xe01   : > { %v3583_v63 = vpop.f32.mrf.mxu1 }
 0xe02   : > { %vm3606_vm13 = vcmp.gt.f32.partialorder %v3582_v33, 0.0  ;;  %v3622_v16 = vmul.f32 0.01, %v3582_v33  ;;  %v3584_v50 = vadd.f32 %v3583_v63, %v6847_v41  ;;  %v3637_v47 = vsel %vm3605_vm14, %v3580_v7, %v3621_v10 }
 0xe03   : > { %v3587_v0 = vpop.f32.mrf.mxu1 }
 0xe04   : > { %vm3607_vm1 = vcmp.gt.f32.partialorder %v3584_v50, 0.0  ;;  %v3623_v59 = vmul.f32 0.01, %v3584_v50  ;;  %v3638_v39 = vsel %vm3606_vm13, %v3582_v33, %v3622_v16  ;;  %v3588_v3 = vadd.f32 %v3587_v0, %v6851_v43 }
 0xe05   : > { %v3589_v34 = vpop.f32.mrf.mxu1  ;;  %v3648_v53 = vpack.c.bf16 %v3638_v39, %v3636_v26 }
 0xe06   : > { %v3590_v22 = vadd.f32 %v3589_v34, %v6847_v41  ;;  %v3639_v30 = vsel %vm3607_vm1, %v3584_v50, %v3623_v59  ;;  %v3624_v31 = vmul.f32 0.01, %v3588_v3  ;;  %vm3608_vm4 = vcmp.gt.f32.partialorder %v3588_v3, 0.0 }
 0xe07   : > { %v3591_v45 = vpop.f32.mrf.mxu1  ;;  %v3649_v44 = vpack.c.bf16 %v3639_v30, %v3637_v47 }
 0xe08   : > { %v3592_v38 = vadd.f32 %v3591_v45, %v6851_v43  ;;  %v3625_v19 = vmul.f32 0.01, %v3590_v22  ;;  %vm3609_vm3 = vcmp.gt.f32.partialorder %v3590_v22, 0.0  ;;  %v3640_v62 = vsel %vm3608_vm4, %v3588_v3, %v3624_v31  ;;  %v5388_v31 = vld [vmem:[#allocation11 + $0x8] sm:$0xff]  }
 0xe09   : > { %v3593_v54 = vpop.f32.mrf.mxu1  ;;  %3835 = vmatprep.mubr.bf16.mxu0 %v3649_v44 }
 0xe0a   : > { %vm3610_vm2 = vcmp.gt.f32.partialorder %v3592_v38, 0.0  ;;  %v3626_v60 = vmul.f32 0.01, %v3592_v38  ;;  %v3594_v61 = vadd.f32 %v3593_v54, %v6847_v41  ;;  %3836 = vmatmul.mubr.bf16.gmra.mxu0 %v3648_v53  ;;  %v3641_v8 = vsel %vm3609_vm3, %v3590_v22, %v3625_v19  ;;  %v4662_v41 = vld [vmem:[%s7015_s10] ss:$0 sm:$0xff]  ;;  %v5382_v54 = vld [vmem:[#allocation11 + $0x38] sm:$0xff]  }
 0xe0b   : > { %5110 = vmatpush3.bf16.msra.mxu1 %v5382_v54  ;;  %v5385_v19 = vld [vmem:[#allocation11 + $0x20] sm:$0xff]  }
 0xe0c   : > { %vm3611_vm5 = vcmp.gt.f32.partialorder %v3594_v61, 0.0  ;;  %v3627_v37 = vmul.f32 0.01, %v3594_v61  ;;  %v3642_v36 = vsel %vm3610_vm2, %v3592_v38, %v3626_v60  ;;  %5111 = vmatprep.subr.bf16.mxu1 %v5885_v29  ;;  %v5386_v60 = vld [vmem:[#allocation11 + $0x18] sm:$0xff]  }
 0xe0d   : > { %v3650_v43 = vpack.c.bf16 %v3642_v36, %v3640_v62  ;;  %v5390_v36 = vld [vmem:[#allocation13 + $0x38] sm:$0xff]  }
 0xe0e   : > { %v3643_v56 = vsel %vm3611_vm5, %v3594_v61, %v3627_v37  ;;  %v5387_v61 = vld [vmem:[#allocation11 + $0x10] sm:$0xff]   ;;  %v5389_v37 = vld [vmem:[#allocation11] sm:$0xff]   ;;  %5130 = vmatpush3.bf16.msra.mxu0 %v5390_v36  ;;  %v5394_v62 = vld [vmem:[#allocation13 + $0x18] sm:$0xff]  }
 0xe0f   : > { %v3651_v28 = vpack.c.bf16 %v3643_v56, %v3641_v8  ;;  %v5391_v8 = vld [vmem:[#allocation13 + $0x30] sm:$0xff]   ;;  %5131 = vmatprep.subr.bf16.mxu0 %v5885_v29  ;;  %v5392_v56 = vld [vmem:[#allocation13 + $0x28] sm:$0xff]  }
 0xe11   : > { %3843 = vmatprep.mubr.bf16.mxu0 %v3651_v28  ;;  %v5393_v28 = vld [vmem:[#allocation13 + $0x20] sm:$0xff]  }
 0xe12   : > { %3844 = vmatmul.mubr.bf16.gmra.mxu0 %v3650_v43  ;;  %v5395_v43 = vld [vmem:[#allocation13 + $0x10] sm:$0xff]  }
 0xe13   : > { %5145 = vmatprep.mubr.msk.bf16.mxu0 %vm5886_vm0, %v5885_v29  ;;  %5132 = vmatpush3.bf16.msra.mxu0 %v5391_v8 }
 0xe14   : > { %5133 = vmatprep.subr.bf16.mxu0 %v5885_v29 }
 0xe17   : > { %5134 = vmatpush3.bf16.msra.mxu0 %v5392_v56 }
 0xe18   : > { %5135 = vmatprep.subr.bf16.mxu0 %v5885_v29 }
 0xe1b   : > { %5136 = vmatpush3.bf16.msra.mxu0 %v5393_v28 }
 0xe1c   : > { %5137 = vmatprep.subr.bf16.mxu0 %v5885_v29 }
 0xe1f   : > { %5138 = vmatpush3.bf16.msra.mxu0 %v5394_v62 }
 0xe20   : > { %5139 = vmatprep.subr.bf16.mxu0 %v5885_v29 }
 0xe23   : > { %5140 = vmatpush3.bf16.msra.mxu0 %v5395_v43 }
 0xe24   : > { %5141 = vmatprep.subr.bf16.mxu0 %v5885_v29 }
 0xe8d   : > { %v4818_v6 = vpop.f32.mrf.mxu0 }
 0xe8f   : > { %v4819_v40 = vpop.f32.mrf.mxu0 }
 0xe90   : > { %v4820_v48 = vadd.f32 %v4819_v40, %v4818_v6 }
 0xe91   : > { %v4821_v11 = vpop.f32.mrf.mxu0 }
 0xe92   : > { %v3822_v46 = vadd.f32 %v4820_v48, %v4662_v41 }
 0xe93   : > { %v4822_v49 = vpop.f32.mrf.mxu0 }
 0xe94   : > { %v4823_v27 = vadd.f32 %v4822_v49, %v4821_v11  ;;  %v6875_v1 = vadd.f32 %v3822_v46, %v6794_v51 }
 0xe95   : > { %v4824_v52 = vpop.f32.mrf.mxu0 }
 0xe96   : > { %v3825_v42 = vadd.f32 %v4823_v27, %v4662_v41  ;;  %3862 = vadd.xlane.f32.xlu0 %v6875_v1  ;;  %v3886_v35 = vmul.f32 %v6875_v1, %v6875_v1 }
 0xe97   : > { %v4825_v18 = vpop.f32.mrf.mxu0 }
 0xe98   : > { %v4826_v32 = vadd.f32 %v4825_v18, %v4824_v52  ;;  %v6879_v25 = vadd.f32 %v3825_v42, %v6797_v15 }
 0xe99   : > { %v4827_v24 = vpop.f32.mrf.mxu0 }
 0xe9a   : > { %v3830_v20 = vadd.f32 %v4826_v32, %v4662_v41  ;;  %3864 = vadd.xlane.f32.xlu1 %v6879_v25  ;;  %3894 = vadd.xlane.f32.xlu0 %v3886_v35  ;;  %v3887_v58 = vmul.f32 %v6879_v25, %v6879_v25 }
 0xe9b   : > { %v4828_v23 = vpop.f32.mrf.mxu0 }
 0xe9c   : > { %v4829_v51 = vadd.f32 %v4828_v23, %v4827_v24  ;;  %v6887_v57 = vadd.f32 %v3830_v20, %v6806_v55 }
 0xe9e   : > { %v3833_v9 = vadd.f32 %v4829_v51, %v4662_v41  ;;  %3896 = vadd.xlane.f32.xlu1 %v3887_v58  ;;  %3866 = vadd.xlane.f32.xlu0 %v6887_v57  ;;  %v3888_v7 = vmul.f32 %v6887_v57, %v6887_v57 }
 0xea0   : > { %v6891_v15 = vadd.f32 %v3833_v9, %v6809_v5 }
 0xea2   : > { %3868 = vadd.xlane.f32.xlu1 %v6891_v15  ;;  %3898 = vadd.xlane.f32.xlu0 %v3888_v7  ;;  %v3889_v13 = vmul.f32 %v6891_v15, %v6891_v15 }
 0xea6   : > { %3900 = vadd.xlane.f32.xlu1 %v3889_v13 }
 0xeca   : > { %v4830_v14 = vpop.f32.mrf.mxu0 }
 0xecc   : > { %v4831_v55 = vpop.f32.mrf.mxu0 }
 0xecd   : > { %v4832_v33 = vadd.f32 %v4831_v55, %v4830_v14 }
 0xece   : > { %v4833_v63 = vpop.f32.mrf.mxu0 }
 0xecf   : > { %v3838_v10 = vadd.f32 %v4832_v33, %v4662_v41 }
 0xed0   : > { %v4834_v16 = vpop.f32.mrf.mxu0 }
 0xed1   : > { %v4835_v50 = vadd.f32 %v4834_v16, %v4833_v63  ;;  %v6899_v5 = vadd.f32 %v3838_v10, %v6820_v2 }
 0xed2   : > { %v4836_v21 = vpop.f32.mrf.mxu0 }
 0xed3   : > { %v3841_v0 = vadd.f32 %v4835_v50, %v4662_v41  ;;  %3870 = vadd.xlane.f32.xlu0 %v6899_v5  ;;  %v3890_v22 = vmul.f32 %v6899_v5, %v6899_v5 }
 0xed4   : > { %v4837_v59 = vpop.f32.mrf.mxu0 }
 0xed5   : > { %v4838_v34 = vadd.f32 %v4837_v59, %v4836_v21  ;;  %v6903_v39 = vadd.f32 %v3841_v0, %v6823_v4 }
 0xed6   : > { %v4839_v47 = vpop.f32.mrf.mxu0 }
 0xed7   : > { %v3846_v30 = vadd.f32 %v4838_v34, %v4662_v41  ;;  %3872 = vadd.xlane.f32.xlu1 %v6903_v39  ;;  %3902 = vadd.xlane.f32.xlu0 %v3890_v22  ;;  %v3891_v45 = vmul.f32 %v6903_v39, %v6903_v39 }
 0xed8   : > { %v4840_v3 = vpop.f32.mrf.mxu0 }
 0xed9   : > { %v4841_v2 = vadd.f32 %v4840_v3, %v4839_v47  ;;  %v6911_v44 = vadd.f32 %v3846_v30, %v6832_v17  ;;  %v5383_v17 = vld [vmem:[#allocation11 + $0x30] sm:$0xff]  }
 0xeda   : > { %5112 = vmatpush3.bf16.msra.mxu1 %v5383_v17 }
 0xedb   : > { %v3849_v26 = vadd.f32 %v4841_v2, %v4662_v41  ;;  %3904 = vadd.xlane.f32.xlu1 %v3891_v45  ;;  %3874 = vadd.xlane.f32.xlu0 %v6911_v44  ;;  %v3892_v38 = vmul.f32 %v6911_v44, %v6911_v44 }
 0xedc   : > { %5113 = vmatprep.subr.bf16.mxu1 %v5885_v29 }
 0xedd   : > { %v6915_v4 = vadd.f32 %v3849_v26, %v6835_v12  ;;  %v5384_v12 = vld [vmem:[#allocation11 + $0x28] sm:$0xff]  }
 0xede   : > { %5114 = vmatpush3.bf16.msra.mxu1 %v5384_v12 }
 0xedf   : > { %3876 = vadd.xlane.f32.xlu1 %v6915_v4  ;;  %3906 = vadd.xlane.f32.xlu0 %v3892_v38  ;;  %v3893_v53 = vmul.f32 %v6915_v4, %v6915_v4 }
 0xee0   : > { %5115 = vmatprep.subr.bf16.mxu1 %v5885_v29 }
 0xee2   : > { %5116 = vmatpush3.bf16.msra.mxu1 %v5385_v19 }
 0xee3   : > { %3908 = vadd.xlane.f32.xlu1 %v3893_v53  ;;  %5117 = vmatprep.subr.bf16.mxu1 %v5885_v29 }
 0xee6   : > { %5118 = vmatpush3.bf16.msra.mxu1 %v5386_v60 }
 0xee7   : > { %5119 = vmatprep.subr.bf16.mxu1 %v5885_v29 }
 0xeea   : > { %5120 = vmatpush3.bf16.msra.mxu1 %v5387_v61 }
 0xeeb   : > { %5121 = vmatprep.subr.bf16.mxu1 %v5885_v29 }
 0xeee   : > { %5122 = vmatpush3.bf16.msra.mxu1 %v5388_v31 }
 0xeef   : > { %5123 = vmatprep.subr.bf16.mxu1 %v5885_v29 }
 0xef2   : > { %5124 = vmatpush3.bf16.msra.mxu1 %v5389_v37 }
 0xef3   : > { %5149 = vmatprep.subr.bf16.mxu1 %v5885_v29 }
 0xf1f   : > { %v3863_v41 = vpop.xlane.xlu0 %3862 }
 0xf20   : > { %v3878_v35 = vmul.f32 0.01, %v3863_v41 }
 0xf22   : > { %v3918_v13 = vmul.f32 %v3878_v35, %v3878_v35  ;;  %v3934_v8 = vsub.f32 %v6875_v1, %v3878_v35 }
 0xf23   : > { %v3865_v6 = vpop.xlane.xlu1 %3864  ;;  %v3895_v48 = vpop.xlane.xlu0 %3894 }
 0xf24   : > { %v3879_v52 = vmul.f32 0.01, %v3865_v6  ;;  %v3910_v58 = vmul.f32 0.01, %v3895_v48 }
 0xf26   : > { %v3919_v51 = vmul.f32 %v3879_v52, %v3879_v52  ;;  %v3926_v33 = vsub.f32 %v3910_v58, %v3918_v13  ;;  %v3935_v53 = vsub.f32 %v6879_v25, %v3879_v52 }
 0xf27   : > { %v3897_v40 = vpop.xlane.xlu1 %3896  ;;  %v3867_v46 = vpop.xlane.xlu0 %3866 }
 0xf28   : > { %v3880_v32 = vmul.f32 0.01, %v3867_v46  ;;  %v3911_v24 = vmul.f32 0.01, %v3897_v40  ;;  %v3942_v50 = vadd.f32 1e-05, %v3926_v33 }
 0xf2a   : > { %v3920_v7 = vmul.f32 %v3880_v32, %v3880_v32  ;;  %v3927_v14 = vsub.f32 %v3911_v24, %v3919_v51  ;;  %v3936_v54 = vsub.f32 %v6887_v57, %v3880_v32 }
 0xf2b   : > { %v3869_v11 = vpop.xlane.xlu1 %3868  ;;  %v3899_v42 = vpop.xlane.xlu0 %3898 }
 0xf2c   : > { %v3881_v27 = vmul.f32 0.01, %v3869_v11  ;;  %v3912_v23 = vmul.f32 0.01, %v3899_v42  ;;  %v3943_v10 = vadd.f32 1e-05, %v3927_v14 }
 0xf2e   : > { %v3921_v20 = vmul.f32 %v3881_v27, %v3881_v27  ;;  %v3928_v55 = vsub.f32 %v3912_v23, %v3920_v7  ;;  %v3937_v2 = vsub.f32 %v6891_v15, %v3881_v27  ;;  %v4679_v15 = vld [vmem:[%s7016_s11] ss:$0 sm:$0xff] }
 0xf2f   : > { %v3901_v49 = vpop.xlane.xlu1 %3900  ;;  %v4680_v27 = vld [vmem:[%s7084_s29] ss:$0 sm:$0xff] }
 0xf30   : > { %v3913_v18 = vmul.f32 0.01, %v3901_v49  ;;  %v3944_v16 = vadd.f32 1e-05, %v3928_v55 }
 0xf32   : > { %v3929_v9 = vsub.f32 %v3913_v18, %v3921_v20 }
 0xf34   : > { %v3945_v63 = vadd.f32 1e-05, %v3929_v9 }
 0xf36   : > { %5554 = vrsqrt.f32 %v3945_v63 }
 0xf37   : > { %5556 = vrsqrt.f32 %v3943_v10 }
 0xf38   : > { %5558 = vrsqrt.f32 %v3944_v16 }
 0xf39   : > { %5560 = vrsqrt.f32 %v3942_v50 }
 0xf43   : > { %v5555_v22 = vpop.eup %5554 }
 0xf44   : > { %v5557_v45 = vpop.eup %5556  ;;  %v3961_v17 = vmul.f32 %v5555_v22, %v3937_v2 }
 0xf45   : > { %v5559_v38 = vpop.eup %5558  ;;  %v3959_v56 = vmul.f32 %v5557_v45, %v3935_v53 }
 0xf46   : > { %v5561_v60 = vpop.eup %5560  ;;  %v3960_v28 = vmul.f32 %v5559_v38, %v3936_v54  ;;  %v3975_v57 = vmul.f32 %v4679_v15, %v3961_v17 }
 0xf47   : > { %v3958_v62 = vmul.f32 %v5561_v60, %v3934_v8  ;;  %v3973_v46 = vmul.f32 %v4679_v15, %v3959_v56 }
 0xf48   : > { %v3974_v49 = vmul.f32 %v4679_v15, %v3960_v28  ;;  %v3989_v18 = vadd.f32 %v4680_v27, %v3975_v57 }
 0xf49   : > { %v3972_v52 = vmul.f32 %v4679_v15, %v3958_v62  ;;  %v3987_v20 = vadd.f32 %v4680_v27, %v3973_v46 }
 0xf4a   : > { %v3988_v23 = vadd.f32 %v4680_v27, %v3974_v49 }
 0xf4b   : > { %v3986_v58 = vadd.f32 %v4680_v27, %v3972_v52 }
 0xf4c   : > { %v4001_v9 = vadd.f32 %v3989_v18, %v3988_v23 }
 0xf4d   : > { %v3994_v13 = vadd.f32 %v3987_v20, %v3986_v58 }
 0xf4e   : > { %v4002_v33 = vrot.slane %v4001_v9, 4 }
 0xf4f   : > { %v3995_v10 = vrot.slane %v3994_v13, 4 }
 0xf51   : > { %v3996_v22 = vadd.f32 %v3995_v10, %v3994_v13  ;;  %v5396_v13 = vld [vmem:[#allocation13 + $0x8] sm:$0xff]   ;;  %v5401_v10 = vld [vmem:[#allocation14 + $0x20] sm:$0xff]  }
 0xf52   : > { %5142 = vmatpush3.bf16.msra.mxu0 %v5396_v13 }
 0xf53   : > { %v3997_v54 = vrot.slane %v3996_v22, 2  ;;  %5143 = vmatprep.subr.bf16.mxu0 %v5885_v29 }
 0xf5c   : > { %v3871_v21 = vpop.xlane.xlu0 %3870 }
 0xf5d   : > { %v3882_v0 = vmul.f32 0.01, %v3871_v21  ;;  %v4003_v21 = vadd.f32 %v4002_v33, %v4001_v9  ;;  %v5399_v33 = vld [vmem:[#allocation14 + $0x30] sm:$0xff]  }
 0xf5f   : > { %v3922_v47 = vmul.f32 %v3882_v0, %v3882_v0  ;;  %v3938_v14 = vsub.f32 %v6899_v5, %v3882_v0  ;;  %v4004_v5 = vrot.slane %v4003_v21, 2 }
 0xf60   : > { %v3873_v59 = vpop.xlane.xlu1 %3872  ;;  %v3903_v34 = vpop.xlane.xlu0 %3902 }
 0xf61   : > { %v3883_v30 = vmul.f32 0.01, %v3873_v59  ;;  %v3914_v3 = vmul.f32 0.01, %v3903_v34 }
 0xf63   : > { %v3930_v26 = vsub.f32 %v3914_v3, %v3922_v47  ;;  %v3923_v61 = vmul.f32 %v3883_v30, %v3883_v30  ;;  %v3939_v16 = vsub.f32 %v6903_v39, %v3883_v30 }
 0xf64   : > { %v3905_v12 = vpop.xlane.xlu1 %3904  ;;  %v3875_v19 = vpop.xlane.xlu0 %3874 }
 0xf65   : > { %v3946_v31 = vadd.f32 1e-05, %v3930_v26  ;;  %v3915_v37 = vmul.f32 0.01, %v3905_v12  ;;  %v3884_v36 = vmul.f32 0.01, %v3875_v19  ;;  %v4005_v19 = vadd.f32 %v4004_v5, %v4003_v21 }
 0xf66   : > { %v4681_v21 = vld [vmem:[%s7085_s13] ss:$0 sm:$0xff]  ;;  %s4412_s13 = scalar_lea.hbm %s7088_s16, %s4709_s18 }
 0xf67   : > { %5562 = vrsqrt.f32 %v3946_v31  ;;  %v3931_v25 = vsub.f32 %v3915_v37, %v3923_v61  ;;  %v3924_v40 = vmul.f32 %v3884_v36, %v3884_v36  ;;  %v3940_v3 = vsub.f32 %v6911_v44, %v3884_v36  ;;  %v5405_v5 = vld [vmem:[#allocation14] sm:$0xff]  }
 0xf68   : > { %v3877_v43 = vpop.xlane.xlu1 %3876  ;;  %v3907_v6 = vpop.xlane.xlu0 %3906  ;;  %v3998_v61 = vadd.f32 %v3997_v54, %v3996_v22  ;;  %v4006_v44 = vrot.slane %v4005_v19, 1 }
 0xf69   : > { %v3947_v41 = vadd.f32 1e-05, %v3931_v25  ;;  %v3885_v48 = vmul.f32 0.01, %v3877_v43  ;;  %v3916_v11 = vmul.f32 0.01, %v3907_v6 }
 0xf6a   : > { %v3999_v28 = vrot.slane %v3998_v61, 1  ;;  %v4007_v62 = vadd.f32 %v4006_v44, %v4005_v19 }
 0xf6b   : > { %5564 = vrsqrt.f32 %v3947_v41  ;;  %v3932_v1 = vsub.f32 %v3916_v11, %v3924_v40  ;;  %v3925_v32 = vmul.f32 %v3885_v48, %v3885_v48  ;;  %v3941_v53 = vsub.f32 %v6915_v4, %v3885_v48 }
 0xf6c   : > { %v3909_v42 = vpop.xlane.xlu1 %3908  ;;  %v4000_v4 = vadd.f32 %v3999_v28, %v3998_v61  ;;  %v4023_v48 = vmul.f32 0.0625, %v4007_v62 }
 0xf6d   : > { %v3948_v35 = vadd.f32 1e-05, %v3932_v1  ;;  %v3917_v24 = vmul.f32 0.01, %v3909_v42 }
 0xf6e   : > { %v4027_v1 = vpack.c.bf16 %v4023_v48, %v4023_v48 }
 0xf6f   : > { %5566 = vrsqrt.f32 %v3948_v35  ;;  %v3933_v51 = vsub.f32 %v3917_v24, %v3925_v32 }
 0xf70   : > { %v4058_v32 = vunpack.c.l.b16 %v4027_v1 }
 0xf71   : > { %v3949_v7 = vadd.f32 1e-05, %v3933_v51 }
 0xf73   : > { %5568 = vrsqrt.f32 %v3949_v7 }
 0xf74   : > { %v5563_v55 = vpop.eup %5562 }
 0xf75   : > { %v3962_v63 = vmul.f32 %v5563_v55, %v3938_v14  ;;  %v5397_v14 = vld [vmem:[#allocation13] sm:$0xff]   ;;  %v5398_v55 = vld [vmem:[#allocation14 + $0x38] sm:$0xff]  }
 0xf76   : > { %5144 = vmatpush3.bf16.msra.mxu0 %v5397_v14 }
 0xf77   : > { %v3976_v59 = vmul.f32 %v4679_v15, %v3962_v63  ;;  %v5400_v63 = vld [vmem:[#allocation14 + $0x28] sm:$0xff]  }
 0xf78   : > { %v5565_v50 = vpop.eup %5564 }
 0xf79   : > { %v3963_v34 = vmul.f32 %v5565_v50, %v3939_v16  ;;  %v3990_v45 = vadd.f32 %v4680_v27, %v3976_v59  ;;  %v5402_v16 = vld [vmem:[#allocation14 + $0x18] sm:$0xff]   ;;  %v5403_v50 = vld [vmem:[#allocation14 + $0x10] sm:$0xff]  }
 0xf7b   : > { %v3977_v47 = vmul.f32 %v4679_v15, %v3963_v34 }
 0xf7c   : > { %v5567_v2 = vpop.eup %5566 }
 0xf7d   : > { %v3991_v26 = vadd.f32 %v4680_v27, %v3977_v47  ;;  %v3964_v38 = vmul.f32 %v5567_v2, %v3940_v3 }
 0xf7f   : > { %v4008_v0 = vadd.f32 %v3991_v26, %v3990_v45  ;;  %v3978_v39 = vmul.f32 %v4679_v15, %v3964_v38  ;;  %v5404_v38 = vld [vmem:[#allocation14 + $0x8] sm:$0xff]  }
 0xf80   : > { %v5569_v17 = vpop.eup %5568 }
 0xf81   : > { %v4009_v12 = vrot.slane %v4008_v0, 4  ;;  %v3965_v30 = vmul.f32 %v5569_v17, %v3941_v53  ;;  %v3992_v37 = vadd.f32 %v4680_v27, %v3978_v39 }
 0xf83   : > { %v3979_v60 = vmul.f32 %v4679_v15, %v3965_v30  ;;  %v4010_v31 = vadd.f32 %v4009_v12, %v4008_v0  ;;  %v4022_v15 = vmul.f32 0.0625, %v4000_v4  ;;  %v4690_v0 = vld [vmem:[%s7086_s1] ss:$0 sm:$0xff]  ;;  %s5890_s1 = smov [#allocation16]  }
 0xf84   : > { %s5792_s12 = sshll.u32 %s5890_s1, 4  ;;  %s5793_s12 = int_to_ptr.vmem [resolvable:$false] %s5792_s12 }
 0xf85   : > { %v3993_v8 = vadd.f32 %v4680_v27, %v3979_v60  ;;  %v4011_v36 = vrot.slane %v4010_v31, 2  ;;  %v4026_v42 = vpack.c.bf16 %v4022_v15, %v4022_v15  ;;  %s5794_s2 = scalar_lea.vmem %s5793_s12, 128  ;;  %p5795_p10 = scmp.lt.s32.totalorder %s4415_s3, %s5793_s12 }
 0xf86   : > { %p5796_p3 = scmp.lt.s32.totalorder %s5794_s2, %s5788_s17 }
 0xf87   : > { %v4015_v56 = vadd.f32 %v3993_v8, %v3992_v37  ;;  %v4012_v25 = vadd.f32 %v4011_v36, %v4010_v31  ;;  %v4057_v20 = vunpack.c.l.b16 %v4026_v42 }
 0xf88   : > { %p5797_p8 = por %p5796_p3, %p5795_p10 }
 0xf89   : > { %v4013_v57 = vrot.slane %v4012_v25, 1  ;;  %v4016_v43 = vrot.slane %v4015_v56, 4  ;;  %v4062_v51 = vsel %vm4061_vm6, %v4058_v32, %v4057_v20 }
 0xf8a   : > { %p5798_p6 = pnand %p5797_p8, %p5791_p12 }
 0xf8b   : > { %v4014_v6 = vadd.f32 %v4013_v57, %v4012_v25  ;;  %v4017_v41 = vadd.f32 %v4016_v43, %v4015_v56 }
 0xf8d   : > { %v4018_v40 = vrot.slane %v4017_v41, 2  ;;  %v4024_v11 = vmul.f32 0.0625, %v4014_v6 }
 0xf8f   : > { %v4019_v46 = vadd.f32 %v4018_v40, %v4017_v41  ;;  %v4028_v52 = vpack.c.bf16 %v4024_v11, %v4024_v11 }
 0xf91   : > { %v4020_v49 = vrot.slane %v4019_v46, 1  ;;  %v4059_v35 = vunpack.c.l.b16 %v4028_v52 }
 0xf93   : > { %v4021_v27 = vadd.f32 %v4020_v49, %v4019_v46  ;;  %v4064_v58 = vsel %vm4063_vm7, %v4059_v35, %v4062_v51 }
 0xf95   : > { %v4025_v18 = vmul.f32 0.0625, %v4021_v27 }
 0xf97   : > { %v4029_v24 = vpack.c.bf16 %v4025_v18, %v4025_v18 }
 0xf99   : > { %v4060_v23 = vunpack.c.l.b16 %v4029_v24 }
 0xf9b   : > { %v4066_v9 = vsel %vm4065_vm8, %v4060_v23, %v4064_v58 }
 0xf9c   : > { %v4067_v7 = vpack.c.b16 %v4066_v9, %v4066_v9 }
 0xf9e   : > { %5126 = vmatmul.mubr.bf16.vlgmr.msra.gmra.mxu1 %v4067_v7 }
 0xf9f   : > { %5165 = vmatprep.mubr.msk.bf16.mxu1 %vm5886_vm0, %v5885_v29  ;;  %5150 = vmatpush3.bf16.msra.mxu1 %v5398_v55 }
 0xfa0   : > { %5151 = vmatprep.subr.bf16.mxu1 %v5885_v29 }
 0xfa3   : > { %5152 = vmatpush3.bf16.msra.mxu1 %v5399_v33 }
 0xfa4   : > { %5153 = vmatprep.subr.bf16.mxu1 %v5885_v29 }
 0xfa7   : > { %5154 = vmatpush3.bf16.msra.mxu1 %v5400_v63 }
 0xfa8   : > { %5155 = vmatprep.subr.bf16.mxu1 %v5885_v29 }
 0xfab   : > { %5156 = vmatpush3.bf16.msra.mxu1 %v5401_v10 }
 0xfac   : > { %5157 = vmatprep.subr.bf16.mxu1 %v5885_v29 }
 0xfaf   : > { %5158 = vmatpush3.bf16.msra.mxu1 %v5402_v16 }
 0xfb0   : > { %5159 = vmatprep.subr.bf16.mxu1 %v5885_v29 }
 0xfb3   : > { %5160 = vmatpush3.bf16.msra.mxu1 %v5403_v50 }
 0xfb4   : > { %5161 = vmatprep.subr.bf16.mxu1 %v5885_v29 }
 0xfb7   : > { %5162 = vmatpush3.bf16.msra.mxu1 %v5404_v38 }
 0xfb8   : > { %5163 = vmatprep.subr.bf16.mxu1 %v5885_v29  ;;  %v4699_v29 = vld [vmem:[%s7087_s9] ss:$0 sm:$0xff] }
 0xfbb   : > { %5164 = vmatpush3.bf16.msra.mxu1 %v5405_v5 }
0x105e   : > { %v4151_v59 = vpop.f32.mrf.mxu1 }
0x105f   : > { %v4152_v34 = vadd.f32 %v4681_v21, %v4151_v59 }
0x1060   : > { %v5127_v22 = vpop.f32.mrf.mxu1 }
0x1061   : > { %vm4157_vm0 = vcmp.gt.f32.partialorder %v4152_v34, 0.0  ;;  %v4158_v47 = vmul.f32 0.01, %v4152_v34 }
0x1062   : > { %v4154_v3 = vpop.f32.mrf.mxu1 }
0x1063   : > { %v4159_v2 = vsel %vm4157_vm0, %v4152_v34, %v4158_v47 }
0x1064   : > { %v4160_v45 = vpack.c.bf16 %v4159_v2, %v4159_v2  ;;  %v5128_v26 = vpop.f32.mrf.mxu1 }
0x1066   : > { %5146 = vmatmul.mubr.bf16.vlgmr.msra.gmra.mxu0 %v4160_v45 }
0x1126   : > { %v4266_v53 = vpop.f32.mrf.mxu0 }
0x1127   : > { %v4267_v54 = vadd.f32 %v4690_v0, %v4266_v53 }
0x1128   : > { %v5147_v17 = vpop.f32.mrf.mxu0 }
0x1129   : > { %vm4272_vm9 = vcmp.gt.f32.partialorder %v4267_v54, 0.0  ;;  %v4273_v12 = vmul.f32 0.01, %v4267_v54 }
0x112a   : > { %v4269_v39 = vpop.f32.mrf.mxu0 }
0x112b   : > { %v4274_v30 = vsel %vm4272_vm9, %v4267_v54, %v4273_v12 }
0x112c   : > { %v4275_v19 = vpack.c.bf16 %v4274_v30, %v4274_v30  ;;  %v5148_v60 = vpop.f32.mrf.mxu0 }
0x112e   : > { %5166 = vmatmul.mubr.bf16.vlgmr.msra.gmra.mxu1 %v4275_v19 }
0x11ee   : > { %v4381_v61 = vpop.f32.mrf.mxu1 }
0x11ef   : > { %v4382_v31 = vadd.f32 %v4699_v29, %v4381_v61 }
0x11f0   : > { %v5167_v37 = vpop.f32.mrf.mxu1 }
0x11f1   : > { %v4388_v8 = vsel %vm4387_vm10, %v4382_v31, -inf }
0x11f2   : > { %4389 = vmax.xlane.f32.xlu0 %v4388_v8  ;;  %v4384_v44 = vpop.f32.mrf.mxu1 }
0x11f4   : > { %v5168_v36 = vpop.f32.mrf.mxu1 }
0x127b   : > { %v4390_v56 = vpop.xlane.xlu0 %4389 }
0x127c   : > { %v4391_v28 = vsub.f32 %v4382_v31, %v4390_v56 }
0x127e   : > { %v4392_v25 = vmul.f32 1.442695, %v4391_v28 }
0x1280   : > { %5570 = vpow2.f32 %v4392_v25 }
0x128d   : > { %v5571_v62 = vpop.eup %5570 }
0x128e   : > { %v4394_v57 = vsel %vm4387_vm10, %v5571_v62, 0.0 }
0x128f   : > { %4395 = vadd.xlane.f32.xlu1 %v4394_v57 }
0x1318   : > { %v4396_v43 = vpop.xlane.xlu1 %4395 }
0x1319   : > { %5572 = vrcp.f32 %v4396_v43 }
0x1326   : > { %v5573_v4 = vpop.eup %5572 }
0x1327   : > { %v4398_v6 = vmul.f32 %v5573_v4, %v5571_v62 }
0x1329   : > { %4399 = vst [vmem:[%s723_s27] sm:$0xf] %v4398_v6 }
0x132a   : > { %5801 = shalt.err (!%p5798_p6)
}
0x132b   : > { %s5802_s7 = scalar_lea.hbm %s4412_s13, 64  ;;  %s5806_s23 = scalar_lea.hbm %s7088_s16, 128 }
0x132c   : > { %p5803_p1 = scmp.ne.s32.totalorder %s4412_s13, %s5802_s7  ;;  %p5807_p0 = scmp.lt.s32.totalorder %s4412_s13, %s7088_s16 }
0x132d   : > { %p5808_p2 = scmp.lt.s32.totalorder %s5806_s23, %s5802_s7 }
0x132e   : > { %p5804_p4 = pnand %p5803_p1, %p7089_p11 }
0x132f   : > { %p5809_p5 = por %p5808_p2, %p5807_p0 }
0x1330   : > { %p5805_p13 = pneg %p5804_p4 }
0x1332   : > { %p5810_p9 = pnand %p5809_p5, %p5805_p13 }
0x1334   : > { %5813 = shalt.err (!%p5810_p9)
}
0x1335   : > { %5199 = dma.vmem_to_hbm [thread:$0]  (%p7089_p11), %s4415_s3, 64, %s4412_s13, %s4401_s14  }
0x1336 PF: > { %s4426_s29 = sand.u32 1, %s5856_s0   ;;  %p7090_p7 = scmp.ne.s32.totalorder %s7062_s28, 0 }
0x1337   : > { %p7091_p12 = scmp.ge.s32.totalorder %s5868_s21, 2  ;;  %s4427_s22 = scalar_lea.sflag [#allocation4], %s4426_s29 }
0x1339   : > { %p5228_p10 = pnand %p7091_p12, %p7090_p7 }
0x133b   : > { %p5229_p3 = pneg %p5228_p10 }
0x133d   : > { %5851 = dma.done.wait (%p5229_p3), %s4427_s22, 64  }
0x133e   : > { %5853 = vsyncadd (%p5229_p3), %s4427_s22, 4294967232  ;;  %p36_p8 = scmp.ge.s32.totalorder %s6102_s26, 4   ;;  %s7092_s0 = smov %s5860_s30 }
0x133f   : > { %s7093_s30 = smov %s5864_s20  ;;  %s7094_s20 = smov %s6114_s24 }
0x1340   : > { %s7095_s21 = smov %s6102_s26  ;;  %38 = sbr.rel (!%p36_p8) target bundleno = 24 (0x18), region = 169 }
0x1345   :  { %4432 = vsyncpa [#allocation3], 1 }
0x1346   :  { %4434 = vsyncpa [#allocation3 + $0x1], 1 }
0x1347   :  { %4435 = vsyncpa [#allocation6], 1 }
0x1348   :  { %4436 = vsyncpa [#allocation9], 1 }
0x1349   :  { %4437 = vsyncpa [#allocation12], 1 }
0x134a   :  { %4438 = vsyncpa [#allocation15], 1 }
0x134b   :  { %4439 = vsyncpa [#allocation4], 1 }
0x134c   :  { %4441 = vsyncpa [#allocation4 + $0x1], 1 }

</bundles_post_ra>
